<compile_context>
chip_gen: v7x
topology: tpu7x:2x2x1
jax: 0.10.0
libtpu: 0.0.40
codegen_flags: <defaults>
</compile_context>

<pallas_src>
from functools import partial

import jax
import jax.numpy as jnp
from jax import lax
from jax.experimental import pallas as pl
from jax.experimental.pallas import tpu as pltpu


def _prb_kernel(x_ref,       # (T, Bblk, LCi)       f32
                wp_ref,      # (Tc, LCi, LCi)       bf16  pconv taps, kron(eyeL, wp)
                w1_ref,      # (3, LCi, LCm)        bf16  conv1 T-taps, L-banded
                w2_ref,      # (3, LCm, LCo)        bf16  conv2 T-taps, L-banded
                wd_ref,      # (LCi, LCo)           bf16  downsample 1x1, block-diag
                bias_ref,    # (1, LCi+LCm+2*LCo)   f32   [bp | b1 | b2 | bd]
                o_ref,       # (T, Bblk, LCo)       f32
                pad1_ref,    # (T+2, Bblk, LCi)     bf16  scratch
                pad2_ref):   # (T+2, Bblk, LCm)     bf16  scratch
    T, Bblk, LCi = x_ref.shape
    LCm = w1_ref.shape[2]
    LCo = w2_ref.shape[2]
    Tc = T - 1
    bf16 = jnp.bfloat16

    bp = bias_ref[:, :LCi]
    b1 = bias_ref[:, LCi:LCi + LCm]
    b2 = bias_ref[:, LCi + LCm:LCi + LCm + LCo]
    bd = bias_ref[:, LCi + LCm + LCo:]

    x = x_ref[...]                      # (T, Bblk, LCi) f32
    xb = x.astype(bf16)                 # MXU operand (pconv taps, pad1 write, downsample)

    # ---- pconv: relu(BN(conv_{(Tc,1)}(contexts))) as Tc K=128 matmuls, back-to-back
    #      into one f32 accumulator (no duplicated flattened-context HBM input).
    pred = jnp.dot(xb[0], wp_ref[0], preferred_element_type=jnp.float32)
    for kh in range(1, Tc):
        pred = pred + jnp.dot(xb[kh], wp_ref[kh], preferred_element_type=jnp.float32)
    pred = jnp.maximum(pred + bp, 0.0)                        # (Bblk, LCi) f32

    # ---- prediction errors = relu(choices) - predictions
    pred_err = jnp.maximum(x[Tc], 0.0) - pred                 # (Bblk, LCi) f32

    # ---- out0 = cat(contexts, prediction_errors) along T, written T-padded into a
    #      bf16 scratch; only the two zero border rows are extra writes.
    zci = jnp.zeros((1, Bblk, LCi), bf16)
    pad1_ref[0:1] = zci
    pad1_ref[T + 1:T + 2] = zci
    pad1_ref[1:1 + Tc] = xb[:Tc]
    pad1_ref[1 + Tc:2 + Tc] = pred_err.astype(bf16)[None]

    # ---- conv1 (3x3): 3 banded matmuls (one per T tap).  Each tap slice is a pure
    #      leading-dim view of the scratch; K = LCi, N = LCm, M = T*Bblk.
    acc1 = jnp.dot(pad1_ref[0:T].reshape(T * Bblk, LCi), w1_ref[0],
                   preferred_element_type=jnp.float32)
    for dh in range(1, 3):
        acc1 = acc1 + jnp.dot(pad1_ref[dh:dh + T].reshape(T * Bblk, LCi), w1_ref[dh],
                              preferred_element_type=jnp.float32)
    h1 = jnp.maximum(acc1 + b1, 0.0)                          # (T*Bblk, LCm) f32

    # ---- conv2 (3x3): same structure; K = LCm, N = LCo.
    zcm = jnp.zeros((1, Bblk, LCm), bf16)
    pad2_ref[0:1] = zcm
    pad2_ref[T + 1:T + 2] = zcm
    pad2_ref[1:1 + T] = h1.astype(bf16).reshape(T, Bblk, LCm)

    acc2 = jnp.dot(pad2_ref[0:T].reshape(T * Bblk, LCm), w2_ref[0],
                   preferred_element_type=jnp.float32)
    for dh in range(1, 3):
        acc2 = acc2 + jnp.dot(pad2_ref[dh:dh + T].reshape(T * Bblk, LCm), w2_ref[dh],
                              preferred_element_type=jnp.float32)
    h2 = jnp.maximum(acc2 + b2, 0.0)                          # (T*Bblk, LCo) f32

    # ---- identity = downsample(x): 1x1 conv (block-diag weight) + BN bias, no ReLU.
    iden = jnp.dot(xb.reshape(T * Bblk, LCi), wd_ref[...],
                   preferred_element_type=jnp.float32) + bd

    # ---- dropout(p=0) is identity; residual add, lane-dense (128-lane) store.
    o_ref[...] = (h2 + iden).reshape(T, Bblk, LCo).astype(o_ref.dtype)


def _pick_block_b(B, T):
    """Pick a batch chunk: multiple of 8 (or the whole batch), capped at 128,
    preferring >= 4 grid steps and a matmul M-dim (Bblk*T) >= 256."""
    ok = [d for d in range(1, B + 1) if B % d == 0 and (d % 8 == 0 or d == B)]
    for min_steps, min_m in ((4, 256), (4, 0), (2, 0), (1, 0)):
        cand = [d for d in ok if B // d >= min_steps and d * T >= min_m and d <= 128]
        if cand:
            return max(cand)
    return B


@partial(jax.jit, static_argnames=("block_b",))
def predictive_reasoning_block(x_nhwc, params, *, block_b=None):
    """x_nhwc: (B, T, L, Cin) float32.  Returns (B, T, L, Cout) float32."""
    B, T, L, Cin = x_nhwc.shape
    wp, sp, bp, w1, s1, b1, w2, s2, b2, wd, sd, bd = params
    Tc = T - 1
    Cmd = w1.shape[3]
    Cout = w2.shape[3]
    LCi, LCm, LCo = L * Cin, L * Cmd, L * Cout

    Bblk = _pick_block_b(B, T) if block_b is None else block_b
    assert B % Bblk == 0 and (Bblk % 8 == 0 or Bblk == B), "bad block_b"
    grid = (B // Bblk,)

    bf16 = jnp.bfloat16
    eyeL = jnp.eye(L, dtype=jnp.float32)

    # Fold BN scale into the conv weights (scale acts on the output channel).
    wp_s = wp * sp[0]            # (Tc, Cin, Cin)
    w1_s = w1 * s1[0]            # (3, 3, Cin, Cmd)
    w2_s = w2 * s2[0]            # (3, 3, Cmd, Cout)
    wd_s = wd * sd[0]            # (Cin, Cout)

    # pconv taps as per-tap block-diagonal weights: (Tc, L*Cin, L*Cin).
    wp_t = jnp.stack([jnp.kron(eyeL, wp_s[kh]) for kh in range(Tc)], axis=0)

    # 3x3 conv as banded matmuls over the L axis: (3, L*Ci, L*Co), one per T-tap.
    def band(w):
        return jnp.stack([
            sum(jnp.kron(jnp.eye(L, k=1 - dw, dtype=jnp.float32), w[dh, dw])
                for dw in range(3))
            for dh in range(3)], axis=0)

    w1_b = band(w1_s)
    w2_b = band(w2_s)
    wd_b = jnp.kron(eyeL, wd_s)                                   # (L*Cin, L*Cout)

    # All bias rows packed into one lane-dense row [bp | b1 | b2 | bd], tiled over L
    # (l-outer, c-inner -- must match the kron(eyeL, .) flattening).
    bias_all = jnp.concatenate(
        [jnp.tile(bp[0], L), jnp.tile(b1[0], L),
         jnp.tile(b2[0], L), jnp.tile(bd[0], L)])[None, :].astype(jnp.float32)

    wp_t, w1_b, w2_b, wd_b = (a.astype(bf16) for a in (wp_t, w1_b, w2_b, wd_b))

    # Lane-dense (T, B, L*C) activations: T-tap slices / reshapes inside the kernel
    # are then pure leading-dim views.
    x3 = jnp.transpose(x_nhwc.reshape(B, T, LCi), (1, 0, 2)).astype(jnp.float32)

    # VMEM budget for the chosen Bblk: ~1 MiB bf16 weights (x2 buffers), plus
    # double-buffered x/out blocks, bf16 pad scratches and f32 matmul temporaries
    # scaling with Bblk.  Clamped to [32 MiB, 64 MiB] (v7x physical VMEM is 64 MiB).
    weight_bytes = 2 * (Tc * LCi * LCi + 3 * LCi * LCm + 3 * LCm * LCo + LCi * LCo)
    per_row = (T * (LCi + LCo) * 4 * 2            # x / out blocks, double-buffered
               + (T + 2) * (LCi + LCm) * 2        # bf16 pad scratches
               + T * (LCi + 3 * LCm + 3 * LCo) * 4)   # f32 temporaries
    vmem_limit = int(min(64 * 1024 * 1024,
                         max(32 * 1024 * 1024,
                             2 * (2 * weight_bytes + Bblk * per_row))))

    grid_spec = pltpu.PrefetchScalarGridSpec(
        num_scalar_prefetch=0,
        grid=grid,
        in_specs=[
            pl.BlockSpec((T, Bblk, LCi), lambda i: (0, i, 0)),
            pl.BlockSpec((Tc, LCi, LCi), lambda i: (0, 0, 0)),
            pl.BlockSpec((3, LCi, LCm), lambda i: (0, 0, 0)),
            pl.BlockSpec((3, LCm, LCo), lambda i: (0, 0, 0)),
            pl.BlockSpec((LCi, LCo), lambda i: (0, 0)),
            pl.BlockSpec((1, LCi + LCm + 2 * LCo), lambda i: (0, 0)),
        ],
        out_specs=pl.BlockSpec((T, Bblk, LCo), lambda i: (0, i, 0)),
        scratch_shapes=[
            pltpu.VMEM((T + 2, Bblk, LCi), jnp.bfloat16),
            pltpu.VMEM((T + 2, Bblk, LCm), jnp.bfloat16),
        ],
    )

    out_tbl = pl.pallas_call(
        _prb_kernel,
        out_shape=jax.ShapeDtypeStruct((T, B, LCo), jnp.float32),
        grid_spec=grid_spec,
        compiler_params=pltpu.CompilerParams(
            dimension_semantics=("parallel",),
            vmem_limit_bytes=vmem_limit,
        ),
    )(x3, wp_t, w1_b, w2_b, wd_b, bias_all)

    # (T, B, L*Cout) -> (B, T, L, Cout)
    return jnp.transpose(out_tbl, (1, 0, 2)).reshape(B, T, L, Cout)


# ----------------------------- pure-JAX reference -----------------------------
def reference(x_nhwc, params):
    wp, sp, bp, w1, s1, b1, w2, s2, b2, wd, sd, bd = params
    HI = lax.Precision.HIGHEST
    B, T, L, Cin = x_nhwc.shape
    Tc = T - 1
    dn = ('NHWC', 'HWIO', 'NHWC')

    def conv(a, w, pad):
        return lax.conv_general_dilated(a, w, (1, 1), pad,
                                        dimension_numbers=dn, precision=HI)

    x = x_nhwc.astype(jnp.float32)
    contexts, choices = x[:, :Tc], x[:, Tc:]
    pred = jax.nn.relu(conv(contexts, wp[:, None], 'VALID') * sp + bp)   # (B,1,L,Cin)
    perr = jax.nn.relu(choices) - pred
    out0 = jnp.concatenate([contexts, perr], axis=1)
    h1 = jax.nn.relu(conv(out0, w1, ((1, 1), (1, 1))) * s1 + b1)
    h2 = jax.nn.relu(conv(h1, w2, ((1, 1), (1, 1))) * s2 + b2)
    iden = conv(x, wd[None, None], 'VALID') * sd + bd
    return h2 + iden


def fold_bn(key, c):
    kg, kb, km, kv = jax.random.split(key, 4)
    gamma = 1.0 + 0.1 * jax.random.normal(kg, (c,), jnp.float32)
    beta = 0.1 * jax.random.normal(kb, (c,), jnp.float32)
    mean = 0.1 * jax.random.normal(km, (c,), jnp.float32)
    var = 0.5 + 0.1 * jnp.abs(jax.random.normal(kv, (c,), jnp.float32))
    scale = gamma / jnp.sqrt(var + 1e-5)
    bias = beta - mean * scale
    return scale[None, :], bias[None, :]


if __name__ == "__main__":
    key = jax.random.PRNGKey(0)
    # Module-consistent shapes: 8 context rows + 1 choice row, 16 "l" positions,
    # 8 in/out channels (md_planes = 4*ou_planes = 32).  B=64 -> Bblk=16, 4 grid steps.
    B, Cin, Cout, num_contexts, L = 64, 8, 8, 8, 16
    Cmd = Cout * 4
    T = num_contexts + 1

    ks = jax.random.split(key, 9)
    # Input in the PyTorch layout (b, c, t, l), moved to kernel wrapper layout (b, t, l, c).
    x_nchw = jax.random.normal(ks[0], (B, Cin, T, L), jnp.float32)
    x = jnp.transpose(x_nchw, (0, 2, 3, 1))

    # Deterministic synthetic parameters (conv weights in HWIO-ish layouts).
    wp = 0.2 * jax.random.normal(ks[1], (num_contexts, Cin, Cin), jnp.float32)  # (kh, ci, co)
    w1 = 0.2 * jax.random.normal(ks[2], (3, 3, Cin, Cmd), jnp.float32)
    w2 = 0.2 * jax.random.normal(ks[3], (3, 3, Cmd, Cout), jnp.float32)
    wd = 0.2 * jax.random.normal(ks[4], (Cin, Cout), jnp.float32)
    sp, bp = fold_bn(ks[5], Cin)
    s1, b1 = fold_bn(ks[6], Cmd)
    s2, b2 = fold_bn(ks[7], Cout)
    sd, bd = fold_bn(ks[8], Cout)
    params = (wp, sp, bp, w1, s1, b1, w2, s2, b2, wd, sd, bd)

    out = jax.block_until_ready(predictive_reasoning_block(x, params))
    ref = reference(x, params)

    assert out.shape == (B, T, L, Cout)
    # bf16 MXU inputs with f32 accumulation: bf16-level tolerance relative to the
    # reference's dynamic range.
    err = float(jnp.max(jnp.abs(out - ref)))
    scale = float(jnp.max(jnp.abs(ref)))
    if err > 3e-2 * scale + 1e-3:
        raise AssertionError(
            f"mismatch vs reference: max abs err = {err}, max |ref| = {scale}")
    print("KERNEL_OK")
</pallas_src>

<mosaic_0001>
module attributes {stable_mosaic.version = 11 : i64} {
  func.func @_prb_kernel(%arg0: i32, %arg1: memref<9x16x128xf32, #tpu.memory_space<vmem>>, %arg2: memref<8x128x128xbf16, #tpu.memory_space<vmem>>, %arg3: memref<3x128x512xbf16, #tpu.memory_space<vmem>>, %arg4: memref<3x512x128xbf16, #tpu.memory_space<vmem>>, %arg5: memref<128x128xbf16, #tpu.memory_space<vmem>>, %arg6: memref<1x896xf32, #tpu.memory_space<vmem>>, %arg7: memref<9x16x128xf32, #tpu.memory_space<vmem>>, %arg8: memref<11x16x128xbf16, #tpu.memory_space<vmem>>, %arg9: memref<11x16x512xbf16, #tpu.memory_space<vmem>>) attributes {dimension_semantics = [#tpu.dimension_semantics<parallel>], iteration_bounds = array<i64: 4>, scalar_prefetch = 0 : i64, scratch_operands = 2 : i64, tpu.core_type = #tpu.core_type<tc>, window_params = [{transform_indices = @transform_0, window_bounds = array<i64: 9, 16, 128>}, {pipeline_mode = #tpu.pipeline_mode<synchronous>, transform_indices = @transform_1, window_bounds = array<i64: 8, 128, 128>}, {pipeline_mode = #tpu.pipeline_mode<synchronous>, transform_indices = @transform_2, window_bounds = array<i64: 3, 128, 512>}, {pipeline_mode = #tpu.pipeline_mode<synchronous>, transform_indices = @transform_3, window_bounds = array<i64: 3, 512, 128>}, {pipeline_mode = #tpu.pipeline_mode<synchronous>, transform_indices = @transform_4, window_bounds = array<i64: 128, 128>}, {pipeline_mode = #tpu.pipeline_mode<synchronous>, transform_indices = @transform_5, window_bounds = array<i64: 1, 896>}, {transform_indices = @transform_6, window_bounds = array<i64: 9, 16, 128>}]} {
    %c0 = arith.constant 0 : index
    %c0_0 = arith.constant 0 : index
    %0 = vector.load %arg6[%c0, %c0_0] : memref<1x896xf32, #tpu.memory_space<vmem>>, vector<1x128xf32>
    %c0_1 = arith.constant 0 : index
    %c128 = arith.constant 128 : index
    %1 = vector.load %arg6[%c0_1, %c128] : memref<1x896xf32, #tpu.memory_space<vmem>>, vector<1x512xf32>
    %c0_2 = arith.constant 0 : index
    %c640 = arith.constant 640 : index
    %2 = vector.load %arg6[%c0_2, %c640] : memref<1x896xf32, #tpu.memory_space<vmem>>, vector<1x128xf32>
    %c0_3 = arith.constant 0 : index
    %c768 = arith.constant 768 : index
    %3 = vector.load %arg6[%c0_3, %c768] : memref<1x896xf32, #tpu.memory_space<vmem>>, vector<1x128xf32>
    %c0_4 = arith.constant 0 : index
    %c0_5 = arith.constant 0 : index
    %c0_6 = arith.constant 0 : index
    %4 = vector.load %arg1[%c0_4, %c0_5, %c0_6] : memref<9x16x128xf32, #tpu.memory_space<vmem>>, vector<9x16x128xf32>
    %5 = arith.truncf %4 : vector<9x16x128xf32> to vector<9x16x128xbf16>
    %6 = vector.extract_strided_slice %5 {offsets = [0, 0, 0], sizes = [1, 16, 128], strides = [1, 1, 1]} : vector<9x16x128xbf16> to vector<1x16x128xbf16>
    %7 = vector.shape_cast %6 : vector<1x16x128xbf16> to vector<16x128xbf16>
    %c0_7 = arith.constant 0 : index
    %c0_8 = arith.constant 0 : index
    %c0_9 = arith.constant 0 : index
    %8 = vector.load %arg2[%c0_7, %c0_8, %c0_9] : memref<8x128x128xbf16, #tpu.memory_space<vmem>>, vector<1x128x128xbf16>
    %9 = vector.shape_cast %8 : vector<1x128x128xbf16> to vector<128x128xbf16>
    %cst = arith.constant dense<0.000000e+00> : vector<16x128xf32>
    %10 = tpu.matmul %7, %9, %cst {dimension_numbers = #tpu.dot_dimension_numbers<[1], [0], [0], [1], [0, 0, 1, 1], [], []>} : vector<16x128xbf16>, vector<128x128xbf16>, vector<16x128xf32> -> vector<16x128xf32>
    %11 = vector.extract_strided_slice %5 {offsets = [1, 0, 0], sizes = [1, 16, 128], strides = [1, 1, 1]} : vector<9x16x128xbf16> to vector<1x16x128xbf16>
    %12 = vector.shape_cast %11 : vector<1x16x128xbf16> to vector<16x128xbf16>
    %c1 = arith.constant 1 : index
    %c0_10 = arith.constant 0 : index
    %c0_11 = arith.constant 0 : index
    %13 = vector.load %arg2[%c1, %c0_10, %c0_11] : memref<8x128x128xbf16, #tpu.memory_space<vmem>>, vector<1x128x128xbf16>
    %14 = vector.shape_cast %13 : vector<1x128x128xbf16> to vector<128x128xbf16>
    %cst_12 = arith.constant dense<0.000000e+00> : vector<16x128xf32>
    %15 = tpu.matmul %12, %14, %cst_12 {dimension_numbers = #tpu.dot_dimension_numbers<[1], [0], [0], [1], [0, 0, 1, 1], [], []>} : vector<16x128xbf16>, vector<128x128xbf16>, vector<16x128xf32> -> vector<16x128xf32>
    %16 = arith.addf %10, %15 : vector<16x128xf32>
    %17 = vector.extract_strided_slice %5 {offsets = [2, 0, 0], sizes = [1, 16, 128], strides = [1, 1, 1]} : vector<9x16x128xbf16> to vector<1x16x128xbf16>
    %18 = vector.shape_cast %17 : vector<1x16x128xbf16> to vector<16x128xbf16>
    %c2 = arith.constant 2 : index
    %c0_13 = arith.constant 0 : index
    %c0_14 = arith.constant 0 : index
    %19 = vector.load %arg2[%c2, %c0_13, %c0_14] : memref<8x128x128xbf16, #tpu.memory_space<vmem>>, vector<1x128x128xbf16>
    %20 = vector.shape_cast %19 : vector<1x128x128xbf16> to vector<128x128xbf16>
    %cst_15 = arith.constant dense<0.000000e+00> : vector<16x128xf32>
    %21 = tpu.matmul %18, %20, %cst_15 {dimension_numbers = #tpu.dot_dimension_numbers<[1], [0], [0], [1], [0, 0, 1, 1], [], []>} : vector<16x128xbf16>, vector<128x128xbf16>, vector<16x128xf32> -> vector<16x128xf32>
    %22 = arith.addf %16, %21 : vector<16x128xf32>
    %23 = vector.extract_strided_slice %5 {offsets = [3, 0, 0], sizes = [1, 16, 128], strides = [1, 1, 1]} : vector<9x16x128xbf16> to vector<1x16x128xbf16>
    %24 = vector.shape_cast %23 : vector<1x16x128xbf16> to vector<16x128xbf16>
    %c3 = arith.constant 3 : index
    %c0_16 = arith.constant 0 : index
    %c0_17 = arith.constant 0 : index
    %25 = vector.load %arg2[%c3, %c0_16, %c0_17] : memref<8x128x128xbf16, #tpu.memory_space<vmem>>, vector<1x128x128xbf16>
    %26 = vector.shape_cast %25 : vector<1x128x128xbf16> to vector<128x128xbf16>
    %cst_18 = arith.constant dense<0.000000e+00> : vector<16x128xf32>
    %27 = tpu.matmul %24, %26, %cst_18 {dimension_numbers = #tpu.dot_dimension_numbers<[1], [0], [0], [1], [0, 0, 1, 1], [], []>} : vector<16x128xbf16>, vector<128x128xbf16>, vector<16x128xf32> -> vector<16x128xf32>
    %28 = arith.addf %22, %27 : vector<16x128xf32>
    %29 = vector.extract_strided_slice %5 {offsets = [4, 0, 0], sizes = [1, 16, 128], strides = [1, 1, 1]} : vector<9x16x128xbf16> to vector<1x16x128xbf16>
    %30 = vector.shape_cast %29 : vector<1x16x128xbf16> to vector<16x128xbf16>
    %c4 = arith.constant 4 : index
    %c0_19 = arith.constant 0 : index
    %c0_20 = arith.constant 0 : index
    %31 = vector.load %arg2[%c4, %c0_19, %c0_20] : memref<8x128x128xbf16, #tpu.memory_space<vmem>>, vector<1x128x128xbf16>
    %32 = vector.shape_cast %31 : vector<1x128x128xbf16> to vector<128x128xbf16>
    %cst_21 = arith.constant dense<0.000000e+00> : vector<16x128xf32>
    %33 = tpu.matmul %30, %32, %cst_21 {dimension_numbers = #tpu.dot_dimension_numbers<[1], [0], [0], [1], [0, 0, 1, 1], [], []>} : vector<16x128xbf16>, vector<128x128xbf16>, vector<16x128xf32> -> vector<16x128xf32>
    %34 = arith.addf %28, %33 : vector<16x128xf32>
    %35 = vector.extract_strided_slice %5 {offsets = [5, 0, 0], sizes = [1, 16, 128], strides = [1, 1, 1]} : vector<9x16x128xbf16> to vector<1x16x128xbf16>
    %36 = vector.shape_cast %35 : vector<1x16x128xbf16> to vector<16x128xbf16>
    %c5 = arith.constant 5 : index
    %c0_22 = arith.constant 0 : index
    %c0_23 = arith.constant 0 : index
    %37 = vector.load %arg2[%c5, %c0_22, %c0_23] : memref<8x128x128xbf16, #tpu.memory_space<vmem>>, vector<1x128x128xbf16>
    %38 = vector.shape_cast %37 : vector<1x128x128xbf16> to vector<128x128xbf16>
    %cst_24 = arith.constant dense<0.000000e+00> : vector<16x128xf32>
    %39 = tpu.matmul %36, %38, %cst_24 {dimension_numbers = #tpu.dot_dimension_numbers<[1], [0], [0], [1], [0, 0, 1, 1], [], []>} : vector<16x128xbf16>, vector<128x128xbf16>, vector<16x128xf32> -> vector<16x128xf32>
    %40 = arith.addf %34, %39 : vector<16x128xf32>
    %41 = vector.extract_strided_slice %5 {offsets = [6, 0, 0], sizes = [1, 16, 128], strides = [1, 1, 1]} : vector<9x16x128xbf16> to vector<1x16x128xbf16>
    %42 = vector.shape_cast %41 : vector<1x16x128xbf16> to vector<16x128xbf16>
    %c6 = arith.constant 6 : index
    %c0_25 = arith.constant 0 : index
    %c0_26 = arith.constant 0 : index
    %43 = vector.load %arg2[%c6, %c0_25, %c0_26] : memref<8x128x128xbf16, #tpu.memory_space<vmem>>, vector<1x128x128xbf16>
    %44 = vector.shape_cast %43 : vector<1x128x128xbf16> to vector<128x128xbf16>
    %cst_27 = arith.constant dense<0.000000e+00> : vector<16x128xf32>
    %45 = tpu.matmul %42, %44, %cst_27 {dimension_numbers = #tpu.dot_dimension_numbers<[1], [0], [0], [1], [0, 0, 1, 1], [], []>} : vector<16x128xbf16>, vector<128x128xbf16>, vector<16x128xf32> -> vector<16x128xf32>
    %46 = arith.addf %40, %45 : vector<16x128xf32>
    %47 = vector.extract_strided_slice %5 {offsets = [7, 0, 0], sizes = [1, 16, 128], strides = [1, 1, 1]} : vector<9x16x128xbf16> to vector<1x16x128xbf16>
    %48 = vector.shape_cast %47 : vector<1x16x128xbf16> to vector<16x128xbf16>
    %c7 = arith.constant 7 : index
    %c0_28 = arith.constant 0 : index
    %c0_29 = arith.constant 0 : index
    %49 = vector.load %arg2[%c7, %c0_28, %c0_29] : memref<8x128x128xbf16, #tpu.memory_space<vmem>>, vector<1x128x128xbf16>
    %50 = vector.shape_cast %49 : vector<1x128x128xbf16> to vector<128x128xbf16>
    %cst_30 = arith.constant dense<0.000000e+00> : vector<16x128xf32>
    %51 = tpu.matmul %48, %50, %cst_30 {dimension_numbers = #tpu.dot_dimension_numbers<[1], [0], [0], [1], [0, 0, 1, 1], [], []>} : vector<16x128xbf16>, vector<128x128xbf16>, vector<16x128xf32> -> vector<16x128xf32>
    %52 = arith.addf %46, %51 : vector<16x128xf32>
    %53 = vector.broadcast %0 : vector<1x128xf32> to vector<16x128xf32>
    %54 = arith.addf %52, %53 : vector<16x128xf32>
    %cst_31 = arith.constant 0.000000e+00 : f32
    %55 = vector.broadcast %cst_31 : f32 to vector<16x128xf32>
    %56 = arith.maximumf %54, %55 : vector<16x128xf32>
    %57 = vector.extract_strided_slice %4 {offsets = [8, 0, 0], sizes = [1, 16, 128], strides = [1, 1, 1]} : vector<9x16x128xf32> to vector<1x16x128xf32>
    %58 = vector.shape_cast %57 : vector<1x16x128xf32> to vector<16x128xf32>
    %cst_32 = arith.constant 0.000000e+00 : f32
    %59 = vector.broadcast %cst_32 : f32 to vector<16x128xf32>
    %60 = arith.maximumf %58, %59 : vector<16x128xf32>
    %61 = arith.subf %60, %56 : vector<16x128xf32>
    %cst_33 = arith.constant 0.000000e+00 : bf16
    %62 = vector.broadcast %cst_33 : bf16 to vector<1x16x128xbf16>
    %c0_34 = arith.constant 0 : index
    %c0_35 = arith.constant 0 : index
    %c0_36 = arith.constant 0 : index
    %63 = vector.load %arg8[%c0_34, %c0_35, %c0_36] : memref<11x16x128xbf16, #tpu.memory_space<vmem>>, vector<1x16x128xbf16>
    tpu.vector_store %arg8[%c0_34, %c0_35, %c0_36], %62 {strides = array<i32>} : memref<11x16x128xbf16, #tpu.memory_space<vmem>>, vector<1x16x128xbf16>,
    %c10 = arith.constant 10 : index
    %c0_37 = arith.constant 0 : index
    %c0_38 = arith.constant 0 : index
    %64 = vector.load %arg8[%c10, %c0_37, %c0_38] : memref<11x16x128xbf16, #tpu.memory_space<vmem>>, vector<1x16x128xbf16>
    tpu.vector_store %arg8[%c10, %c0_37, %c0_38], %62 {strides = array<i32>} : memref<11x16x128xbf16, #tpu.memory_space<vmem>>, vector<1x16x128xbf16>,
    %65 = vector.extract_strided_slice %5 {offsets = [0, 0, 0], sizes = [8, 16, 128], strides = [1, 1, 1]} : vector<9x16x128xbf16> to vector<8x16x128xbf16>
    %c1_39 = arith.constant 1 : index
    %c0_40 = arith.constant 0 : index
    %c0_41 = arith.constant 0 : index
    %66 = vector.load %arg8[%c1_39, %c0_40, %c0_41] : memref<11x16x128xbf16, #tpu.memory_space<vmem>>, vector<8x16x128xbf16>
    tpu.vector_store %arg8[%c1_39, %c0_40, %c0_41], %65 {strides = array<i32>} : memref<11x16x128xbf16, #tpu.memory_space<vmem>>, vector<8x16x128xbf16>,
    %67 = arith.truncf %61 : vector<16x128xf32> to vector<16x128xbf16>
    %68 = vector.shape_cast %67 : vector<16x128xbf16> to vector<1x16x128xbf16>
    %c9 = arith.constant 9 : index
    %c0_42 = arith.constant 0 : index
    %c0_43 = arith.constant 0 : index
    %69 = vector.load %arg8[%c9, %c0_42, %c0_43] : memref<11x16x128xbf16, #tpu.memory_space<vmem>>, vector<1x16x128xbf16>
    tpu.vector_store %arg8[%c9, %c0_42, %c0_43], %68 {strides = array<i32>} : memref<11x16x128xbf16, #tpu.memory_space<vmem>>, vector<1x16x128xbf16>,
    %c0_44 = arith.constant 0 : index
    %c0_45 = arith.constant 0 : index
    %c0_46 = arith.constant 0 : index
    %70 = vector.load %arg8[%c0_44, %c0_45, %c0_46] : memref<11x16x128xbf16, #tpu.memory_space<vmem>>, vector<9x16x128xbf16>
    %71 = vector.shape_cast %70 : vector<9x16x128xbf16> to vector<144x128xbf16>
    %c0_47 = arith.constant 0 : index
    %c0_48 = arith.constant 0 : index
    %c0_49 = arith.constant 0 : index
    %72 = vector.load %arg3[%c0_47, %c0_48, %c0_49] : memref<3x128x512xbf16, #tpu.memory_space<vmem>>, vector<1x128x512xbf16>
    %73 = vector.shape_cast %72 : vector<1x128x512xbf16> to vector<128x512xbf16>
    %cst_50 = arith.constant dense<0.000000e+00> : vector<144x512xf32>
    %74 = tpu.matmul %71, %73, %cst_50 {dimension_numbers = #tpu.dot_dimension_numbers<[1], [0], [0], [1], [0, 0, 1, 1], [], []>} : vector<144x128xbf16>, vector<128x512xbf16>, vector<144x512xf32> -> vector<144x512xf32>
    %c1_51 = arith.constant 1 : index
    %c0_52 = arith.constant 0 : index
    %c0_53 = arith.constant 0 : index
    %75 = vector.load %arg8[%c1_51, %c0_52, %c0_53] : memref<11x16x128xbf16, #tpu.memory_space<vmem>>, vector<9x16x128xbf16>
    %76 = vector.shape_cast %75 : vector<9x16x128xbf16> to vector<144x128xbf16>
    %c1_54 = arith.constant 1 : index
    %c0_55 = arith.constant 0 : index
    %c0_56 = arith.constant 0 : index
    %77 = vector.load %arg3[%c1_54, %c0_55, %c0_56] : memref<3x128x512xbf16, #tpu.memory_space<vmem>>, vector<1x128x512xbf16>
    %78 = vector.shape_cast %77 : vector<1x128x512xbf16> to vector<128x512xbf16>
    %cst_57 = arith.constant dense<0.000000e+00> : vector<144x512xf32>
    %79 = tpu.matmul %76, %78, %cst_57 {dimension_numbers = #tpu.dot_dimension_numbers<[1], [0], [0], [1], [0, 0, 1, 1], [], []>} : vector<144x128xbf16>, vector<128x512xbf16>, vector<144x512xf32> -> vector<144x512xf32>
    %80 = arith.addf %74, %79 : vector<144x512xf32>
    %c2_58 = arith.constant 2 : index
    %c0_59 = arith.constant 0 : index
    %c0_60 = arith.constant 0 : index
    %81 = vector.load %arg8[%c2_58, %c0_59, %c0_60] : memref<11x16x128xbf16, #tpu.memory_space<vmem>>, vector<9x16x128xbf16>
    %82 = vector.shape_cast %81 : vector<9x16x128xbf16> to vector<144x128xbf16>
    %c2_61 = arith.constant 2 : index
    %c0_62 = arith.constant 0 : index
    %c0_63 = arith.constant 0 : index
    %83 = vector.load %arg3[%c2_61, %c0_62, %c0_63] : memref<3x128x512xbf16, #tpu.memory_space<vmem>>, vector<1x128x512xbf16>
    %84 = vector.shape_cast %83 : vector<1x128x512xbf16> to vector<128x512xbf16>
    %cst_64 = arith.constant dense<0.000000e+00> : vector<144x512xf32>
    %85 = tpu.matmul %82, %84, %cst_64 {dimension_numbers = #tpu.dot_dimension_numbers<[1], [0], [0], [1], [0, 0, 1, 1], [], []>} : vector<144x128xbf16>, vector<128x512xbf16>, vector<144x512xf32> -> vector<144x512xf32>
    %86 = arith.addf %80, %85 : vector<144x512xf32>
    %87 = vector.broadcast %1 : vector<1x512xf32> to vector<144x512xf32>
    %88 = arith.addf %86, %87 : vector<144x512xf32>
    %cst_65 = arith.constant 0.000000e+00 : f32
    %89 = vector.broadcast %cst_65 : f32 to vector<144x512xf32>
    %90 = arith.maximumf %88, %89 : vector<144x512xf32>
    %cst_66 = arith.constant 0.000000e+00 : bf16
    %91 = vector.broadcast %cst_66 : bf16 to vector<1x16x512xbf16>
    %c0_67 = arith.constant 0 : index
    %c0_68 = arith.constant 0 : index
    %c0_69 = arith.constant 0 : index
    %92 = vector.load %arg9[%c0_67, %c0_68, %c0_69] : memref<11x16x512xbf16, #tpu.memory_space<vmem>>, vector<1x16x512xbf16>
    tpu.vector_store %arg9[%c0_67, %c0_68, %c0_69], %91 {strides = array<i32>} : memref<11x16x512xbf16, #tpu.memory_space<vmem>>, vector<1x16x512xbf16>,
    %c10_70 = arith.constant 10 : index
    %c0_71 = arith.constant 0 : index
    %c0_72 = arith.constant 0 : index
    %93 = vector.load %arg9[%c10_70, %c0_71, %c0_72] : memref<11x16x512xbf16, #tpu.memory_space<vmem>>, vector<1x16x512xbf16>
    tpu.vector_store %arg9[%c10_70, %c0_71, %c0_72], %91 {strides = array<i32>} : memref<11x16x512xbf16, #tpu.memory_space<vmem>>, vector<1x16x512xbf16>,
    %94 = arith.truncf %90 : vector<144x512xf32> to vector<144x512xbf16>
    %95 = vector.shape_cast %94 : vector<144x512xbf16> to vector<9x16x512xbf16>
    %c1_73 = arith.constant 1 : index
    %c0_74 = arith.constant 0 : index
    %c0_75 = arith.constant 0 : index
    %96 = vector.load %arg9[%c1_73, %c0_74, %c0_75] : memref<11x16x512xbf16, #tpu.memory_space<vmem>>, vector<9x16x512xbf16>
    tpu.vector_store %arg9[%c1_73, %c0_74, %c0_75], %95 {strides = array<i32>} : memref<11x16x512xbf16, #tpu.memory_space<vmem>>, vector<9x16x512xbf16>,
    %c0_76 = arith.constant 0 : index
    %c0_77 = arith.constant 0 : index
    %c0_78 = arith.constant 0 : index
    %97 = vector.load %arg9[%c0_76, %c0_77, %c0_78] : memref<11x16x512xbf16, #tpu.memory_space<vmem>>, vector<9x16x512xbf16>
    %98 = vector.shape_cast %97 : vector<9x16x512xbf16> to vector<144x512xbf16>
    %c0_79 = arith.constant 0 : index
    %c0_80 = arith.constant 0 : index
    %c0_81 = arith.constant 0 : index
    %99 = vector.load %arg4[%c0_79, %c0_80, %c0_81] : memref<3x512x128xbf16, #tpu.memory_space<vmem>>, vector<1x512x128xbf16>
    %100 = vector.shape_cast %99 : vector<1x512x128xbf16> to vector<512x128xbf16>
    %cst_82 = arith.constant dense<0.000000e+00> : vector<144x128xf32>
    %101 = tpu.matmul %98, %100, %cst_82 {dimension_numbers = #tpu.dot_dimension_numbers<[1], [0], [0], [1], [0, 0, 1, 1], [], []>} : vector<144x512xbf16>, vector<512x128xbf16>, vector<144x128xf32> -> vector<144x128xf32>
    %c1_83 = arith.constant 1 : index
    %c0_84 = arith.constant 0 : index
    %c0_85 = arith.constant 0 : index
    %102 = vector.load %arg9[%c1_83, %c0_84, %c0_85] : memref<11x16x512xbf16, #tpu.memory_space<vmem>>, vector<9x16x512xbf16>
    %103 = vector.shape_cast %102 : vector<9x16x512xbf16> to vector<144x512xbf16>
    %c1_86 = arith.constant 1 : index
    %c0_87 = arith.constant 0 : index
    %c0_88 = arith.constant 0 : index
    %104 = vector.load %arg4[%c1_86, %c0_87, %c0_88] : memref<3x512x128xbf16, #tpu.memory_space<vmem>>, vector<1x512x128xbf16>
    %105 = vector.shape_cast %104 : vector<1x512x128xbf16> to vector<512x128xbf16>
    %cst_89 = arith.constant dense<0.000000e+00> : vector<144x128xf32>
    %106 = tpu.matmul %103, %105, %cst_89 {dimension_numbers = #tpu.dot_dimension_numbers<[1], [0], [0], [1], [0, 0, 1, 1], [], []>} : vector<144x512xbf16>, vector<512x128xbf16>, vector<144x128xf32> -> vector<144x128xf32>
    %107 = arith.addf %101, %106 : vector<144x128xf32>
    %c2_90 = arith.constant 2 : index
    %c0_91 = arith.constant 0 : index
    %c0_92 = arith.constant 0 : index
    %108 = vector.load %arg9[%c2_90, %c0_91, %c0_92] : memref<11x16x512xbf16, #tpu.memory_space<vmem>>, vector<9x16x512xbf16>
    %109 = vector.shape_cast %108 : vector<9x16x512xbf16> to vector<144x512xbf16>
    %c2_93 = arith.constant 2 : index
    %c0_94 = arith.constant 0 : index
    %c0_95 = arith.constant 0 : index
    %110 = vector.load %arg4[%c2_93, %c0_94, %c0_95] : memref<3x512x128xbf16, #tpu.memory_space<vmem>>, vector<1x512x128xbf16>
    %111 = vector.shape_cast %110 : vector<1x512x128xbf16> to vector<512x128xbf16>
    %cst_96 = arith.constant dense<0.000000e+00> : vector<144x128xf32>
    %112 = tpu.matmul %109, %111, %cst_96 {dimension_numbers = #tpu.dot_dimension_numbers<[1], [0], [0], [1], [0, 0, 1, 1], [], []>} : vector<144x512xbf16>, vector<512x128xbf16>, vector<144x128xf32> -> vector<144x128xf32>
    %113 = arith.addf %107, %112 : vector<144x128xf32>
    %114 = vector.broadcast %2 : vector<1x128xf32> to vector<144x128xf32>
    %115 = arith.addf %113, %114 : vector<144x128xf32>
    %cst_97 = arith.constant 0.000000e+00 : f32
    %116 = vector.broadcast %cst_97 : f32 to vector<144x128xf32>
    %117 = arith.maximumf %115, %116 : vector<144x128xf32>
    %118 = vector.shape_cast %5 : vector<9x16x128xbf16> to vector<144x128xbf16>
    %c0_98 = arith.constant 0 : index
    %c0_99 = arith.constant 0 : index
    %119 = vector.load %arg5[%c0_98, %c0_99] : memref<128x128xbf16, #tpu.memory_space<vmem>>, vector<128x128xbf16>
    %cst_100 = arith.constant dense<0.000000e+00> : vector<144x128xf32>
    %120 = tpu.matmul %118, %119, %cst_100 {dimension_numbers = #tpu.dot_dimension_numbers<[1], [0], [0], [1], [0, 0, 1, 1], [], []>} : vector<144x128xbf16>, vector<128x128xbf16>, vector<144x128xf32> -> vector<144x128xf32>
    %121 = vector.broadcast %3 : vector<1x128xf32> to vector<144x128xf32>
    %122 = arith.addf %120, %121 : vector<144x128xf32>
    %123 = arith.addf %117, %122 : vector<144x128xf32>
    %124 = vector.shape_cast %123 : vector<144x128xf32> to vector<9x16x128xf32>
    %c0_101 = arith.constant 0 : index
    %c0_102 = arith.constant 0 : index
    %c0_103 = arith.constant 0 : index
    %125 = vector.load %arg7[%c0_101, %c0_102, %c0_103] : memref<9x16x128xf32, #tpu.memory_space<vmem>>, vector<9x16x128xf32>
    tpu.vector_store %arg7[%c0_101, %c0_102, %c0_103], %124 {strides = array<i32>} : memref<9x16x128xf32, #tpu.memory_space<vmem>>, vector<9x16x128xf32>,
    return
  }
  func.func @transform_0(%arg0: i32) -> (i32, i32, i32) {
    %c0_i32 = arith.constant 0 : i32
    %c0_i32_0 = arith.constant 0 : i32
    %c0_i32_1 = arith.constant 0 : i32
    return %c0_i32, %arg0, %c0_i32_0 : i32, i32, i32
  }
  func.func @transform_1(%arg0: i32) -> (i32, i32, i32) {
    %c0_i32 = arith.constant 0 : i32
    %c0_i32_0 = arith.constant 0 : i32
    %c0_i32_1 = arith.constant 0 : i32
    %c0_i32_2 = arith.constant 0 : i32
    return %c0_i32, %c0_i32_0, %c0_i32_1 : i32, i32, i32
  }
  func.func @transform_2(%arg0: i32) -> (i32, i32, i32) {
    %c0_i32 = arith.constant 0 : i32
    %c0_i32_0 = arith.constant 0 : i32
    %c0_i32_1 = arith.constant 0 : i32
    %c0_i32_2 = arith.constant 0 : i32
    return %c0_i32, %c0_i32_0, %c0_i32_1 : i32, i32, i32
  }
  func.func @transform_3(%arg0: i32) -> (i32, i32, i32) {
    %c0_i32 = arith.constant 0 : i32
    %c0_i32_0 = arith.constant 0 : i32
    %c0_i32_1 = arith.constant 0 : i32
    %c0_i32_2 = arith.constant 0 : i32
    return %c0_i32, %c0_i32_0, %c0_i32_1 : i32, i32, i32
  }
  func.func @transform_4(%arg0: i32) -> (i32, i32) {
    %c0_i32 = arith.constant 0 : i32
    %c0_i32_0 = arith.constant 0 : i32
    %c0_i32_1 = arith.constant 0 : i32
    return %c0_i32, %c0_i32_0 : i32, i32
  }
  func.func @transform_5(%arg0: i32) -> (i32, i32) {
    %c0_i32 = arith.constant 0 : i32
    %c0_i32_0 = arith.constant 0 : i32
    %c0_i32_1 = arith.constant 0 : i32
    return %c0_i32, %c0_i32_0 : i32, i32
  }
  func.func @transform_6(%arg0: i32) -> (i32, i32, i32) {
    %c0_i32 = arith.constant 0 : i32
    %c0_i32_0 = arith.constant 0 : i32
    %c0_i32_1 = arith.constant 0 : i32
    return %c0_i32, %arg0, %c0_i32_0 : i32, i32, i32
  }
}

</mosaic_0001>

<bundles_post_ra>
// kernel: tile.30
= control target key start
LH: loop header
LB: loop body
LE: loop exit
PB: predicated region body
PF: predicated region fallthrough
CT: control target
= control target key end

     0   :  { %s28_s0 = inlined_call_operand.vmem [shape: f32[8], index: 0, kind: input, shape index: {}]   ;;  %s29_s1 = inlined_call_operand.vmem [shape: f32[16,8], index: 1, kind: output, shape index: {}]  }
   0x1   :  { %v4_v0 = vld [vmem:[%s28_s0] ss:$0 sm:$0xff] }
   0x2   :  { %5 = vst [vmem:[%s29_s1] sm:$0xff] %v4_v0  ;;  %8 = vst [vmem:[%s29_s1 + $0x8] sm:$0xff] %v4_v0 }

// kernel: tile.31
= control target key start
LH: loop header
LB: loop body
LE: loop exit
PB: predicated region body
PF: predicated region fallthrough
CT: control target
= control target key end

     0   :  { %s131_s10 = smov 120   ;;  %s132_s11 = smov 104   ;;  %vm3_vm0 = vcmask 64512   ;;  %vm9_vm1 = vcmask 1048512   ;;  %vm15_vm2 = vcmask 982912   ;;  %vm21_vm3 = vcmask 917312   ;;  %s207_s0 = inlined_call_operand.vmem [shape: f32[16,8], index: 0, kind: input, shape index: {}]   ;;  %s208_s1 = inlined_call_operand.vmem [shape: f32[128], index: 1, kind: output, shape index: {}]  }
   0x1   :  { %v101_v0 = vld [vmem:[%s207_s0 + $0xf] sm:$0x1]   ;;  %v103_v1 = vld [vmem:[%s207_s0 + $0xd] sm:$0x1]   ;;  %v102_v2 = vld [vmem:[%s207_s0 + $0xe] sm:$0x1]  }
   0x2   :  { %7 = vrot.lane.b32.xlu0 %v101_v0, %s131_s10  ;;  %19 = vrot.lane.b32.xlu1 %v103_v1, %s132_s11  ;;  %v104_v3 = vld [vmem:[%s207_s0 + $0xc] sm:$0x1]   ;;  %s133_s16 = smov 112   ;;  %s134_s17 = smov 96   ;;  %v105_v4 = vld [vmem:[%s207_s0 + $0xb] sm:$0x1]  }
   0x3   :  { %v106_v5 = vld [vmem:[%s207_s0 + $0xa] sm:$0x1]   ;;  %v2_v6 = vld [vmem:[%s207_s0] sm:$0x1]   ;;  %s135_s24 = smov 88   ;;  %s136_s25 = smov 80  }
   0x4   :  { %4 = vst.msk [vmem:[#allocation0] sm:$0x1] %vm3_vm0, %v2_v6   ;;  %v107_v7 = vld [vmem:[%s207_s0 + $0x9] sm:$0x1]   ;;  %v108_v8 = vld [vmem:[%s207_s0 + $0x8] sm:$0x1]  }
   0x5   :  { %s137_s30 = smov 72   ;;  %s138_s2 = smov 64   ;;  %v109_v9 = vld [vmem:[%s207_s0 + $0x7] sm:$0x1]   ;;  %v110_v10 = vld [vmem:[%s207_s0 + $0x6] sm:$0x1]  }
   0x6   :  { %13 = vrot.lane.b32.xlu0 %v102_v2, %s133_s16  ;;  %25 = vrot.lane.b32.xlu1 %v104_v3, %s134_s17  ;;  %s139_s7 = smov 56   ;;  %s140_s8 = smov 48   ;;  %v111_v11 = vld [vmem:[%s207_s0 + $0x5] sm:$0x1]   ;;  %v112_v12 = vld [vmem:[%s207_s0 + $0x4] sm:$0x1]  }
   0x7   :  { %s141_s13 = smov 40   ;;  %s142_s14 = smov 32   ;;  %v113_v13 = vld [vmem:[%s207_s0 + $0x3] sm:$0x1]   ;;  %v114_v14 = vld [vmem:[%s207_s0 + $0x2] sm:$0x1]  }
   0x8   :  { %s143_s19 = smov 24   ;;  %s144_s20 = smov 16   ;;  %v115_v15 = vld [vmem:[%s207_s0 + $0x1] sm:$0x1]   ;;  %vm27_vm4 = vcmask 851712   ;;  %vm33_vm5 = vcmask 786112  }
   0x9   :  { %s145_s0 = smov 8   ;;  %vm39_vm6 = vcmask 720512   ;;  %vm45_vm7 = vcmask 654912   ;;  %vm51_vm8 = vcmask 589312   ;;  %vm57_vm9 = vcmask 523712  }
   0xa   :  { %31 = vrot.lane.b32.xlu0 %v105_v4, %s135_s24  ;;  %37 = vrot.lane.b32.xlu1 %v106_v5, %s136_s25  ;;  %vm63_vm10 = vcmask 458112   ;;  %vm69_vm11 = vcmask 392512   ;;  %vm75_vm12 = vcmask 326912   ;;  %vm81_vm13 = vcmask 261312  }
   0xb   :  { %vm87_vm14 = vcmask 195712   ;;  %vm93_vm15 = vcmask 130112  }
   0xe   :  { %43 = vrot.lane.b32.xlu0 %v107_v7, %s137_s30  ;;  %49 = vrot.lane.b32.xlu1 %v108_v8, %s138_s2 }
  0x12   :  { %55 = vrot.lane.b32.xlu0 %v109_v9, %s139_s7  ;;  %61 = vrot.lane.b32.xlu1 %v110_v10, %s140_s8 }
  0x16   :  { %67 = vrot.lane.b32.xlu0 %v111_v11, %s141_s13  ;;  %73 = vrot.lane.b32.xlu1 %v112_v12, %s142_s14 }
  0x1a   :  { %79 = vrot.lane.b32.xlu0 %v113_v13, %s143_s19  ;;  %85 = vrot.lane.b32.xlu1 %v114_v14, %s144_s20 }
  0x1e   :  { %91 = vrot.lane.b32.xlu0 %v115_v15, %s145_s0 }
  0x74   :  { %v8_v16 = vpop.permute.xlu0 %7   ;;  %v20_v17 = vpop.permute.xlu1 %19  }
  0x75   :  { %10 = vst.msk [vmem:[#allocation0] sm:$0x1] %vm9_vm1, %v8_v16  }
  0x78   :  { %v14_v18 = vpop.permute.xlu0 %13   ;;  %v26_v19 = vpop.permute.xlu1 %25  }
  0x79   :  { %16 = vst.msk [vmem:[#allocation0] sm:$0x1] %vm15_vm2, %v14_v18  }
  0x7a   :  { %22 = vst.msk [vmem:[#allocation0] sm:$0x1] %vm21_vm3, %v20_v17  }
  0x7b   :  { %28 = vst.msk [vmem:[#allocation0] sm:$0x1] %vm27_vm4, %v26_v19  }
  0x7c   :  { %v32_v20 = vpop.permute.xlu0 %31   ;;  %v38_v21 = vpop.permute.xlu1 %37  }
  0x7d   :  { %34 = vst.msk [vmem:[#allocation0] sm:$0x1] %vm33_vm5, %v32_v20  }
  0x7e   :  { %40 = vst.msk [vmem:[#allocation0] sm:$0x1] %vm39_vm6, %v38_v21  }
  0x80   :  { %v44_v22 = vpop.permute.xlu0 %43   ;;  %v50_v23 = vpop.permute.xlu1 %49  }
  0x81   :  { %46 = vst.msk [vmem:[#allocation0] sm:$0x1] %vm45_vm7, %v44_v22  }
  0x82   :  { %52 = vst.msk [vmem:[#allocation0] sm:$0x1] %vm51_vm8, %v50_v23  }
  0x84   :  { %v56_v24 = vpop.permute.xlu0 %55   ;;  %v62_v25 = vpop.permute.xlu1 %61  }
  0x85   :  { %58 = vst.msk [vmem:[#allocation0] sm:$0x1] %vm57_vm9, %v56_v24  }
  0x86   :  { %64 = vst.msk [vmem:[#allocation0] sm:$0x1] %vm63_vm10, %v62_v25  }
  0x88   :  { %v68_v26 = vpop.permute.xlu0 %67   ;;  %v74_v27 = vpop.permute.xlu1 %73  }
  0x89   :  { %70 = vst.msk [vmem:[#allocation0] sm:$0x1] %vm69_vm11, %v68_v26  }
  0x8a   :  { %76 = vst.msk [vmem:[#allocation0] sm:$0x1] %vm75_vm12, %v74_v27  }
  0x8c   :  { %v80_v28 = vpop.permute.xlu0 %79   ;;  %v86_v29 = vpop.permute.xlu1 %85  }
  0x8d   :  { %82 = vst.msk [vmem:[#allocation0] sm:$0x1] %vm81_vm13, %v80_v28  }
  0x8e   :  { %88 = vst.msk [vmem:[#allocation0] sm:$0x1] %vm87_vm14, %v86_v29  }
  0x90   :  { %v92_v30 = vpop.permute.xlu0 %91  }
  0x91   :  { %94 = vst.msk [vmem:[#allocation0] sm:$0x1] %vm93_vm15, %v92_v30  }
  0x98   :  { %v98_v31 = vld [vmem:[#allocation0] sm:$0x1] }
  0x99   :  { %100 = vst [vmem:[%s208_s1] sm:$0x1] %v98_v31 }

// kernel: tile.22
= control target key start
LH: loop header
LB: loop body
LE: loop exit
PB: predicated region body
PF: predicated region fallthrough
CT: control target
= control target key end

     0   :  { %s28_s0 = inlined_call_operand.vmem [shape: f32[32], index: 0, kind: input, shape index: {}]   ;;  %s29_s1 = inlined_call_operand.vmem [shape: f32[16,32], index: 1, kind: output, shape index: {}]  }
   0x1   :  { %v4_v0 = vld [vmem:[%s28_s0] ss:$0 sm:$0xff] }
   0x2   :  { %5 = vst [vmem:[%s29_s1] sm:$0xff] %v4_v0  ;;  %8 = vst [vmem:[%s29_s1 + $0x8] sm:$0xff] %v4_v0 }

// kernel: tile.23
= control target key start
LH: loop header
LB: loop body
LE: loop exit
PB: predicated region body
PF: predicated region fallthrough
CT: control target
= control target key end

     0   :  { %s35_s8 = smov 96   ;;  %vm3_vm0 = vcmask 261120   ;;  %s37_s15 = smov 64   ;;  %vm9_vm1 = vcmask 1048320   ;;  %vm15_vm2 = vcmask 785920   ;;  %vm21_vm3 = vcmask 523520   ;;  %s63_s0 = inlined_call_operand.vmem [shape: f32[16,32], index: 0, kind: input, shape index: {}]   ;;  %s64_s1 = inlined_call_operand.vmem [shape: f32[512], index: 1, kind: output, shape index: {}]  }
   0x1   :  { %v29_v0 = vld [vmem:[%s63_s0 + $0x3] ss:$4 sm:$0xf]   ;;  %v30_v1 = vld [vmem:[%s63_s0 + $0x2] ss:$4 sm:$0xf]  }
   0x2   :  { %7 = vrot.lane.b32.xlu0 %v29_v0, %s35_s8  ;;  %v31_v2 = vld [vmem:[%s63_s0 + $0x1] ss:$4 sm:$0xf]   ;;  %v2_v3 = vld [vmem:[%s63_s0] ss:$4 sm:$0xf]  }
   0x3   :  { %s36_s0 = smov 32   ;;  %4 = vst.msk [vmem:[#allocation0] sm:$0xf] %vm3_vm0, %v2_v3  }
   0x4   :  { %19 = vrot.lane.b32.xlu1 %v31_v2, %s36_s0 }
   0x6   :  { %13 = vrot.lane.b32.xlu0 %v30_v1, %s37_s15 }
  0x74   :  { %v8_v4 = vpop.permute.xlu0 %7  }
  0x75   :  { %10 = vst.msk [vmem:[#allocation0] sm:$0xf] %vm9_vm1, %v8_v4  }
  0x76   :  { %v20_v5 = vpop.permute.xlu1 %19  }
  0x78   :  { %v14_v6 = vpop.permute.xlu0 %13  }
  0x79   :  { %16 = vst.msk [vmem:[#allocation0] sm:$0xf] %vm15_vm2, %v14_v6  }
  0x7a   :  { %22 = vst.msk [vmem:[#allocation0] sm:$0xf] %vm21_vm3, %v20_v5  }
  0x81   :  { %v26_v7 = vld [vmem:[#allocation0] sm:$0xf] }
  0x82   :  { %28 = vst [vmem:[%s64_s1] sm:$0xf] %v26_v7 }

// kernel: predictive_reasoning_block.1
= control target key start
LH: loop header
LB: loop body
LE: loop exit
PB: predicated region body
PF: predicated region fallthrough
CT: control target
= control target key end

     0   :  { %s6734_s21 = smov 0   ;;  %s6736_s22 = smov 0   ;;  %s8412_s0 = inlined_call_operand.vmem [shape: f32[9,64,128], index: 0, kind: input, shape index: {}]   ;;  %s8413_s1 = inlined_call_operand.vmem [shape: bf16[8,128,128], index: 1, kind: input, shape index: {}]   ;;  %s8414_s2 = inlined_call_operand.vmem [shape: bf16[3,128,512], index: 2, kind: input, shape index: {}]   ;;  %s8415_s3 = inlined_call_operand.vmem [shape: bf16[3,512,128], index: 3, kind: input, shape index: {}]   ;;  %s8416_s4 = inlined_call_operand.vmem [shape: bf16[128,128], index: 4, kind: input, shape index: {}]   ;;  %s8417_s5 = inlined_call_operand.vmem [shape: f32[1,896], index: 5, kind: input, shape index: {}]   ;;  %s8418_s6 = inlined_call_operand.vmem [shape: f32[9,64,128], index: 6, kind: output, shape index: {}]  }
   0x1   :  { %s6738_s23 = smov 0  }
   0x2 LB: > { %s4880_s24 = sadd.s32 4294967295, %s6694_s23   ;;  %s6751_s25 = sadd.s32 1, %s6694_s23   ;;  %s6694_s23 = sphi %s6738_s23, %s8428_s23   ;;  %s6690_s22 = sphi %s6736_s22, %s8427_s22   ;;  %s6686_s21 = sphi %s6734_s21, %s8426_s21  }
   0x3   : > { %s20_s26 = ssub.s32 %s6694_s23, %s6751_s25  ;;  %s23_s27 = sadd.s32 1, %s6690_s22 }
   0x4   : > { %p21_p0 = scmp.eq.s32.totalorder %s20_s26, 0  ;;  %p30_p1 = scmp.ne.s32.totalorder %s6690_s22, %s6686_s21 }
   0x5   : > { %p31_p2 = scmp.eq.s32.totalorder %s6694_s23, 0  ;;  %p165_p3 = scmp.eq.s32.totalorder %s4880_s24, 3 }
   0x6   : > { %s6762_s28 = scalar_select %p21_p0, %s6690_s22, %s23_s27  }
   0x7   : > { %p32_p4 = por %p31_p2, %p30_p1  ;;  %p6764_p5 = por %p165_p3, %p30_p1 }
   0x8   : > { %p4883_p6 = scmp.ge.s32.totalorder %s6694_s23, 4 }
   0xa   : > { %202 = sbr.rel (%p4883_p6) target bundleno = 30 (0x1e), region = 36 }
  0x11   : > { %205 = sbr.rel (!%p32_p4) target bundleno = 30 (0x1e), region = 40  ;;  %s207_s30 = sand.u32 (%p32_p4), 1, %s6690_s22  }
  0x12   : > { %s5462_s7 = sshll.u32 (%p32_p4), %s6694_s23, 4  ;;  %s6329_s8 = smul.u32 (%p32_p4), 144, %s207_s30 }
  0x13   : > { %s6774_s11 = scalar_lea.vmem (%p32_p4), %s8412_s0, %s5462_s7 }
  0x14   : > { %v274_v0 = vld [vmem:[%s6774_s11] sm:$0xff] (%p32_p4)  ;;  %v276_v1 = vld [vmem:[%s6774_s11 + $0x8] sm:$0xff] (%p32_p4)  ;;  %s209_s12 = scalar_lea.vmem (%p32_p4), [#allocation4], %s6329_s8 }
  0x15   : > { %v278_v2 = vld [vmem:[%s6774_s11 + $0x40] sm:$0xff] (%p32_p4)  ;;  %v280_v3 = vld [vmem:[%s6774_s11 + $0x48] sm:$0xff] (%p32_p4)  ;;  %275 = vst [vmem:[%s209_s12] sm:$0xff] (%p32_p4), %v274_v0  ;;  %277 = vst [vmem:[%s209_s12 + $0x8] sm:$0xff] (%p32_p4), %v276_v1 }
  0x16   : > { %v282_v4 = vld [vmem:[%s6774_s11 + $0x80] sm:$0xff] (%p32_p4)  ;;  %v284_v5 = vld [vmem:[%s6774_s11 + $0x88] sm:$0xff] (%p32_p4)  ;;  %279 = vst [vmem:[%s209_s12 + $0x10] sm:$0xff] (%p32_p4), %v278_v2  ;;  %281 = vst [vmem:[%s209_s12 + $0x18] sm:$0xff] (%p32_p4), %v280_v3 }
  0x17   : > { %283 = vst [vmem:[%s209_s12 + $0x20] sm:$0xff] (%p32_p4), %v282_v4  ;;  %285 = vst [vmem:[%s209_s12 + $0x28] sm:$0xff] (%p32_p4), %v284_v5  ;;  %v286_v6 = vld [vmem:[%s6774_s11 + $0xc0] sm:$0xff] (%p32_p4)  ;;  %v288_v7 = vld [vmem:[%s6774_s11 + $0xc8] sm:$0xff] (%p32_p4) }
  0x18   : > { %v290_v8 = vld [vmem:[%s6774_s11 + $0x100] sm:$0xff]  ;;  %287 = vst [vmem:[%s209_s12 + $0x30] sm:$0xff] %v286_v6  ;;  %289 = vst [vmem:[%s209_s12 + $0x38] sm:$0xff] %v288_v7  ;;  %v292_v9 = vld [vmem:[%s6774_s11 + $0x108] sm:$0xff] }
  0x19   : > { %291 = vst [vmem:[%s209_s12 + $0x40] sm:$0xff] %v290_v8  ;;  %v294_v10 = vld [vmem:[%s6774_s11 + $0x140] sm:$0xff]  ;;  %v296_v11 = vld [vmem:[%s6774_s11 + $0x148] sm:$0xff]  ;;  %293 = vst [vmem:[%s209_s12 + $0x48] sm:$0xff] %v292_v9 }
  0x1a   : > { %295 = vst [vmem:[%s209_s12 + $0x50] sm:$0xff] %v294_v10  ;;  %297 = vst [vmem:[%s209_s12 + $0x58] sm:$0xff] %v296_v11  ;;  %v298_v12 = vld [vmem:[%s6774_s11 + $0x180] sm:$0xff]  ;;  %v300_v13 = vld [vmem:[%s6774_s11 + $0x188] sm:$0xff] }
  0x1b   : > { %v302_v14 = vld [vmem:[%s6774_s11 + $0x1c0] sm:$0xff]  ;;  %299 = vst [vmem:[%s209_s12 + $0x60] sm:$0xff] %v298_v12  ;;  %301 = vst [vmem:[%s209_s12 + $0x68] sm:$0xff] %v300_v13  ;;  %v304_v15 = vld [vmem:[%s6774_s11 + $0x1c8] sm:$0xff] }
  0x1c   : > { %303 = vst [vmem:[%s209_s12 + $0x70] sm:$0xff] %v302_v14  ;;  %v306_v16 = vld [vmem:[%s6774_s11 + $0x200] sm:$0xff]  ;;  %v308_v17 = vld [vmem:[%s6774_s11 + $0x208] sm:$0xff]  ;;  %305 = vst [vmem:[%s209_s12 + $0x78] sm:$0xff] %v304_v15 }
  0x1d   : > { %307 = vst [vmem:[%s209_s12 + $0x80] sm:$0xff] %v306_v16  ;;  %309 = vst [vmem:[%s209_s12 + $0x88] sm:$0xff] %v308_v17 }
  0x1e PF: > { %p4886_p7 = scmp.ge.s32.totalorder %s6694_s23, 1  ;;  %p314_p8 = scmp.lt.s32.totalorder %s6694_s23, 5 }
  0x20   : > { %p315_p9 = pnand %p4886_p7, %p314_p8 }
  0x21   : > { %v6358_v18 = vld [vmem:[%s8413_s1 + $0x40] sm:$0xff] (!%p315_p9)   ;;  %v8419_v19 = vmov (!%p315_p9), 0.0   ;;  %v6359_v20 = vld [vmem:[%s8413_s1 + $0x48] sm:$0xff] (!%p315_p9)   ;;  %vm6697_vm0 = vmmov (!%p315_p9), 0   ;;  %v6360_v21 = vld [vmem:[%s8413_s1 + $0x50] sm:$0xff] (!%p315_p9)   ;;  %s321_s10 = sand.u32 (!%p315_p9), 1, %s6686_s21  }
  0x22   : > { %318 = sbr.rel (%p315_p9) target bundleno = 1227 (0x4cb), region = 78  ;;  %5973 = vmatprep.subr.bf16.mxu1 (!%p315_p9), %v8419_v19  ;;  %6013 = vmatprep.subr.bf16.mxu0 (!%p315_p9), %v8419_v19  ;;  %v6361_v22 = vld [vmem:[%s8413_s1 + $0x58] sm:$0xff] (!%p315_p9)   ;;  %v6367_v23 = vld [vmem:[%s8413_s1 + $0x80] sm:$0xff] (!%p315_p9)   ;;  %v6369_v24 = vld [vmem:[%s8413_s1 + $0x88] sm:$0xff] (!%p315_p9)  }
  0x23   : > { %5974 = vmatpush3.bf16.msra.mxu1 (!%p315_p9), %v6358_v18  ;;  %5989 = vmatprep.mubr.msk.bf16.mxu1 (!%p315_p9), %vm6697_vm0, %v8419_v19  ;;  %v6362_v25 = vld [vmem:[%s8413_s1 + $0x60] sm:$0xff] (!%p315_p9)   ;;  %v6371_v26 = vld [vmem:[%s8413_s1 + $0x90] sm:$0xff] (!%p315_p9)   ;;  %v6363_v27 = vld [vmem:[%s8413_s1 + $0x68] sm:$0xff] (!%p315_p9)   ;;  %s6837_s15 = smul.u32 (!%p315_p9), 144, %s321_s10 }
  0x24   : > { %5975 = vmatprep.subr.bf16.mxu1 (!%p315_p9), %v8419_v19  ;;  %6029 = vmatprep.mubr.msk.bf16.mxu0 (!%p315_p9), %vm6697_vm0, %v8419_v19  ;;  %v6373_v28 = vld [vmem:[%s8413_s1 + $0x98] sm:$0xff] (!%p315_p9)   ;;  %v6364_v29 = vld [vmem:[%s8413_s1 + $0x70] sm:$0xff] (!%p315_p9)   ;;  %v6375_v30 = vld [vmem:[%s8413_s1 + $0xa0] sm:$0xff] (!%p315_p9)  }
  0x25   : > { %6014 = vmatpush3.bf16.msra.mxu0 (!%p315_p9), %v6367_v23  ;;  %v6365_v31 = vld [vmem:[%s8413_s1 + $0x78] sm:$0xff] (!%p315_p9)   ;;  %s6855_s30 = scalar_lea.vmem (!%p315_p9), [#allocation4], %s6837_s15  ;;  %v6377_v34 = vld [vmem:[%s8413_s1 + $0xa8] sm:$0xff] (!%p315_p9)   ;;  %v6366_v36 = vld [vmem:[%s8413_s1] sm:$0xff] (!%p315_p9)   ;;  %s8289_s20 = scalar_lea.vmem (!%p315_p9), [#allocation5], %s6837_s15 }
  0x26   : > { %6015 = vmatprep.subr.bf16.mxu0 (!%p315_p9), %v8419_v19  ;;  %v358_v32 = vld [vmem:[%s6855_s30 + $0x10] sm:$0xff] (!%p315_p9)  ;;  %v359_v33 = vld [vmem:[%s6855_s30 + $0x18] sm:$0xff] (!%p315_p9)  ;;  %v360_v40 = vld [vmem:[%s6855_s30 + $0x20] sm:$0xff] (!%p315_p9) }
  0x27   : > { %5976 = vmatpush3.bf16.msra.mxu1 (!%p315_p9), %v6359_v20  ;;  %v6863_v35 = vpack.c.bf16 (!%p315_p9), %v359_v33, %v358_v32  ;;  %v6379_v37 = vld [vmem:[%s8413_s1 + $0xb0] sm:$0xff] (!%p315_p9)   ;;  %v6368_v38 = vld [vmem:[%s8413_s1 + $0x8] sm:$0xff] (!%p315_p9)   ;;  %v6381_v39 = vld [vmem:[%s8413_s1 + $0xb8] sm:$0xff] (!%p315_p9)  }
  0x28   : > { %5977 = vmatprep.subr.bf16.mxu1 (!%p315_p9), %v8419_v19  ;;  %v361_v41 = vld [vmem:[%s6855_s30 + $0x28] sm:$0xff] (!%p315_p9)  ;;  %v6370_v42 = vld [vmem:[%s8413_s1 + $0x10] sm:$0xff] (!%p315_p9)   ;;  %v6383_v44 = vld [vmem:[%s8413_s1 + $0x100] sm:$0xff] (!%p315_p9)  }
  0x29   : > { %6016 = vmatpush3.bf16.msra.mxu0 %v6369_v24  ;;  %v6891_v43 = vpack.c.bf16 %v361_v41, %v360_v40  ;;  %v6372_v45 = vld [vmem:[%s8413_s1 + $0x18] sm:$0xff]   ;;  %v6385_v46 = vld [vmem:[%s8413_s1 + $0x108] sm:$0xff]   ;;  %v6374_v47 = vld [vmem:[%s8413_s1 + $0x20] sm:$0xff]   ;;  %s5463_s15 = sshll.u32 (%p6764_p5), %s4880_s24, 4 }
  0x2a   : > { %6017 = vmatprep.subr.bf16.mxu0 %v8419_v19  ;;  %v6387_v48 = vld [vmem:[%s8413_s1 + $0x110] sm:$0xff]   ;;  %v6376_v49 = vld [vmem:[%s8413_s1 + $0x28] sm:$0xff]   ;;  %v6389_v50 = vld [vmem:[%s8413_s1 + $0x118] sm:$0xff]   ;;  %s8367_s29 = scalar_lea.vmem (%p6764_p5), %s8418_s6, %s5463_s15 }
  0x2b   : > { %5978 = vmatpush3.bf16.msra.mxu1 %v6360_v21  ;;  %v6378_v51 = vld [vmem:[%s8413_s1 + $0x30] sm:$0xff]   ;;  %v6380_v52 = vld [vmem:[%s8413_s1 + $0x38] sm:$0xff]   ;;  %v6391_v53 = vld [vmem:[%s8413_s1 + $0x120] sm:$0xff]  }
  0x2c   : > { %5979 = vmatprep.subr.bf16.mxu1 %v8419_v19  ;;  %v356_v54 = vld [vmem:[%s6855_s30] sm:$0xff]  ;;  %v357_v55 = vld [vmem:[%s6855_s30 + $0x8] sm:$0xff]  ;;  %v362_v12 = vld [vmem:[%s6855_s30 + $0x30] sm:$0xff] }
  0x2d   : > { %6018 = vmatpush3.bf16.msra.mxu0 %v6371_v26  ;;  %v6393_v56 = vld [vmem:[%s8413_s1 + $0x128] sm:$0xff]   ;;  %v6941_v57 = vpack.c.bf16 %v357_v55, %v356_v54  ;;  %v6382_v58 = vld [vmem:[%s8413_s1 + $0xc0] sm:$0xff]   ;;  %v6395_v59 = vld [vmem:[%s8413_s1 + $0x130] sm:$0xff]  }
  0x2e   : > { %6019 = vmatprep.subr.bf16.mxu0 %v8419_v19  ;;  %v6384_v60 = vld [vmem:[%s8413_s1 + $0xc8] sm:$0xff]   ;;  %v6397_v61 = vld [vmem:[%s8413_s1 + $0x138] sm:$0xff]   ;;  %v364_v62 = vld [vmem:[%s6855_s30 + $0x40] sm:$0xff] }
  0x2f   : > { %5980 = vmatpush3.bf16.msra.mxu1 %v6361_v22  ;;  %v365_v63 = vld [vmem:[%s6855_s30 + $0x48] sm:$0xff]  ;;  %v6386_v0 = vld [vmem:[%s8413_s1 + $0xd0] sm:$0xff]   ;;  %v6399_v1 = vld [vmem:[%s8413_s1 + $0x180] sm:$0xff]  }
  0x30   : > { %5981 = vmatprep.subr.bf16.mxu1 %v8419_v19  ;;  %v6972_v2 = vpack.c.bf16 %v365_v63, %v364_v62  ;;  %v6388_v3 = vld [vmem:[%s8413_s1 + $0xd8] sm:$0xff]   ;;  %v6401_v4 = vld [vmem:[%s8413_s1 + $0x188] sm:$0xff]   ;;  %v6390_v5 = vld [vmem:[%s8413_s1 + $0xe0] sm:$0xff]  }
  0x31   : > { %6020 = vmatpush3.bf16.msra.mxu0 %v6373_v28  ;;  %v6403_v6 = vld [vmem:[%s8413_s1 + $0x190] sm:$0xff]   ;;  %v6392_v7 = vld [vmem:[%s8413_s1 + $0xe8] sm:$0xff]   ;;  %v6405_v8 = vld [vmem:[%s8413_s1 + $0x198] sm:$0xff]  }
  0x32   : > { %6021 = vmatprep.subr.bf16.mxu0 %v8419_v19  ;;  %v6394_v9 = vld [vmem:[%s8413_s1 + $0xf0] sm:$0xff]   ;;  %v6407_v10 = vld [vmem:[%s8413_s1 + $0x1a0] sm:$0xff]   ;;  %v6396_v11 = vld [vmem:[%s8413_s1 + $0xf8] sm:$0xff]  }
  0x33   : > { %5982 = vmatpush3.bf16.msra.mxu1 %v6362_v25  ;;  %v363_v13 = vld [vmem:[%s6855_s30 + $0x38] sm:$0xff]  ;;  %v6398_v15 = vld [vmem:[%s8413_s1 + $0x140] sm:$0xff]   ;;  %v6411_v17 = vld [vmem:[%s8413_s1 + $0x1b0] sm:$0xff]  }
  0x34   : > { %5983 = vmatprep.subr.bf16.mxu1 %v8419_v19  ;;  %v6409_v14 = vld [vmem:[%s8413_s1 + $0x1a8] sm:$0xff]   ;;  %v7022_v16 = vpack.c.bf16 %v363_v13, %v362_v12  ;;  %v6413_v20 = vld [vmem:[%s8413_s1 + $0x1b8] sm:$0xff]   ;;  %v368_v21 = vld [vmem:[%s6855_s30 + $0x60] sm:$0xff] }
  0x35   : > { %6022 = vmatpush3.bf16.msra.mxu0 %v6375_v30  ;;  %v6400_v18 = vld [vmem:[%s8413_s1 + $0x148] sm:$0xff]   ;;  %v6402_v23 = vld [vmem:[%s8413_s1 + $0x150] sm:$0xff]   ;;  %v6404_v25 = vld [vmem:[%s8413_s1 + $0x158] sm:$0xff]  }
  0x36   : > { %6023 = vmatprep.subr.bf16.mxu0 %v8419_v19  ;;  %v369_v22 = vld [vmem:[%s6855_s30 + $0x68] sm:$0xff]  ;;  %v6406_v26 = vld [vmem:[%s8413_s1 + $0x160] sm:$0xff]   ;;  %v6410_v28 = vld [vmem:[%s8413_s1 + $0x170] sm:$0xff]  }
  0x37   : > { %5984 = vmatpush3.bf16.msra.mxu1 %v6363_v27  ;;  %v7047_v24 = vpack.c.bf16 %v369_v22, %v368_v21  ;;  %v6408_v27 = vld [vmem:[%s8413_s1 + $0x168] sm:$0xff]   ;;  %v366_v30 = vld [vmem:[%s6855_s30 + $0x50] sm:$0xff]  ;;  %v6421_v41 = vld [vmem:[%s8413_s1 + $0x1f8] sm:$0xff]  }
  0x38   : > { %5985 = vmatprep.subr.bf16.mxu1 %v8419_v19  ;;  %v6414_v32 = vld [vmem:[%s8413_s1 + $0x1c0] sm:$0xff]   ;;  %v6420_v40 = vld [vmem:[%s8413_s1 + $0x1f0] sm:$0xff]   ;;  %v6445_v62 = vld [vmem:[%s8414_s2 + $0x16c] ss:$16 sps:$4 sm:$0xff]  }
  0x39   : > { %6024 = vmatpush3.bf16.msra.mxu0 %v6377_v34  ;;  %v6415_v34 = vld [vmem:[%s8413_s1 + $0x1c8] sm:$0xff]   ;;  %v6434_v54 = vld [vmem:[%s8414_s2 + $0x140] ss:$16 sps:$4 sm:$0xff]   ;;  %v6442_v55 = vld [vmem:[%s8414_s2 + $0x164] ss:$16 sps:$4 sm:$0xff]  }
  0x3a   : > { %6025 = vmatprep.subr.bf16.mxu0 %v8419_v19  ;;  %v6446_v63 = vld [vmem:[%s8414_s2 + $0x180] ss:$16 sps:$4 sm:$0xff]   ;;  %v6466_v13 = vld [vmem:[%s8414_s2 + $0x1e4] ss:$16 sps:$4 sm:$0xff]  }
  0x3b   : > { %5986 = vmatpush3.bf16.msra.mxu1 %v6364_v29  ;;  %v6412_v29 = vld [vmem:[%s8413_s1 + $0x178] sm:$0xff]   ;;  %v6464_v12 = vld [vmem:[%s8414_s2 + $0x1e0] ss:$16 sps:$4 sm:$0xff]   ;;  %v6475_v21 = vld [vmem:[%s8414_s2 + $0x24] ss:$16 sps:$4 sm:$0xff]  }
  0x3c   : > { %5987 = vmatprep.subr.bf16.mxu1 %v8419_v19  ;;  %v6473_v22 = vld [vmem:[%s8414_s2 + $0x20] ss:$16 sps:$4 sm:$0xff]  }
  0x3d   : > { %6026 = vmatpush3.bf16.msra.mxu0 %v6379_v37  ;;  %v6417_v37 = vld [vmem:[%s8413_s1 + $0x1d8] sm:$0xff]  }
  0x3e   : > { %6027 = vmatprep.subr.bf16.mxu0 %v8419_v19 }
  0x3f   : > { %5988 = vmatpush3.bf16.msra.mxu1 %v6365_v31  ;;  %v367_v31 = vld [vmem:[%s6855_s30 + $0x58] sm:$0xff] }
  0x40   : > { %5993 = vmatprep.subr.bf16.mxu1 %v8419_v19  ;;  %v7075_v33 = vpack.c.bf16 %v367_v31, %v366_v30  ;;  %v6487_v30 = vld [vmem:[%s8414_s2 + $0xc] ss:$16 sps:$4 sm:$0xff]   ;;  %v6482_v31 = vld [vmem:[%s8414_s2 + $0x80] ss:$16 sps:$4 sm:$0xff]  }
  0x41   : > { %6028 = vmatpush3.bf16.msra.mxu0 %v6381_v39  ;;  %v6419_v39 = vld [vmem:[%s8413_s1 + $0x1e8] sm:$0xff]  }
  0x42   : > { %5990 = vmatmul.mubr.bf16.vlgmr.msra.gmra.mrb[0].mxu1 %v6863_v35  ;;  %6053 = vmatprep.subr.bf16.mxu0 %v8419_v19 }
  0x43   : > { %5994 = vmatpush3.bf16.msra.mxu1 %v6366_v36  ;;  %6009 = vmatprep.mubr.msk.bf16.mxu1 %vm6697_vm0, %v8419_v19  ;;  %v6416_v36 = vld [vmem:[%s8413_s1 + $0x1d0] sm:$0xff]  }
  0x44   : > { %5995 = vmatprep.subr.bf16.mxu1 %v8419_v19  ;;  %6030 = vmatmul.mubr.bf16.vlgmr.msra.gmra.mrb[0].mxu0 %v6891_v43 }
  0x45   : > { %6054 = vmatpush3.bf16.msra.mxu0 %v6383_v44  ;;  %6069 = vmatprep.mubr.msk.bf16.mxu0 %vm6697_vm0, %v8419_v19  ;;  %v6424_v44 = vld [vmem:[%s8414_s2 + $0x104] ss:$16 sps:$4 sm:$0xff]  }
  0x46   : > { %6055 = vmatprep.subr.bf16.mxu0 %v8419_v19 }
  0x47   : > { %5996 = vmatpush3.bf16.msra.mxu1 %v6368_v38  ;;  %v6418_v38 = vld [vmem:[%s8413_s1 + $0x1e0] sm:$0xff]  }
  0x48   : > { %5997 = vmatprep.subr.bf16.mxu1 %v8419_v19 }
  0x49   : > { %6056 = vmatpush3.bf16.msra.mxu0 %v6385_v46  ;;  %v371_v46 = vld [vmem:[%s6855_s30 + $0x78] sm:$0xff] }
  0x4a   : > { %6057 = vmatprep.subr.bf16.mxu0 %v8419_v19 }
  0x4b   : > { %5998 = vmatpush3.bf16.msra.mxu1 %v6370_v42  ;;  %v6422_v42 = vld [vmem:[%s8414_s2 + $0x100] ss:$16 sps:$4 sm:$0xff]  }
  0x4c   : > { %5999 = vmatprep.subr.bf16.mxu1 %v8419_v19 }
  0x4d   : > { %6058 = vmatpush3.bf16.msra.mxu0 %v6387_v48  ;;  %v6427_v48 = vld [vmem:[%s8414_s2 + $0x10c] ss:$16 sps:$4 sm:$0xff]  }
  0x4e   : > { %6059 = vmatprep.subr.bf16.mxu0 %v8419_v19 }
  0x4f   : > { %6000 = vmatpush3.bf16.msra.mxu1 %v6372_v45  ;;  %v370_v45 = vld [vmem:[%s6855_s30 + $0x70] sm:$0xff] }
  0x50   : > { %6001 = vmatprep.subr.bf16.mxu1 %v8419_v19 }
  0x51   : > { %6060 = vmatpush3.bf16.msra.mxu0 %v6389_v50  ;;  %v7126_v50 = vpack.c.bf16 %v371_v46, %v370_v45 }
  0x52   : > { %6061 = vmatprep.subr.bf16.mxu0 %v8419_v19 }
  0x53   : > { %6002 = vmatpush3.bf16.msra.mxu1 %v6374_v47  ;;  %v6430_v47 = vld [vmem:[%s8414_s2 + $0x124] ss:$16 sps:$4 sm:$0xff]  }
  0x54   : > { %6003 = vmatprep.subr.bf16.mxu1 %v8419_v19 }
  0x55   : > { %6062 = vmatpush3.bf16.msra.mxu0 %v6391_v53  ;;  %v6433_v53 = vld [vmem:[%s8414_s2 + $0x12c] ss:$16 sps:$4 sm:$0xff]  }
  0x56   : > { %6063 = vmatprep.subr.bf16.mxu0 %v8419_v19 }
  0x57   : > { %6004 = vmatpush3.bf16.msra.mxu1 %v6376_v49  ;;  %v6428_v49 = vld [vmem:[%s8414_s2 + $0x120] ss:$16 sps:$4 sm:$0xff]  }
  0x58   : > { %6005 = vmatprep.subr.bf16.mxu1 %v8419_v19 }
  0x59   : > { %6064 = vmatpush3.bf16.msra.mxu0 %v6393_v56  ;;  %v6431_v56 = vld [vmem:[%s8414_s2 + $0x128] ss:$16 sps:$4 sm:$0xff]  }
  0x5a   : > { %6065 = vmatprep.subr.bf16.mxu0 %v8419_v19 }
  0x5b   : > { %6006 = vmatpush3.bf16.msra.mxu1 %v6378_v51  ;;  %v6436_v51 = vld [vmem:[%s8414_s2 + $0x144] ss:$16 sps:$4 sm:$0xff]  }
  0x5c   : > { %6007 = vmatprep.subr.bf16.mxu1 %v8419_v19 }
  0x5d   : > { %6066 = vmatpush3.bf16.msra.mxu0 %v6395_v59  ;;  %v6440_v59 = vld [vmem:[%s8414_s2 + $0x160] ss:$16 sps:$4 sm:$0xff]  }
  0x5e   : > { %6067 = vmatprep.subr.bf16.mxu0 %v8419_v19 }
  0x5f   : > { %6008 = vmatpush3.bf16.msra.mxu1 %v6380_v52  ;;  %v6425_v52 = vld [vmem:[%s8414_s2 + $0x108] ss:$16 sps:$4 sm:$0xff]  }
  0x60   : > { %6033 = vmatprep.subr.bf16.mxu1 %v8419_v19 }
  0x61   : > { %6068 = vmatpush3.bf16.msra.mxu0 %v6397_v61  ;;  %v6437_v61 = vld [vmem:[%s8414_s2 + $0x148] ss:$16 sps:$4 sm:$0xff]  }
  0x62   : > { %6010 = vmatmul.mubr.bf16.vlgmr.msra.gmra.mrb[4].mxu1 %v6941_v57  ;;  %6093 = vmatprep.subr.bf16.mxu0 %v8419_v19 }
  0x63   : > { %6034 = vmatpush3.bf16.msra.mxu1 %v6382_v58  ;;  %6049 = vmatprep.mubr.msk.bf16.mxu1 %vm6697_vm0, %v8419_v19  ;;  %v6439_v58 = vld [vmem:[%s8414_s2 + $0x14c] ss:$16 sps:$4 sm:$0xff]  }
  0x64   : > { %6035 = vmatprep.subr.bf16.mxu1 %v8419_v19  ;;  %6070 = vmatmul.mubr.bf16.vlgmr.msra.gmra.mrb[4].mxu0 %v6972_v2 }
  0x65   : > { %6094 = vmatpush3.bf16.msra.mxu0 %v6399_v1  ;;  %6109 = vmatprep.mubr.msk.bf16.mxu0 %vm6697_vm0, %v8419_v19  ;;  %v6451_v1 = vld [vmem:[%s8414_s2 + $0x18c] ss:$16 sps:$4 sm:$0xff]  }
  0x66   : > { %6095 = vmatprep.subr.bf16.mxu0 %v8419_v19 }
  0x67   : > { %6036 = vmatpush3.bf16.msra.mxu1 %v6384_v60  ;;  %v6448_v60 = vld [vmem:[%s8414_s2 + $0x184] ss:$16 sps:$4 sm:$0xff]  }
  0x68   : > { %6037 = vmatprep.subr.bf16.mxu1 %v8419_v19 }
  0x69   : > { %6096 = vmatpush3.bf16.msra.mxu0 %v6401_v4  ;;  %v6454_v4 = vld [vmem:[%s8414_s2 + $0x1a4] ss:$16 sps:$4 sm:$0xff]  }
  0x6a   : > { %6097 = vmatprep.subr.bf16.mxu0 %v8419_v19 }
  0x6b   : > { %6038 = vmatpush3.bf16.msra.mxu1 %v6386_v0  ;;  %v6443_v0 = vld [vmem:[%s8414_s2 + $0x168] ss:$16 sps:$4 sm:$0xff]  }
  0x6c   : > { %6039 = vmatprep.subr.bf16.mxu1 %v8419_v19 }
  0x6d   : > { %6098 = vmatpush3.bf16.msra.mxu0 %v6403_v6  ;;  %v6452_v6 = vld [vmem:[%s8414_s2 + $0x1a0] ss:$16 sps:$4 sm:$0xff]  }
  0x6e   : > { %6099 = vmatprep.subr.bf16.mxu0 %v8419_v19 }
  0x6f   : > { %6040 = vmatpush3.bf16.msra.mxu1 %v6388_v3  ;;  %v6449_v3 = vld [vmem:[%s8414_s2 + $0x188] ss:$16 sps:$4 sm:$0xff]  }
  0x70   : > { %6041 = vmatprep.subr.bf16.mxu1 %v8419_v19 }
  0x71   : > { %6100 = vmatpush3.bf16.msra.mxu0 %v6405_v8  ;;  %v6460_v8 = vld [vmem:[%s8414_s2 + $0x1c4] ss:$16 sps:$4 sm:$0xff]  }
  0x72   : > { %6101 = vmatprep.subr.bf16.mxu0 %v8419_v19 }
  0x73   : > { %6042 = vmatpush3.bf16.msra.mxu1 %v6390_v5  ;;  %v6457_v5 = vld [vmem:[%s8414_s2 + $0x1ac] ss:$16 sps:$4 sm:$0xff]  }
  0x74   : > { %6043 = vmatprep.subr.bf16.mxu1 %v8419_v19 }
  0x75   : > { %6102 = vmatpush3.bf16.msra.mxu0 %v6407_v10  ;;  %v6458_v10 = vld [vmem:[%s8414_s2 + $0x1c0] ss:$16 sps:$4 sm:$0xff]  }
  0x76   : > { %6103 = vmatprep.subr.bf16.mxu0 %v8419_v19 }
  0x77   : > { %6044 = vmatpush3.bf16.msra.mxu1 %v6392_v7  ;;  %v6455_v7 = vld [vmem:[%s8414_s2 + $0x1a8] ss:$16 sps:$4 sm:$0xff]  }
  0x78   : > { %6045 = vmatprep.subr.bf16.mxu1 %v8419_v19 }
  0x79   : > { %6104 = vmatpush3.bf16.msra.mxu0 %v6409_v14  ;;  %v6467_v14 = vld [vmem:[%s8414_s2 + $0x1e8] ss:$16 sps:$4 sm:$0xff]  }
  0x7a   : > { %6105 = vmatprep.subr.bf16.mxu0 %v8419_v19 }
  0x7b   : > { %6046 = vmatpush3.bf16.msra.mxu1 %v6394_v9  ;;  %v6463_v9 = vld [vmem:[%s8414_s2 + $0x1cc] ss:$16 sps:$4 sm:$0xff]  }
  0x7c   : > { %6047 = vmatprep.subr.bf16.mxu1 %v8419_v19 }
  0x7d   : > { %6106 = vmatpush3.bf16.msra.mxu0 %v6411_v17  ;;  %v8421_v17 = vmov 0  }
  0x7e   : > { %6107 = vmatprep.subr.bf16.mxu0 %v8419_v19 }
  0x7f   : > { %6048 = vmatpush3.bf16.msra.mxu1 %v6396_v11  ;;  %v6461_v11 = vld [vmem:[%s8414_s2 + $0x1c8] ss:$16 sps:$4 sm:$0xff]  }
  0x80   : > { %6073 = vmatprep.subr.bf16.mxu1 %v8419_v19 }
  0x81   : > { %6108 = vmatpush3.bf16.msra.mxu0 %v6413_v20  ;;  %v6470_v20 = vld [vmem:[%s8414_s2] ss:$16 sps:$4 sm:$0xff]  }
  0x82   : > { %6050 = vmatmul.mubr.bf16.vlgmr.msra.gmra.mrb[8].mxu1 %v7022_v16  ;;  %1514 = vmatprep.subr.bf16.mxu0 %v6424_v44 }
  0x83   : > { %6074 = vmatpush3.bf16.msra.mxu1 %v6398_v15  ;;  %6089 = vmatprep.mubr.msk.bf16.mxu1 %vm6697_vm0, %v8419_v19  ;;  %v6469_v15 = vld [vmem:[%s8414_s2 + $0x1ec] ss:$16 sps:$4 sm:$0xff]  }
  0x84   : > { %6075 = vmatprep.subr.bf16.mxu1 %v8419_v19  ;;  %6110 = vmatmul.mubr.bf16.vlgmr.msra.gmra.mrb[8].mxu0 %v7047_v24 }
  0x85   : > { %1515 = vmatpush1.bf16.msra.mxu0 %v6422_v42  ;;  %1546 = vmatprep.mubr.bf16.mxu0 %v8421_v17  ;;  %v6497_v42 = vld [vmem:[%s8414_s2 + $0x68] ss:$16 sps:$4 sm:$0xff]  }
  0x86   : > { %1516 = vmatprep.subr.bf16.mxu0 %v6430_v47  ;;  %v6505_v47 = vld [vmem:[%s8414_s2 + $0x8c] ss:$16 sps:$4 sm:$0xff]  }
  0x87   : > { %6076 = vmatpush3.bf16.msra.mxu1 %v6400_v18  ;;  %v6472_v18 = vld [vmem:[%s8414_s2 + $0x4] ss:$16 sps:$4 sm:$0xff]  }
  0x88   : > { %6077 = vmatprep.subr.bf16.mxu1 %v8419_v19 }
  0x89   : > { %1517 = vmatpush1.bf16.msra.mxu0 %v6428_v49  ;;  %v6508_v49 = vld [vmem:[%s8414_s2 + $0xac] ss:$16 sps:$4 sm:$0xff]  }
  0x8a   : > { %1518 = vmatprep.subr.bf16.mxu0 %v6436_v51  ;;  %v6506_v51 = vld [vmem:[%s8414_s2 + $0xa8] ss:$16 sps:$4 sm:$0xff]  }
  0x8b   : > { %6078 = vmatpush3.bf16.msra.mxu1 %v6402_v23  ;;  %v6478_v23 = vld [vmem:[%s8414_s2 + $0x44] ss:$16 sps:$4 sm:$0xff]  }
  0x8c   : > { %6079 = vmatprep.subr.bf16.mxu1 %v8419_v19 }
  0x8d   : > { %1519 = vmatpush1.bf16.msra.mxu0 %v6434_v54  ;;  %v6500_v54 = vld [vmem:[%s8414_s2 + $0xc0] ss:$16 sps:$4 sm:$0xff]  }
  0x8e   : > { %1520 = vmatprep.subr.bf16.mxu0 %v6442_v55  ;;  %v6502_v55 = vld [vmem:[%s8414_s2 + $0xc4] ss:$16 sps:$4 sm:$0xff]  }
  0x8f   : > { %6080 = vmatpush3.bf16.msra.mxu1 %v6404_v25  ;;  %v6476_v25 = vld [vmem:[%s8414_s2 + $0x40] ss:$16 sps:$4 sm:$0xff]  }
  0x90   : > { %6081 = vmatprep.subr.bf16.mxu1 %v8419_v19 }
  0x91   : > { %1521 = vmatpush1.bf16.msra.mxu0 %v6440_v59 }
  0x92   : > { %1522 = vmatprep.subr.bf16.mxu0 %v6448_v60  ;;  %v6512_v60 = vld [vmem:[%s8414_s2 + $0xc8] ss:$16 sps:$4 sm:$0xff]  }
  0x93   : > { %6082 = vmatpush3.bf16.msra.mxu1 %v6406_v26  ;;  %v6479_v26 = vld [vmem:[%s8414_s2 + $0x60] ss:$16 sps:$4 sm:$0xff]  }
  0x94   : > { %6083 = vmatprep.subr.bf16.mxu1 %v8419_v19 }
  0x95   : > { %1523 = vmatpush1.bf16.msra.mxu0 %v6446_v63  ;;  %v6517_v63 = vld [vmem:[%s8414_s2 + $0xec] ss:$16 sps:$4 sm:$0xff]  }
  0x96   : > { %1524 = vmatprep.subr.bf16.mxu0 %v6454_v4 }
  0x97   : > { %6084 = vmatpush3.bf16.msra.mxu1 %v6408_v27  ;;  %v6481_v27 = vld [vmem:[%s8414_s2 + $0x64] ss:$16 sps:$4 sm:$0xff]  }
  0x98   : > { %6085 = vmatprep.subr.bf16.mxu1 %v8419_v19 }
  0x99   : > { %1525 = vmatpush1.bf16.msra.mxu0 %v6452_v6 }
  0x9a   : > { %1526 = vmatprep.subr.bf16.mxu0 %v6460_v8 }
  0x9b   : > { %6086 = vmatpush3.bf16.msra.mxu1 %v6410_v28  ;;  %v6484_v28 = vld [vmem:[%s8414_s2 + $0x84] ss:$16 sps:$4 sm:$0xff]  }
  0x9c   : > { %6087 = vmatprep.subr.bf16.mxu1 %v8419_v19 }
  0x9d   : > { %1527 = vmatpush1.bf16.msra.mxu0 %v6458_v10 }
  0x9e   : > { %1528 = vmatprep.subr.bf16.mxu0 %v6466_v13 }
  0x9f   : > { %6088 = vmatpush3.bf16.msra.mxu1 %v6412_v29  ;;  %v6485_v29 = vld [vmem:[%s8414_s2 + $0x8] ss:$16 sps:$4 sm:$0xff]  }
  0xa0   : > { %6113 = vmatprep.subr.bf16.mxu1 %v8419_v19 }
  0xa1   : > { %1529 = vmatpush1.bf16.msra.mxu0 %v6464_v12 }
  0xa2   : > { %6090 = vmatmul.mubr.bf16.vlgmr.msra.gmra.mrb[12].mxu1 %v7075_v33  ;;  %1920 = vmatprep.subr.bf16.mxu0 %v6472_v18 }
  0xa3   : > { %6114 = vmatpush3.bf16.msra.mxu1 %v6414_v32  ;;  %6129 = vmatprep.mubr.msk.bf16.mxu1 %vm6697_vm0, %v8419_v19  ;;  %v6493_v32 = vld [vmem:[%s8414_s2 + $0x2c] ss:$16 sps:$4 sm:$0xff]  }
  0xa4   : > { %6115 = vmatprep.subr.bf16.mxu1 %v8419_v19  ;;  %1547 = vmatmul.mubr.bf16.vlgmr.msra.gmra.mrb[12].mxu0 %v6941_v57 }
  0xa5   : > { %1921 = vmatpush1.bf16.msra.mxu0 %v6470_v20  ;;  %1556 = vmatprep.mubr.bf16.mxu0 %v8421_v17 }
  0xa6   : > { %1922 = vmatprep.subr.bf16.mxu0 %v6475_v21 }
  0xa7   : > { %6116 = vmatpush3.bf16.msra.mxu1 %v6415_v34  ;;  %v6490_v34 = vld [vmem:[%s8414_s2 + $0xa4] ss:$16 sps:$4 sm:$0xff]  }
  0xa8   : > { %6117 = vmatprep.subr.bf16.mxu1 %v8419_v19 }
  0xa9   : > { %1923 = vmatpush1.bf16.msra.mxu0 %v6473_v22 }
  0xaa   : > { %1924 = vmatprep.subr.bf16.mxu0 %v6478_v23 }
  0xab   : > { %6118 = vmatpush3.bf16.msra.mxu1 %v6416_v36  ;;  %v6491_v36 = vld [vmem:[%s8414_s2 + $0x28] ss:$16 sps:$4 sm:$0xff]  }
  0xac   : > { %6119 = vmatprep.subr.bf16.mxu1 %v8419_v19  ;;  %1557 = vmatmul.mubr.bf16.gmra.mrb[16].mxu0 %v6863_v35 }
  0xad   : > { %1566 = vmatprep.mubr.bf16.mxu0 %v8421_v17  ;;  %1925 = vmatpush1.bf16.msra.mxu0 %v6476_v25 }
  0xae   : > { %1926 = vmatprep.subr.bf16.mxu0 %v6481_v27 }
  0xaf   : > { %6120 = vmatpush3.bf16.msra.mxu1 %v6417_v37  ;;  %v6488_v37 = vld [vmem:[%s8414_s2 + $0xa0] ss:$16 sps:$4 sm:$0xff]  }
  0xb0   : > { %6121 = vmatprep.subr.bf16.mxu1 %v8419_v19 }
  0xb1   : > { %1927 = vmatpush1.bf16.msra.mxu0 %v6479_v26 }
  0xb2   : > { %1928 = vmatprep.subr.bf16.mxu0 %v6484_v28 }
  0xb3   : > { %6122 = vmatpush3.bf16.msra.mxu1 %v6418_v38  ;;  %v6496_v38 = vld [vmem:[%s8414_s2 + $0x4c] ss:$16 sps:$4 sm:$0xff]  }
  0xb4   : > { %6123 = vmatprep.subr.bf16.mxu1 %v8419_v19  ;;  %1567 = vmatmul.mubr.bf16.gmra.mrb[20].mxu0 %v6891_v43 }
  0xb5   : > { %1576 = vmatprep.mubr.bf16.mxu0 %v8421_v17  ;;  %1929 = vmatpush1.bf16.msra.mxu0 %v6482_v31 }
  0xb6   : > { %1930 = vmatprep.subr.bf16.mxu0 %v6490_v34 }
  0xb7   : > { %6124 = vmatpush3.bf16.msra.mxu1 %v6419_v39  ;;  %v6494_v39 = vld [vmem:[%s8414_s2 + $0x48] ss:$16 sps:$4 sm:$0xff]  }
  0xb8   : > { %6125 = vmatprep.subr.bf16.mxu1 %v8419_v19 }
  0xb9   : > { %1931 = vmatpush1.bf16.msra.mxu0 %v6488_v37 }
  0xba   : > { %1932 = vmatprep.subr.bf16.mxu0 %v6502_v55 }
  0xbb   : > { %6126 = vmatpush3.bf16.msra.mxu1 %v6420_v40  ;;  %v6499_v40 = vld [vmem:[%s8414_s2 + $0x6c] ss:$16 sps:$4 sm:$0xff]  }
  0xbc   : > { %6127 = vmatprep.subr.bf16.mxu1 %v8419_v19  ;;  %1577 = vmatmul.mubr.bf16.gmra.mrb[24].mxu0 %v7022_v16 }
  0xbd   : > { %1586 = vmatprep.mubr.bf16.mxu0 %v8421_v17  ;;  %1933 = vmatpush1.bf16.msra.mxu0 %v6500_v54 }
  0xbf   : > { %6128 = vmatpush3.bf16.msra.mxu1 %v6421_v41 }
  0xc0   : > { %1637 = vmatprep.subr.bf16.mxu1 %v6427_v48  ;;  %v6503_v48 = vld [vmem:[%s8414_s2 + $0x88] ss:$16 sps:$4 sm:$0xff]  }
  0xc2   : > { %6130 = vmatmul.mubr.bf16.vlgmr.msra.gmra.mrb[16].mxu1 %v7126_v50 }
  0xc3   : > { %1638 = vmatpush1.bf16.msra.mxu1 %v6425_v52  ;;  %1669 = vmatprep.mubr.bf16.mxu1 %v8421_v17 }
  0xc4   : > { %1639 = vmatprep.subr.bf16.mxu1 %v6433_v53  ;;  %1587 = vmatmul.mubr.bf16.gmra.mrb[28].mxu0 %v6972_v2 }
  0xc5   : > { %1596 = vmatprep.mubr.bf16.mxu0 %v8421_v17 }
  0xc7   : > { %1640 = vmatpush1.bf16.msra.mxu1 %v6431_v56 }
  0xc8   : > { %1641 = vmatprep.subr.bf16.mxu1 %v6439_v58  ;;  %v6511_v58 = vld [vmem:[%s8414_s2 + $0xe4] ss:$16 sps:$4 sm:$0xff]  }
  0xc9   : > { %1934 = vmatprep.subr.bf16.mxu0 %v6511_v58 }
  0xcb   : > { %1642 = vmatpush1.bf16.msra.mxu1 %v6437_v61  ;;  %v6514_v61 = vld [vmem:[%s8414_s2 + $0xcc] ss:$16 sps:$4 sm:$0xff]  }
  0xcc   : > { %1643 = vmatprep.subr.bf16.mxu1 %v6445_v62  ;;  %1597 = vmatmul.mubr.bf16.gmra.mrb[32].mxu0 %v7075_v33  ;;  %v6509_v62 = vld [vmem:[%s8414_s2 + $0xe0] ss:$16 sps:$4 sm:$0xff]  }
  0xcd   : > { %1606 = vmatprep.mubr.bf16.mxu0 %v8421_v17  ;;  %1935 = vmatpush1.bf16.msra.mxu0 %v6509_v62 }
  0xcf   : > { %1644 = vmatpush1.bf16.msra.mxu1 %v6443_v0  ;;  %v6520_v0 = vld [vmem:[%s8414_s2 + $0x204] ss:$16 sps:$4 sm:$0xff]  }
  0xd0   : > { %1645 = vmatprep.subr.bf16.mxu1 %v6451_v1  ;;  %v6515_v1 = vld [vmem:[%s8414_s2 + $0xe8] ss:$16 sps:$4 sm:$0xff]   ;;  %2369 = vmatprep.subr.bf16.mxu0 %v6520_v0  ;;  %v6523_v0 = vld [vmem:[%s8414_s2 + $0x224] ss:$16 sps:$4 sm:$0xff]  }
  0xd3   : > { %1646 = vmatpush1.bf16.msra.mxu1 %v6449_v3 }
  0xd4   : > { %1647 = vmatprep.subr.bf16.mxu1 %v6457_v5  ;;  %1607 = vmatmul.mubr.bf16.gmra.mrb[36].mxu0 %v7047_v24 }
  0xd5   : > { %1616 = vmatprep.mubr.bf16.mxu0 %v8421_v17 }
  0xd7   : > { %1648 = vmatpush1.bf16.msra.mxu1 %v6455_v7 }
  0xd8   : > { %1649 = vmatprep.subr.bf16.mxu1 %v6463_v9 }
  0xdb   : > { %1650 = vmatpush1.bf16.msra.mxu1 %v6461_v11 }
  0xdc   : > { %1651 = vmatprep.subr.bf16.mxu1 %v6469_v15  ;;  %1617 = vmatmul.mubr.bf16.gmra.mrb[40].mxu0 %v7126_v50  ;;  %v6535_v15 = vld [vmem:[%s8414_s2 + $0x20c] ss:$16 sps:$4 sm:$0xff]  }
  0xdd   : > { %1626 = vmatprep.mubr.bf16.mxu0 %v8421_v17 }
  0xdf   : > { %1652 = vmatpush1.bf16.msra.mxu1 %v6467_v14 }
  0xe0   : > { %2043 = vmatprep.subr.bf16.mxu1 %v6487_v30 }
  0xe2   : > { %1670 = vmatmul.mubr.bf16.vlgmr.msra.gmra.mrb[20].mxu1 %v6941_v57 }
  0xe3   : > { %1679 = vmatprep.mubr.bf16.mxu1 %v8421_v17  ;;  %2044 = vmatpush1.bf16.msra.mxu1 %v6485_v29 }
  0xe4   : > { %2045 = vmatprep.subr.bf16.mxu1 %v6493_v32 }
  0xe7   : > { %2046 = vmatpush1.bf16.msra.mxu1 %v6491_v36 }
  0xe8   : > { %2047 = vmatprep.subr.bf16.mxu1 %v6496_v38 }
  0xea   : > { %1680 = vmatmul.mubr.bf16.gmra.mrb[24].mxu1 %v6863_v35 }
  0xeb   : > { %1689 = vmatprep.mubr.bf16.mxu1 %v8421_v17  ;;  %2048 = vmatpush1.bf16.msra.mxu1 %v6494_v39 }
  0xec   : > { %2049 = vmatprep.subr.bf16.mxu1 %v6499_v40 }
  0xef   : > { %2050 = vmatpush1.bf16.msra.mxu1 %v6497_v42  ;;  %v5063_v42 = vld [vmem:[%s8417_s5] ss:$0 sm:$0xff] }
  0xf0   : > { %2051 = vmatprep.subr.bf16.mxu1 %v6505_v47  ;;  %v372_v47 = vld [vmem:[%s6855_s30 + $0x80] sm:$0xff] }
  0xf1   : > { %v1252_v55 = vmax.f32 %v372_v47, 0.0  ;;  %v6571_v47 = vld [vmem:[%s8415_s3 + $0x110] sm:$0xff]  }
  0xf2   : > { %1690 = vmatmul.mubr.bf16.gmra.mrb[28].mxu1 %v6891_v43 }
  0xf3   : > { %1699 = vmatprep.mubr.bf16.mxu1 %v8421_v17  ;;  %2052 = vmatpush1.bf16.msra.mxu1 %v6503_v48  ;;  %v373_v48 = vld [vmem:[%s6855_s30 + $0x88] sm:$0xff] }
  0xf4   : > { %2053 = vmatprep.subr.bf16.mxu1 %v6508_v49  ;;  %v1253_v58 = vmax.f32 %v373_v48, 0.0  ;;  %v6583_v48 = vld [vmem:[%s8415_s3 + $0x190] sm:$0xff]  }
  0xf7   : > { %2054 = vmatpush1.bf16.msra.mxu1 %v6506_v51 }
  0xf8   : > { %2055 = vmatprep.subr.bf16.mxu1 %v6514_v61 }
  0xfa   : > { %1700 = vmatmul.mubr.bf16.gmra.mrb[32].mxu1 %v7022_v16 }
  0xfb   : > { %1709 = vmatprep.mubr.bf16.mxu1 %v8421_v17  ;;  %2056 = vmatpush1.bf16.msra.mxu1 %v6512_v60 }
  0xfc   : > { %2057 = vmatprep.subr.bf16.mxu1 %v6517_v63  ;;  %v6518_v63 = vld [vmem:[%s8414_s2 + $0x200] ss:$16 sps:$4 sm:$0xff]  }
  0xff   : > { %2058 = vmatpush1.bf16.msra.mxu1 %v6515_v1  ;;  %v6533_v1 = vld [vmem:[%s8414_s2 + $0x208] ss:$16 sps:$4 sm:$0xff]  }
 0x100   : > { %2492 = vmatprep.subr.bf16.mxu1 %v6535_v15  ;;  %v6530_v15 = vld [vmem:[%s8414_s2 + $0x280] ss:$16 sps:$4 sm:$0xff]  }
 0x102   : > { %1710 = vmatmul.mubr.bf16.gmra.mrb[36].mxu1 %v6972_v2 }
 0x103   : > { %1719 = vmatprep.mubr.bf16.mxu1 %v8421_v17 }
 0x10a   : > { %1720 = vmatmul.mubr.bf16.gmra.mrb[40].mxu1 %v7075_v33 }
 0x10b   : > { %1729 = vmatprep.mubr.bf16.mxu1 %v8421_v17 }
 0x112   : > { %1730 = vmatmul.mubr.bf16.gmra.mrb[44].mxu1 %v7047_v24 }
 0x113   : > { %1739 = vmatprep.mubr.bf16.mxu1 %v8421_v17 }
 0x115   : > { %v498_v41 = vpop.f32.mrb[0].mxu1 }
 0x116   : > { %v5991_v44 = vpop.f32.mrb[1].mxu1 }
 0x117   : > { %v501_v45 = vpop.f32.mrb[2].mxu1  ;;  %v693_v52 = vpop.f32.mrb[0].mxu0 }
 0x118   : > { %v5992_v46 = vpop.f32.mrb[3].mxu1  ;;  %v6031_v53 = vpop.f32.mrb[1].mxu0 }
 0x119   : > { %v696_v56 = vpop.f32.mrb[2].mxu0 }
 0x11a   : > { %1740 = vmatmul.mubr.bf16.gmra.mrb[48].mxu1 %v7126_v50  ;;  %v6032_v59 = vpop.f32.mrb[3].mxu0 }
 0x11b   : > { %1749 = vmatprep.mubr.bf16.mxu1 %v8421_v17 }
 0x135   : > { %v587_v3 = vpop.f32.mrb[4].mxu1 }
 0x136   : > { %v588_v4 = vadd.f32 %v587_v3, %v498_v41  ;;  %v6011_v5 = vpop.f32.mrb[5].mxu1  ;;  %v6541_v3 = vld [vmem:[%s8414_s2 + $0x22c] ss:$16 sps:$4 sm:$0xff]  }
 0x137   : > { %v590_v6 = vpop.f32.mrb[6].mxu1  ;;  %v909_v11 = vpop.f32.mrb[4].mxu0  ;;  %v6526_v5 = vld [vmem:[%s8414_s2 + $0x244] ss:$16 sps:$4 sm:$0xff]  }
 0x138   : > { %v591_v7 = vadd.f32 %v590_v6, %v501_v45  ;;  %v700_v8 = vadd.f32 %v693_v52, %v588_v4  ;;  %v6012_v9 = vpop.f32.mrb[7].mxu1  ;;  %v6071_v12 = vpop.f32.mrb[5].mxu0  ;;  %v6521_v4 = vld [vmem:[%s8414_s2 + $0x220] ss:$16 sps:$4 sm:$0xff]   ;;  %v6539_v6 = vld [vmem:[%s8414_s2 + $0x228] ss:$16 sps:$4 sm:$0xff]  }
 0x139   : > { %v912_v13 = vpop.f32.mrb[6].mxu0  ;;  %v6529_v9 = vld [vmem:[%s8414_s2 + $0x264] ss:$16 sps:$4 sm:$0xff]   ;;  %v6527_v12 = vld [vmem:[%s8414_s2 + $0x260] ss:$16 sps:$4 sm:$0xff]  }
 0x13a   : > { %v701_v10 = vadd.f32 %v696_v56, %v591_v7  ;;  %v6072_v14 = vpop.f32.mrb[7].mxu0  ;;  %v6524_v7 = vld [vmem:[%s8414_s2 + $0x240] ss:$16 sps:$4 sm:$0xff]  }
 0x13b   : > { %v6545_v14 = vld [vmem:[%s8414_s2 + $0x268] ss:$16 sps:$4 sm:$0xff]  }
 0x155   : > { %v801_v18 = vpop.f32.mrb[8].mxu1 }
 0x156   : > { %v808_v20 = vadd.f32 %v801_v18, %v700_v8  ;;  %v6051_v21 = vpop.f32.mrb[9].mxu1  ;;  %v6544_v8 = vld [vmem:[%s8414_s2 + $0x24c] ss:$16 sps:$4 sm:$0xff]  }
 0x157   : > { %v804_v22 = vpop.f32.mrb[10].mxu1  ;;  %v1125_v28 = vpop.f32.mrb[8].mxu0  ;;  %v6553_v18 = vld [vmem:[%s8414_s2 + $0x28c] ss:$16 sps:$4 sm:$0xff]   ;;  %v6551_v21 = vld [vmem:[%s8414_s2 + $0x288] ss:$16 sps:$4 sm:$0xff]  }
 0x158   : > { %v809_v23 = vadd.f32 %v804_v22, %v701_v10  ;;  %v916_v25 = vadd.f32 %v909_v11, %v808_v20  ;;  %v6052_v26 = vpop.f32.mrb[11].mxu1  ;;  %v6111_v29 = vpop.f32.mrb[9].mxu0  ;;  %v6542_v10 = vld [vmem:[%s8414_s2 + $0x248] ss:$16 sps:$4 sm:$0xff]   ;;  %v6547_v11 = vld [vmem:[%s8414_s2 + $0x26c] ss:$16 sps:$4 sm:$0xff]  }
 0x159   : > { %v1128_v30 = vpop.f32.mrb[10].mxu0  ;;  %v6538_v20 = vld [vmem:[%s8414_s2 + $0x2a4] ss:$16 sps:$4 sm:$0xff]   ;;  %v6556_v22 = vld [vmem:[%s8414_s2 + $0x2ac] ss:$16 sps:$4 sm:$0xff]  }
 0x15a   : > { %v917_v27 = vadd.f32 %v912_v13, %v809_v23  ;;  %v6112_v31 = vpop.f32.mrb[11].mxu0  ;;  %v6532_v13 = vld [vmem:[%s8414_s2 + $0x284] ss:$16 sps:$4 sm:$0xff]   ;;  %v6536_v23 = vld [vmem:[%s8414_s2 + $0x2a0] ss:$16 sps:$4 sm:$0xff]  }
 0x15b   : > { %v6554_v26 = vld [vmem:[%s8414_s2 + $0x2a8] ss:$16 sps:$4 sm:$0xff]   ;;  %v6559_v29 = vld [vmem:[%s8414_s2 + $0x2e4] ss:$16 sps:$4 sm:$0xff]   ;;  %v6565_v31 = vld [vmem:[%s8414_s2 + $0x2ec] ss:$16 sps:$4 sm:$0xff]  }
 0x175   : > { %v1017_v32 = vpop.f32.mrb[12].mxu1 }
 0x176   : > { %v1024_v34 = vadd.f32 %v1017_v32, %v916_v25  ;;  %v6091_v36 = vpop.f32.mrb[13].mxu1  ;;  %v6550_v25 = vld [vmem:[%s8414_s2 + $0x2c4] ss:$16 sps:$4 sm:$0xff]   ;;  %v6557_v32 = vld [vmem:[%s8414_s2 + $0x2e0] ss:$16 sps:$4 sm:$0xff]  }
 0x177   : > { %v1020_v37 = vpop.f32.mrb[14].mxu1  ;;  %v6566_v36 = vld [vmem:[%s8415_s3 + $0x140] sm:$0xff]  }
 0x178   : > { %v1025_v38 = vadd.f32 %v1020_v37, %v917_v27  ;;  %v1132_v39 = vadd.f32 %v1125_v28, %v1024_v34  ;;  %v6092_v40 = vpop.f32.mrb[15].mxu1  ;;  %v6548_v27 = vld [vmem:[%s8414_s2 + $0x2c0] ss:$16 sps:$4 sm:$0xff]   ;;  %v6562_v28 = vld [vmem:[%s8414_s2 + $0x2cc] ss:$16 sps:$4 sm:$0xff]  }
 0x179   : > { %v6563_v34 = vld [vmem:[%s8414_s2 + $0x2e8] ss:$16 sps:$4 sm:$0xff]   ;;  %v6576_v37 = vld [vmem:[%s8415_s3 + $0x1c0] sm:$0xff]  }
 0x17a   : > { %v1133_v41 = vadd.f32 %v1128_v30, %v1025_v38  ;;  %v6560_v30 = vld [vmem:[%s8414_s2 + $0x2c8] ss:$16 sps:$4 sm:$0xff]   ;;  %v6567_v38 = vld [vmem:[%s8415_s3 + $0x100] sm:$0xff]  }
 0x17b   : > { %v6568_v40 = vld [vmem:[%s8415_s3 + $0x148] sm:$0xff]  }
 0x195   : > { %v1233_v44 = vpop.f32.mrb[16].mxu1 }
 0x196   : > { %v1240_v45 = vadd.f32 %v1233_v44, %v1132_v39  ;;  %v6131_v46 = vpop.f32.mrb[17].mxu1  ;;  %v6577_v39 = vld [vmem:[%s8415_s3 + $0x180] sm:$0xff]   ;;  %v6581_v44 = vld [vmem:[%s8415_s3 + $0x188] sm:$0xff]  }
 0x197   : > { %v1236_v49 = vpop.f32.mrb[18].mxu1  ;;  %v6582_v46 = vld [vmem:[%s8415_s3 + $0x1d0] sm:$0xff]  }
 0x198   : > { %v1248_v51 = vadd.f32 %v5063_v42, %v1240_v45  ;;  %v1241_v52 = vadd.f32 %v1236_v49, %v1133_v41  ;;  %v6132_v53 = vpop.f32.mrb[19].mxu1  ;;  %v6579_v41 = vld [vmem:[%s8415_s3 + $0x1c8] sm:$0xff]   ;;  %v6570_v45 = vld [vmem:[%s8415_s3 + $0x150] sm:$0xff]   ;;  %v6572_v49 = vld [vmem:[%s8415_s3 + $0x158] sm:$0xff]  }
 0x199   : > { %v6586_v53 = vld [vmem:[%s8415_s3 + $0x198] sm:$0xff]  }
 0x19a   : > { %v1250_v54 = vmax.f32 %v1248_v51, 0.0  ;;  %v1249_v56 = vadd.f32 %v5063_v42, %v1241_v52  ;;  %v6569_v42 = vld [vmem:[%s8415_s3 + $0x108] sm:$0xff]   ;;  %v6584_v51 = vld [vmem:[%s8415_s3 + $0x1d8] sm:$0xff]  }
 0x19b   : > { %v6573_v52 = vld [vmem:[%s8415_s3 + $0x118] sm:$0xff]  }
 0x19c   : > { %v1251_v59 = vmax.f32 %v1249_v56, 0.0  ;;  %v1254_v60 = vsub.f32 %v1252_v55, %v1250_v54  ;;  %v6574_v54 = vld [vmem:[%s8415_s3 + $0x160] sm:$0xff]  }
 0x19d   : > { %v6588_v55 = vld [vmem:[%s8415_s3 + $0x1e0] sm:$0xff]  }
 0x19e   : > { %v1255_v61 = vsub.f32 %v1253_v58, %v1251_v59  ;;  %v6575_v56 = vld [vmem:[%s8415_s3 + $0x120] sm:$0xff]   ;;  %v6578_v59 = vld [vmem:[%s8415_s3 + $0x168] sm:$0xff]  }
 0x19f   : > { %v6589_v58 = vld [vmem:[%s8415_s3 + $0x1a0] sm:$0xff]  }
 0x1a0   : > { %v7351_v62 = vpack.c.bf16 %v1255_v61, %v1254_v60  ;;  %v6590_v60 = vld [vmem:[%s8415_s3 + $0x1e8] sm:$0xff]  }
 0x1a1   : > { %v6580_v61 = vld [vmem:[%s8415_s3 + $0x128] sm:$0xff]  }
 0x1a2   : > { %1627 = vmatmul.mubr.bf16.gmra.mrb[44].mxu0 %v7351_v62  ;;  %1750 = vmatmul.mubr.bf16.gmra.mrb[52].mxu1 %v7351_v62 }
 0x1a3   : > { %1952 = vmatprep.mubr.bf16.mxu0 %v8421_v17  ;;  %2075 = vmatprep.mubr.bf16.mxu1 %v8421_v17 }
 0x1aa   : > { %1953 = vmatmul.mubr.bf16.vlgmr.msra.gmra.mrb[12].mxu0 %v8421_v17  ;;  %2076 = vmatmul.mubr.bf16.vlgmr.msra.gmra.mrb[20].mxu1 %v8421_v17 }
 0x1ab   : > { %2370 = vmatpush1.bf16.msra.mxu0 %v6518_v63  ;;  %1962 = vmatprep.mubr.bf16.mxu0 %v8421_v17  ;;  %v6585_v63 = vld [vmem:[%s8415_s3 + $0x170] sm:$0xff]  }
 0x1ac   : > { %2085 = vmatprep.mubr.bf16.mxu1 %v8421_v17  ;;  %2371 = vmatprep.subr.bf16.mxu0 %v6523_v0  ;;  %v6587_v0 = vld [vmem:[%s8415_s3 + $0x130] sm:$0xff]  }
 0x1ad   : > { %2493 = vmatpush1.bf16.msra.mxu1 %v6533_v1  ;;  %v6591_v1 = vld [vmem:[%s8415_s3 + $0x1a8] sm:$0xff]  }
 0x1ae   : > { %2494 = vmatprep.subr.bf16.mxu1 %v6541_v3  ;;  %v6594_v3 = vld [vmem:[%s8415_s3 + $0x1f0] sm:$0xff]  }
 0x1af   : > { %2372 = vmatpush1.bf16.msra.mxu0 %v6521_v4  ;;  %v6592_v4 = vld [vmem:[%s8415_s3 + $0x178] sm:$0xff]  }
 0x1b0   : > { %2373 = vmatprep.subr.bf16.mxu0 %v6526_v5  ;;  %v6596_v5 = vld [vmem:[%s8415_s3 + $0x1f8] sm:$0xff]  }
 0x1b1   : > { %2495 = vmatpush1.bf16.msra.mxu1 %v6539_v6  ;;  %v6593_v6 = vld [vmem:[%s8415_s3 + $0x138] sm:$0xff]  }
 0x1b2   : > { %1963 = vmatmul.mubr.bf16.gmra.mrb[16].mxu0 %v6941_v57  ;;  %2086 = vmatmul.mubr.bf16.gmra.mrb[24].mxu1 %v6941_v57 }
 0x1b3   : > { %1972 = vmatprep.mubr.bf16.mxu0 %v8421_v17  ;;  %2095 = vmatprep.mubr.bf16.mxu1 %v8421_v17 }
 0x1b4   : > { %2374 = vmatpush1.bf16.msra.mxu0 %v6524_v7  ;;  %2496 = vmatprep.subr.bf16.mxu1 %v6544_v8  ;;  %v6597_v7 = vld [vmem:[%s8415_s3 + $0x1b8] sm:$0xff]   ;;  %v6598_v8 = vld [vmem:[%s8415_s3 + $0x40] sm:$0xff]  }
 0x1b5   : > { %2375 = vmatprep.subr.bf16.mxu0 %v6529_v9  ;;  %2497 = vmatpush1.bf16.msra.mxu1 %v6542_v10  ;;  %v6608_v9 = vld [vmem:[%s8415_s3 + $0xc0] sm:$0xff]   ;;  %v2688_v10 = vlaneseq }
 0x1b6   : > { %2498 = vmatprep.subr.bf16.mxu1 %v6547_v11 }
 0x1b7   : > { %v2689_v11 = vshrl.u32 %v2688_v10, 7 }
 0x1b8   : > { %2376 = vmatpush1.bf16.msra.mxu0 %v6527_v12 }
 0x1b9   : > { %2377 = vmatprep.subr.bf16.mxu0 %v6532_v13  ;;  %2499 = vmatpush1.bf16.msra.mxu1 %v6545_v14  ;;  %v2690_v12 = vsub.s32 0, %v2689_v11  ;;  %v2698_v13 = vsub.s32 2, %v2689_v11  ;;  %v353_v14 = vld [vmem:[%s8417_s5 + $0x1] sm:$0xf] }
 0x1ba   : > { %1973 = vmatmul.mubr.bf16.gmra.mrb[20].mxu0 %v6863_v35  ;;  %2096 = vmatmul.mubr.bf16.gmra.mrb[28].mxu1 %v6863_v35 }
 0x1bb   : > { %1982 = vmatprep.mubr.bf16.mxu0 %v8421_v17  ;;  %2105 = vmatprep.mubr.bf16.mxu1 %v8421_v17 }
 0x1bc   : > { %2378 = vmatpush1.bf16.msra.mxu0 %v6530_v15  ;;  %2500 = vmatprep.subr.bf16.mxu1 %v6553_v18  ;;  %v2694_v15 = vsub.s32 1, %v2689_v11  ;;  %v2702_v18 = vsub.s32 3, %v2689_v11 }
 0x1bd   : > { %2379 = vmatprep.subr.bf16.mxu0 %v6538_v20  ;;  %2501 = vmatpush1.bf16.msra.mxu1 %v6551_v21  ;;  %v7622_v20 = vrot.slane %v353_v14, %v2690_v12  ;;  %v7624_v21 = vrot.slane %v353_v14, %v2698_v13 }
 0x1be   : > { %2502 = vmatprep.subr.bf16.mxu1 %v6556_v22  ;;  %v7626_v22 = vrot.slane %v353_v14, %v2694_v15  ;;  %v6601_v15 = vld [vmem:[%s8415_s3 + $0x8] sm:$0xff]  }
 0x1c0   : > { %2380 = vmatpush1.bf16.msra.mxu0 %v6536_v23  ;;  %v7628_v23 = vrot.slane %v353_v14, %v2702_v18  ;;  %v6613_v18 = vld [vmem:[%s8415_s3 + $0x88] sm:$0xff]  }
 0x1c1   : > { %2381 = vmatprep.subr.bf16.mxu0 %v6550_v25  ;;  %2503 = vmatpush1.bf16.msra.mxu1 %v6554_v26 }
 0x1c2   : > { %1983 = vmatmul.mubr.bf16.gmra.mrb[24].mxu0 %v6891_v43  ;;  %2106 = vmatmul.mubr.bf16.gmra.mrb[32].mxu1 %v6891_v43 }
 0x1c3   : > { %1992 = vmatprep.mubr.bf16.mxu0 %v8421_v17  ;;  %2115 = vmatprep.mubr.bf16.mxu1 %v8421_v17 }
 0x1c4   : > { %2382 = vmatpush1.bf16.msra.mxu0 %v6548_v27  ;;  %2504 = vmatprep.subr.bf16.mxu1 %v6562_v28 }
 0x1c5   : > { %2383 = vmatprep.subr.bf16.mxu0 %v6559_v29  ;;  %2505 = vmatpush1.bf16.msra.mxu1 %v6560_v30 }
 0x1c6   : > { %2506 = vmatprep.subr.bf16.mxu1 %v6565_v31 }
 0x1c8   : > { %2384 = vmatpush1.bf16.msra.mxu0 %v6557_v32 }
 0x1c9   : > { %2507 = vmatpush1.bf16.msra.mxu1 %v6563_v34  ;;  %5536 = vmatprep.subr.bf16.mxu0 %v6566_v36 }
 0x1ca   : > { %1993 = vmatmul.mubr.bf16.gmra.mrb[28].mxu0 %v7022_v16  ;;  %2116 = vmatmul.mubr.bf16.gmra.mrb[36].mxu1 %v7022_v16 }
 0x1cb   : > { %2002 = vmatprep.mubr.bf16.mxu0 %v8421_v17  ;;  %2125 = vmatprep.mubr.bf16.mxu1 %v8421_v17 }
 0x1cc   : > { %5606 = vmatprep.subr.bf16.mxu1 %v6576_v37 }
 0x1d2   : > { %2003 = vmatmul.mubr.bf16.gmra.mrb[32].mxu0 %v6972_v2  ;;  %2126 = vmatmul.mubr.bf16.gmra.mrb[40].mxu1 %v6972_v2 }
 0x1d3   : > { %2012 = vmatprep.mubr.bf16.mxu0 %v8421_v17  ;;  %2135 = vmatprep.mubr.bf16.mxu1 %v8421_v17 }
 0x1da   : > { %2013 = vmatmul.mubr.bf16.gmra.mrb[36].mxu0 %v7075_v33  ;;  %2136 = vmatmul.mubr.bf16.gmra.mrb[44].mxu1 %v7075_v33 }
 0x1db   : > { %2022 = vmatprep.mubr.bf16.mxu0 %v8421_v17  ;;  %2145 = vmatprep.mubr.bf16.mxu1 %v8421_v17 }
 0x1e2   : > { %2023 = vmatmul.mubr.bf16.gmra.mrb[40].mxu0 %v7047_v24  ;;  %2146 = vmatmul.mubr.bf16.gmra.mrb[48].mxu1 %v7047_v24 }
 0x1e3   : > { %2032 = vmatprep.mubr.bf16.mxu0 %v8421_v17  ;;  %2155 = vmatprep.mubr.bf16.mxu1 %v8421_v17 }
 0x1ea   : > { %2033 = vmatmul.mubr.bf16.gmra.mrb[44].mxu0 %v7126_v50  ;;  %2156 = vmatmul.mubr.bf16.gmra.mrb[52].mxu1 %v7126_v50 }
 0x1eb   : > { %2401 = vmatprep.mubr.bf16.mxu0 %v8421_v17  ;;  %2524 = vmatprep.mubr.bf16.mxu1 %v8421_v17 }
 0x1f2   : > { %2402 = vmatmul.mubr.bf16.vlgmr.msra.gmra.mrb[12].mxu0 %v6863_v35  ;;  %2525 = vmatmul.mubr.bf16.vlgmr.msra.gmra.mrb[20].mxu1 %v6863_v35 }
 0x1f3   : > { %2411 = vmatprep.mubr.bf16.mxu0 %v8421_v17  ;;  %2534 = vmatprep.mubr.bf16.mxu1 %v8421_v17 }
 0x1f4   : > { %5537 = vmatpush3.bf16.msra.mxu0 %v6567_v38  ;;  %5607 = vmatpush3.bf16.msra.mxu1 %v6577_v39 }
 0x1f5   : > { %5538 = vmatprep.subr.bf16.mxu0 %v6568_v40  ;;  %5608 = vmatprep.subr.bf16.mxu1 %v6579_v41 }
 0x1f8   : > { %5539 = vmatpush3.bf16.msra.mxu0 %v6569_v42  ;;  %5609 = vmatpush3.bf16.msra.mxu1 %v6581_v44 }
 0x1f9   : > { %5540 = vmatprep.subr.bf16.mxu0 %v6570_v45  ;;  %5610 = vmatprep.subr.bf16.mxu1 %v6582_v46 }
 0x1fa   : > { %2412 = vmatmul.mubr.bf16.gmra.mrb[16].mxu0 %v6891_v43  ;;  %2535 = vmatmul.mubr.bf16.gmra.mrb[24].mxu1 %v6891_v43 }
 0x1fb   : > { %2421 = vmatprep.mubr.bf16.mxu0 %v8421_v17  ;;  %2544 = vmatprep.mubr.bf16.mxu1 %v8421_v17 }
 0x1fc   : > { %5541 = vmatpush3.bf16.msra.mxu0 %v6571_v47  ;;  %5611 = vmatpush3.bf16.msra.mxu1 %v6583_v48 }
 0x1fd   : > { %5542 = vmatprep.subr.bf16.mxu0 %v6572_v49  ;;  %5612 = vmatprep.subr.bf16.mxu1 %v6584_v51 }
 0x200   : > { %5543 = vmatpush3.bf16.msra.mxu0 %v6573_v52  ;;  %5613 = vmatpush3.bf16.msra.mxu1 %v6586_v53 }
 0x201   : > { %5544 = vmatprep.subr.bf16.mxu0 %v6574_v54  ;;  %5614 = vmatprep.subr.bf16.mxu1 %v6588_v55 }
 0x202   : > { %2422 = vmatmul.mubr.bf16.gmra.mrb[20].mxu0 %v7022_v16  ;;  %2545 = vmatmul.mubr.bf16.gmra.mrb[28].mxu1 %v7022_v16 }
 0x203   : > { %2431 = vmatprep.mubr.bf16.mxu0 %v8421_v17  ;;  %2554 = vmatprep.mubr.bf16.mxu1 %v8421_v17 }
 0x204   : > { %5545 = vmatpush3.bf16.msra.mxu0 %v6575_v56  ;;  %5615 = vmatpush3.bf16.msra.mxu1 %v6589_v58 }
 0x205   : > { %5546 = vmatprep.subr.bf16.mxu0 %v6578_v59  ;;  %5616 = vmatprep.subr.bf16.mxu1 %v6590_v60  ;;  %v6599_v60 = vld [vmem:[%s8415_s3] sm:$0xff]  }
 0x208   : > { %5547 = vmatpush3.bf16.msra.mxu0 %v6580_v61  ;;  %5617 = vmatpush3.bf16.msra.mxu1 %v6591_v1  ;;  %v6609_v61 = vld [vmem:[%s8415_s3 + $0x80] sm:$0xff]  }
 0x209   : > { %5548 = vmatprep.subr.bf16.mxu0 %v6585_v63  ;;  %5618 = vmatprep.subr.bf16.mxu1 %v6594_v3 }
 0x20a   : > { %2432 = vmatmul.mubr.bf16.gmra.mrb[24].mxu0 %v6972_v2  ;;  %2555 = vmatmul.mubr.bf16.gmra.mrb[32].mxu1 %v6972_v2 }
 0x20b   : > { %2441 = vmatprep.mubr.bf16.mxu0 %v8421_v17  ;;  %2564 = vmatprep.mubr.bf16.mxu1 %v8421_v17 }
 0x20c   : > { %5549 = vmatpush3.bf16.msra.mxu0 %v6587_v0 }
 0x20d   : > { %5550 = vmatprep.subr.bf16.mxu0 %v6592_v4  ;;  %v6611_v4 = vld [vmem:[%s8415_s3 + $0xc8] sm:$0xff]  }
 0x210   : > { %5551 = vmatpush3.bf16.msra.mxu0 %v6593_v6 }
 0x211   : > { %5676 = vmatprep.subr.bf16.mxu0 %v6598_v8 }
 0x212   : > { %2442 = vmatmul.mubr.bf16.gmra.mrb[28].mxu0 %v7075_v33  ;;  %2565 = vmatmul.mubr.bf16.gmra.mrb[36].mxu1 %v7075_v33 }
 0x213   : > { %2451 = vmatprep.mubr.bf16.mxu0 %v8421_v17  ;;  %2574 = vmatprep.mubr.bf16.mxu1 %v8421_v17 }
 0x21a   : > { %2452 = vmatmul.mubr.bf16.gmra.mrb[32].mxu0 %v7047_v24  ;;  %2575 = vmatmul.mubr.bf16.gmra.mrb[40].mxu1 %v7047_v24 }
 0x21b   : > { %2461 = vmatprep.mubr.bf16.mxu0 %v8421_v17  ;;  %2584 = vmatprep.mubr.bf16.mxu1 %v8421_v17 }
 0x222   : > { %2462 = vmatmul.mubr.bf16.gmra.mrb[36].mxu0 %v7126_v50  ;;  %2585 = vmatmul.mubr.bf16.gmra.mrb[44].mxu1 %v7126_v50 }
 0x223   : > { %2471 = vmatprep.mubr.bf16.mxu0 %v8421_v17  ;;  %2594 = vmatprep.mubr.bf16.mxu1 %v8421_v17 }
 0x22a   : > { %2472 = vmatmul.mubr.bf16.gmra.mrb[40].mxu0 %v7351_v62  ;;  %2595 = vmatmul.mubr.bf16.gmra.mrb[48].mxu1 %v7351_v62  ;;  %v6595_v62 = vld [vmem:[%s8415_s3 + $0x1b0] sm:$0xff]  }
 0x22b   : > { %2481 = vmatprep.mubr.bf16.mxu0 %v8421_v17  ;;  %2604 = vmatprep.mubr.bf16.mxu1 %v8421_v17 }
 0x22c   : > { %5619 = vmatpush3.bf16.msra.mxu1 %v6595_v62  ;;  %v6600_v62 = vld [vmem:[%s8415_s3 + $0x48] sm:$0xff]  }
 0x22d   : > { %5620 = vmatprep.subr.bf16.mxu1 %v6596_v5 }
 0x230   : > { %5621 = vmatpush3.bf16.msra.mxu1 %v6597_v7 }
 0x231   : > { %5746 = vmatprep.subr.bf16.mxu1 %v6608_v9 }
 0x232   : > { %2482 = vmatmul.mubr.bf16.gmra.mrb[44].mxu0 %v8421_v17  ;;  %2605 = vmatmul.mubr.bf16.gmra.mrb[52].mxu1 %v8421_v17 }
 0x2c5   : > { %v2403_v25 = vpop.f32.mrb[12].mxu0  ;;  %v2526_v26 = vpop.f32.mrb[20].mxu1 }
 0x2c6   : > { %v2708_v27 = vadd.f32 %v7622_v20, %v2403_v25  ;;  %v2710_v28 = vadd.f32 %v7624_v21, %v2526_v26  ;;  %v2405_v29 = vpop.f32.mrb[13].mxu0  ;;  %v2528_v30 = vpop.f32.mrb[21].mxu1 }
 0x2c7   : > { %v2709_v31 = vadd.f32 %v7626_v22, %v2405_v29  ;;  %v2711_v32 = vadd.f32 %v7628_v23, %v2528_v30  ;;  %v2407_v34 = vpop.f32.mrb[14].mxu0  ;;  %v2530_v36 = vpop.f32.mrb[22].mxu1  ;;  %v6602_v29 = vld [vmem:[%s8415_s3 + $0x50] sm:$0xff]  }
 0x2c8   : > { %v2712_v37 = vadd.f32 %v7622_v20, %v2407_v34  ;;  %v2714_v38 = vadd.f32 %v7624_v21, %v2530_v36  ;;  %v2409_v39 = vpop.f32.mrb[15].mxu0  ;;  %v2532_v40 = vpop.f32.mrb[23].mxu1  ;;  %v2780_v44 = vmax.f32 %v2708_v27, 0.0  ;;  %v2782_v45 = vmax.f32 %v2710_v28, 0.0  ;;  %v6614_v30 = vld [vmem:[%s8415_s3 + $0xd0] sm:$0xff]  }
 0x2c9   : > { %v2713_v41 = vadd.f32 %v7626_v22, %v2409_v39  ;;  %v2715_v42 = vadd.f32 %v7628_v23, %v2532_v40  ;;  %v2781_v48 = vmax.f32 %v2709_v31, 0.0  ;;  %v2783_v49 = vmax.f32 %v2711_v32, 0.0 }
 0x2ca   : > { %v2784_v46 = vmax.f32 %v2712_v37, 0.0  ;;  %v2786_v47 = vmax.f32 %v2714_v38, 0.0 }
 0x2cb   : > { %v2785_v51 = vmax.f32 %v2713_v41, 0.0  ;;  %v2787_v52 = vmax.f32 %v2715_v42, 0.0 }
 0x2cc   : > { %v7638_v53 = vpack.c.bf16 %v2784_v46, %v2780_v44  ;;  %v7640_v54 = vpack.c.bf16 %v2786_v47, %v2782_v45  ;;  %v6603_v44 = vld [vmem:[%s8415_s3 + $0x10] sm:$0xff]  }
 0x2cd   : > { %v7642_v55 = vpack.c.bf16 %v2785_v51, %v2781_v48  ;;  %v7644_v56 = vpack.c.bf16 %v2787_v52, %v2783_v49  ;;  %v2413_v58 = vpop.f32.mrb[16].mxu0  ;;  %v2536_v59 = vpop.f32.mrb[24].mxu1  ;;  %v6615_v45 = vld [vmem:[%s8415_s3 + $0x90] sm:$0xff]   ;;  %v6604_v51 = vld [vmem:[%s8415_s3 + $0x58] sm:$0xff]  }
 0x2ce   : > { %v2716_v63 = vadd.f32 %v7622_v20, %v2413_v58  ;;  %v2718_v0 = vadd.f32 %v7624_v21, %v2536_v59  ;;  %v2415_v1 = vpop.f32.mrb[17].mxu0  ;;  %v2538_v3 = vpop.f32.mrb[25].mxu1  ;;  %v6616_v52 = vld [vmem:[%s8415_s3 + $0xd8] sm:$0xff]  }
 0x2cf   : > { %v2717_v5 = vadd.f32 %v7626_v22, %v2415_v1  ;;  %v2719_v6 = vadd.f32 %v7628_v23, %v2538_v3  ;;  %v2417_v7 = vpop.f32.mrb[18].mxu0  ;;  %v2540_v8 = vpop.f32.mrb[26].mxu1  ;;  %3359 = vmatprep.mubr.bf16.mxu0 %v7642_v55  ;;  %3464 = vmatprep.mubr.bf16.mxu1 %v7644_v56 }
 0x2d0   : > { %v2720_v9 = vadd.f32 %v7622_v20, %v2417_v7  ;;  %v2722_v10 = vadd.f32 %v7624_v21, %v2540_v8  ;;  %v2419_v11 = vpop.f32.mrb[19].mxu0  ;;  %v2542_v12 = vpop.f32.mrb[27].mxu1  ;;  %3360 = vmatmul.mubr.bf16.vlgmr.msra.gmra.mrb[48].mxu0 %v7638_v53  ;;  %3465 = vmatmul.mubr.bf16.vlgmr.msra.gmra.mrb[56].mxu1 %v7640_v54  ;;  %v2788_v25 = vmax.f32 %v2716_v63, 0.0  ;;  %v2790_v26 = vmax.f32 %v2718_v0, 0.0 }
 0x2d1   : > { %v2721_v13 = vadd.f32 %v7626_v22, %v2419_v11  ;;  %v2723_v14 = vadd.f32 %v7628_v23, %v2542_v12  ;;  %5677 = vmatpush3.bf16.msra.mxu0 %v6599_v60  ;;  %5747 = vmatpush3.bf16.msra.mxu1 %v6609_v61  ;;  %v2789_v31 = vmax.f32 %v2717_v5, 0.0  ;;  %v2791_v32 = vmax.f32 %v2719_v6, 0.0  ;;  %v6605_v5 = vld [vmem:[%s8415_s3 + $0x18] sm:$0xff]   ;;  %v6606_v11 = vld [vmem:[%s8415_s3 + $0x60] sm:$0xff]  }
 0x2d2   : > { %v2792_v27 = vmax.f32 %v2720_v9, 0.0  ;;  %v2794_v28 = vmax.f32 %v2722_v10, 0.0  ;;  %5678 = vmatprep.subr.bf16.mxu0 %v6600_v62  ;;  %5748 = vmatprep.subr.bf16.mxu1 %v6611_v4  ;;  %v6618_v6 = vld [vmem:[%s8415_s3 + $0x98] sm:$0xff]   ;;  %v6620_v12 = vld [vmem:[%s8415_s3 + $0xe0] sm:$0xff]  }
 0x2d3   : > { %v2793_v34 = vmax.f32 %v2721_v13, 0.0  ;;  %v2795_v36 = vmax.f32 %v2723_v14, 0.0 }
 0x2d4   : > { %v7682_v37 = vpack.c.bf16 %v2792_v27, %v2788_v25  ;;  %v7684_v38 = vpack.c.bf16 %v2794_v28, %v2790_v26 }
 0x2d5   : > { %v7686_v39 = vpack.c.bf16 %v2793_v34, %v2789_v31  ;;  %v7688_v40 = vpack.c.bf16 %v2795_v36, %v2791_v32  ;;  %v2423_v41 = vpop.f32.mrb[20].mxu0  ;;  %v2546_v42 = vpop.f32.mrb[28].mxu1  ;;  %5679 = vmatpush3.bf16.msra.mxu0 %v6601_v15  ;;  %5749 = vmatpush3.bf16.msra.mxu1 %v6613_v18  ;;  %v6607_v31 = vld [vmem:[%s8415_s3 + $0x20] sm:$0xff]  }
 0x2d6   : > { %v2724_v46 = vadd.f32 %v7622_v20, %v2423_v41  ;;  %v2726_v47 = vadd.f32 %v7624_v21, %v2546_v42  ;;  %v2425_v48 = vpop.f32.mrb[21].mxu0  ;;  %v2548_v49 = vpop.f32.mrb[29].mxu1  ;;  %5680 = vmatprep.subr.bf16.mxu0 %v6602_v29  ;;  %5750 = vmatprep.subr.bf16.mxu1 %v6614_v30  ;;  %v6621_v32 = vld [vmem:[%s8415_s3 + $0xa0] sm:$0xff]  }
 0x2d7   : > { %v2725_v58 = vadd.f32 %v7626_v22, %v2425_v48  ;;  %v2727_v59 = vadd.f32 %v7628_v23, %v2548_v49  ;;  %v2427_v60 = vpop.f32.mrb[22].mxu0  ;;  %v2550_v61 = vpop.f32.mrb[30].mxu1  ;;  %3367 = vmatprep.mubr.bf16.mxu0 %v7686_v39  ;;  %3472 = vmatprep.mubr.bf16.mxu1 %v7688_v40 }
 0x2d8   : > { %v2728_v63 = vadd.f32 %v7622_v20, %v2427_v60  ;;  %v2730_v0 = vadd.f32 %v7624_v21, %v2550_v61  ;;  %v2429_v1 = vpop.f32.mrb[23].mxu0  ;;  %v2552_v3 = vpop.f32.mrb[31].mxu1  ;;  %3368 = vmatmul.mubr.bf16.gmra.mrb[52].mxu0 %v7682_v37  ;;  %3473 = vmatmul.mubr.bf16.gmra.mrb[60].mxu1 %v7684_v38  ;;  %v2796_v7 = vmax.f32 %v2724_v46, 0.0  ;;  %v2798_v8 = vmax.f32 %v2726_v47, 0.0 }
 0x2d9   : > { %v2729_v62 = vadd.f32 %v7626_v22, %v2429_v1  ;;  %v2731_v4 = vadd.f32 %v7628_v23, %v2552_v3  ;;  %5681 = vmatpush3.bf16.msra.mxu0 %v6603_v44  ;;  %5751 = vmatpush3.bf16.msra.mxu1 %v6615_v45  ;;  %v2797_v13 = vmax.f32 %v2725_v58, 0.0  ;;  %v2799_v14 = vmax.f32 %v2727_v59, 0.0  ;;  %v6610_v44 = vld [vmem:[%s8415_s3 + $0x68] sm:$0xff]  }
 0x2da   : > { %v2800_v9 = vmax.f32 %v2728_v63, 0.0  ;;  %v2802_v10 = vmax.f32 %v2730_v0, 0.0  ;;  %5682 = vmatprep.subr.bf16.mxu0 %v6604_v51  ;;  %5752 = vmatprep.subr.bf16.mxu1 %v6616_v52  ;;  %v6622_v45 = vld [vmem:[%s8415_s3 + $0xe8] sm:$0xff]  }
 0x2db   : > { %v2801_v15 = vmax.f32 %v2729_v62, 0.0  ;;  %v2803_v18 = vmax.f32 %v2731_v4, 0.0  ;;  %v6612_v63 = vld [vmem:[%s8415_s3 + $0x28] sm:$0xff]  }
 0x2dc   : > { %v7726_v25 = vpack.c.bf16 %v2800_v9, %v2796_v7  ;;  %v7728_v26 = vpack.c.bf16 %v2802_v10, %v2798_v8  ;;  %v6623_v0 = vld [vmem:[%s8415_s3 + $0xa8] sm:$0xff]  }
 0x2dd   : > { %v7730_v27 = vpack.c.bf16 %v2801_v15, %v2797_v13  ;;  %v7732_v28 = vpack.c.bf16 %v2803_v18, %v2799_v14  ;;  %v2433_v29 = vpop.f32.mrb[24].mxu0  ;;  %v2556_v30 = vpop.f32.mrb[32].mxu1  ;;  %5683 = vmatpush3.bf16.msra.mxu0 %v6605_v5  ;;  %5753 = vmatpush3.bf16.msra.mxu1 %v6618_v6  ;;  %v6617_v5 = vld [vmem:[%s8415_s3 + $0x70] sm:$0xff]  }
 0x2de   : > { %v2732_v34 = vadd.f32 %v7622_v20, %v2433_v29  ;;  %v2734_v36 = vadd.f32 %v7624_v21, %v2556_v30  ;;  %v2435_v41 = vpop.f32.mrb[25].mxu0  ;;  %v2558_v42 = vpop.f32.mrb[33].mxu1  ;;  %5684 = vmatprep.subr.bf16.mxu0 %v6606_v11  ;;  %5754 = vmatprep.subr.bf16.mxu1 %v6620_v12  ;;  %v6626_v6 = vld [vmem:[%s8415_s3 + $0xf0] sm:$0xff]  }
 0x2df   : > { %v2733_v46 = vadd.f32 %v7626_v22, %v2435_v41  ;;  %v2735_v47 = vadd.f32 %v7628_v23, %v2558_v42  ;;  %v2437_v48 = vpop.f32.mrb[26].mxu0  ;;  %v2560_v49 = vpop.f32.mrb[34].mxu1  ;;  %3375 = vmatprep.mubr.bf16.mxu0 %v7730_v27  ;;  %3480 = vmatprep.mubr.bf16.mxu1 %v7732_v28  ;;  %v6619_v29 = vld [vmem:[%s8415_s3 + $0x30] sm:$0xff]   ;;  %v6624_v41 = vld [vmem:[%s8415_s3 + $0x78] sm:$0xff]  }
 0x2e0   : > { %v2736_v51 = vadd.f32 %v7622_v20, %v2437_v48  ;;  %v2738_v52 = vadd.f32 %v7624_v21, %v2560_v49  ;;  %v2439_v58 = vpop.f32.mrb[27].mxu0  ;;  %v2562_v59 = vpop.f32.mrb[35].mxu1  ;;  %3376 = vmatmul.mubr.bf16.gmra.mrb[56].mxu0 %v7726_v25  ;;  %3481 = vmatmul.mubr.bf16.gmra.mrb[64].mxu1 %v7728_v26  ;;  %v2804_v1 = vmax.f32 %v2732_v34, 0.0  ;;  %v2806_v3 = vmax.f32 %v2734_v36, 0.0  ;;  %v6627_v30 = vld [vmem:[%s8415_s3 + $0xb0] sm:$0xff]   ;;  %v6628_v42 = vld [vmem:[%s8415_s3 + $0xf8] sm:$0xff]  }
 0x2e1   : > { %v2737_v60 = vadd.f32 %v7626_v22, %v2439_v58  ;;  %v2739_v61 = vadd.f32 %v7628_v23, %v2562_v59  ;;  %5685 = vmatpush3.bf16.msra.mxu0 %v6607_v31  ;;  %5755 = vmatpush3.bf16.msra.mxu1 %v6621_v32  ;;  %v2805_v7 = vmax.f32 %v2733_v46, 0.0  ;;  %v2807_v8 = vmax.f32 %v2735_v47, 0.0 }
 0x2e2   : > { %v2808_v62 = vmax.f32 %v2736_v51, 0.0  ;;  %v2810_v4 = vmax.f32 %v2738_v52, 0.0  ;;  %5686 = vmatprep.subr.bf16.mxu0 %v6610_v44  ;;  %5756 = vmatprep.subr.bf16.mxu1 %v6622_v45 }
 0x2e3   : > { %v2809_v9 = vmax.f32 %v2737_v60, 0.0  ;;  %v2811_v10 = vmax.f32 %v2739_v61, 0.0  ;;  %v6625_v60 = vld [vmem:[%s8415_s3 + $0x38] sm:$0xff]  }
 0x2e4   : > { %v7770_v11 = vpack.c.bf16 %v2808_v62, %v2804_v1  ;;  %v7772_v12 = vpack.c.bf16 %v2810_v4, %v2806_v3  ;;  %v6629_v61 = vld [vmem:[%s8415_s3 + $0xb8] sm:$0xff]   ;;  %v6630_v62 = vld [vmem:[%s8415_s3 + $0x240] sm:$0xff]  }
 0x2e5   : > { %v7774_v13 = vpack.c.bf16 %v2809_v9, %v2805_v7  ;;  %v7776_v14 = vpack.c.bf16 %v2811_v10, %v2807_v8  ;;  %v2443_v15 = vpop.f32.mrb[28].mxu0  ;;  %v2566_v18 = vpop.f32.mrb[36].mxu1  ;;  %5687 = vmatpush3.bf16.msra.mxu0 %v6612_v63  ;;  %5757 = vmatpush3.bf16.msra.mxu1 %v6623_v0  ;;  %v6640_v4 = vld [vmem:[%s8415_s3 + $0x2c0] sm:$0xff]  }
 0x2e6   : > { %v2740_v31 = vadd.f32 %v7622_v20, %v2443_v15  ;;  %v2742_v32 = vadd.f32 %v7624_v21, %v2566_v18  ;;  %v2445_v34 = vpop.f32.mrb[29].mxu0  ;;  %v2568_v36 = vpop.f32.mrb[37].mxu1  ;;  %5688 = vmatprep.subr.bf16.mxu0 %v6617_v5  ;;  %5758 = vmatprep.subr.bf16.mxu1 %v6626_v6 }
 0x2e7   : > { %v2741_v44 = vadd.f32 %v7626_v22, %v2445_v34  ;;  %v2743_v45 = vadd.f32 %v7628_v23, %v2568_v36  ;;  %v2447_v46 = vpop.f32.mrb[30].mxu0  ;;  %v2570_v47 = vpop.f32.mrb[38].mxu1  ;;  %3383 = vmatprep.mubr.bf16.mxu0 %v7774_v13  ;;  %3488 = vmatprep.mubr.bf16.mxu1 %v7776_v14 }
 0x2e8   : > { %v2744_v48 = vadd.f32 %v7622_v20, %v2447_v46  ;;  %v2746_v49 = vadd.f32 %v7624_v21, %v2570_v47  ;;  %v2449_v51 = vpop.f32.mrb[31].mxu0  ;;  %v2572_v52 = vpop.f32.mrb[39].mxu1  ;;  %3384 = vmatmul.mubr.bf16.gmra.mrb[60].mxu0 %v7770_v11  ;;  %3489 = vmatmul.mubr.bf16.gmra.mrb[68].mxu1 %v7772_v12  ;;  %v2812_v63 = vmax.f32 %v2740_v31, 0.0  ;;  %v2814_v0 = vmax.f32 %v2742_v32, 0.0 }
 0x2e9   : > { %v2745_v58 = vadd.f32 %v7626_v22, %v2449_v51  ;;  %v2747_v59 = vadd.f32 %v7628_v23, %v2572_v52  ;;  %5689 = vmatpush3.bf16.msra.mxu0 %v6619_v29  ;;  %5759 = vmatpush3.bf16.msra.mxu1 %v6627_v30  ;;  %v2813_v5 = vmax.f32 %v2741_v44, 0.0  ;;  %v2815_v6 = vmax.f32 %v2743_v45, 0.0 }
 0x2ea   : > { %v2816_v1 = vmax.f32 %v2744_v48, 0.0  ;;  %v2818_v3 = vmax.f32 %v2746_v49, 0.0  ;;  %5690 = vmatprep.subr.bf16.mxu0 %v6624_v41  ;;  %5760 = vmatprep.subr.bf16.mxu1 %v6628_v42 }
 0x2eb   : > { %v2817_v7 = vmax.f32 %v2745_v58, 0.0  ;;  %v2819_v8 = vmax.f32 %v2747_v59, 0.0 }
 0x2ec   : > { %v7814_v9 = vpack.c.bf16 %v2816_v1, %v2812_v63  ;;  %v7816_v10 = vpack.c.bf16 %v2818_v3, %v2814_v0 }
 0x2ed   : > { %v7818_v15 = vpack.c.bf16 %v2817_v7, %v2813_v5  ;;  %v7820_v18 = vpack.c.bf16 %v2819_v8, %v2815_v6  ;;  %v2453_v29 = vpop.f32.mrb[32].mxu0  ;;  %v2576_v30 = vpop.f32.mrb[40].mxu1  ;;  %5691 = vmatpush3.bf16.msra.mxu0 %v6625_v60  ;;  %5761 = vmatpush3.bf16.msra.mxu1 %v6629_v61 }
 0x2ee   : > { %v2748_v31 = vadd.f32 %v7622_v20, %v2453_v29  ;;  %v2750_v32 = vadd.f32 %v7624_v21, %v2576_v30  ;;  %v2455_v34 = vpop.f32.mrb[33].mxu0  ;;  %v2578_v36 = vpop.f32.mrb[41].mxu1  ;;  %5816 = vmatprep.subr.bf16.mxu0 %v6630_v62  ;;  %5886 = vmatprep.subr.bf16.mxu1 %v6640_v4 }
 0x2ef   : > { %v2749_v41 = vadd.f32 %v7626_v22, %v2455_v34  ;;  %v2751_v42 = vadd.f32 %v7628_v23, %v2578_v36  ;;  %v2457_v44 = vpop.f32.mrb[34].mxu0  ;;  %v2580_v45 = vpop.f32.mrb[42].mxu1  ;;  %3391 = vmatprep.mubr.bf16.mxu0 %v7818_v15  ;;  %3496 = vmatprep.mubr.bf16.mxu1 %v7820_v18 }
 0x2f0   : > { %v2752_v46 = vadd.f32 %v7622_v20, %v2457_v44  ;;  %v2754_v47 = vadd.f32 %v7624_v21, %v2580_v45  ;;  %v2459_v48 = vpop.f32.mrb[35].mxu0  ;;  %v2582_v49 = vpop.f32.mrb[43].mxu1  ;;  %3392 = vmatmul.mubr.bf16.gmra.mrb[64].mxu0 %v7814_v9  ;;  %3497 = vmatmul.mubr.bf16.gmra.mrb[72].mxu1 %v7816_v10  ;;  %v2820_v58 = vmax.f32 %v2748_v31, 0.0  ;;  %v2822_v59 = vmax.f32 %v2750_v32, 0.0 }
 0x2f1   : > { %v2753_v51 = vadd.f32 %v7626_v22, %v2459_v48  ;;  %v2755_v52 = vadd.f32 %v7628_v23, %v2582_v49  ;;  %v2821_v63 = vmax.f32 %v2749_v41, 0.0  ;;  %v2823_v0 = vmax.f32 %v2751_v42, 0.0 }
 0x2f2   : > { %v2824_v60 = vmax.f32 %v2752_v46, 0.0  ;;  %v2826_v61 = vmax.f32 %v2754_v47, 0.0 }
 0x2f3   : > { %v2825_v1 = vmax.f32 %v2753_v51, 0.0  ;;  %v2827_v3 = vmax.f32 %v2755_v52, 0.0 }
 0x2f4   : > { %v7834_v62 = vpack.c.bf16 %v2824_v60, %v2820_v58  ;;  %v7836_v4 = vpack.c.bf16 %v2826_v61, %v2822_v59 }
 0x2f5   : > { %v7838_v5 = vpack.c.bf16 %v2825_v1, %v2821_v63  ;;  %v7840_v6 = vpack.c.bf16 %v2827_v3, %v2823_v0  ;;  %v2463_v7 = vpop.f32.mrb[36].mxu0  ;;  %v2586_v8 = vpop.f32.mrb[44].mxu1 }
 0x2f6   : > { %v2756_v29 = vadd.f32 %v7622_v20, %v2463_v7  ;;  %v2758_v30 = vadd.f32 %v7624_v21, %v2586_v8  ;;  %v2465_v31 = vpop.f32.mrb[37].mxu0  ;;  %v2588_v32 = vpop.f32.mrb[45].mxu1 }
 0x2f7   : > { %v2757_v34 = vadd.f32 %v7626_v22, %v2465_v31  ;;  %v2759_v36 = vadd.f32 %v7628_v23, %v2588_v32  ;;  %v2467_v41 = vpop.f32.mrb[38].mxu0  ;;  %v2590_v42 = vpop.f32.mrb[46].mxu1  ;;  %3399 = vmatprep.mubr.bf16.mxu0 %v7838_v5  ;;  %3504 = vmatprep.mubr.bf16.mxu1 %v7840_v6 }
 0x2f8   : > { %v2760_v44 = vadd.f32 %v7622_v20, %v2467_v41  ;;  %v2762_v45 = vadd.f32 %v7624_v21, %v2590_v42  ;;  %v2469_v46 = vpop.f32.mrb[39].mxu0  ;;  %v2592_v47 = vpop.f32.mrb[47].mxu1  ;;  %3400 = vmatmul.mubr.bf16.gmra.mrb[68].mxu0 %v7834_v62  ;;  %3505 = vmatmul.mubr.bf16.gmra.mrb[76].mxu1 %v7836_v4  ;;  %v2828_v51 = vmax.f32 %v2756_v29, 0.0  ;;  %v2830_v52 = vmax.f32 %v2758_v30, 0.0 }
 0x2f9   : > { %v2761_v48 = vadd.f32 %v7626_v22, %v2469_v46  ;;  %v2763_v49 = vadd.f32 %v7628_v23, %v2592_v47  ;;  %v2829_v60 = vmax.f32 %v2757_v34, 0.0  ;;  %v2831_v61 = vmax.f32 %v2759_v36, 0.0 }
 0x2fa   : > { %v2832_v58 = vmax.f32 %v2760_v44, 0.0  ;;  %v2834_v59 = vmax.f32 %v2762_v45, 0.0 }
 0x2fb   : > { %v2833_v63 = vmax.f32 %v2761_v48, 0.0  ;;  %v2835_v0 = vmax.f32 %v2763_v49, 0.0 }
 0x2fc   : > { %v7854_v1 = vpack.c.bf16 %v2832_v58, %v2828_v51  ;;  %v7856_v3 = vpack.c.bf16 %v2834_v59, %v2830_v52 }
 0x2fd   : > { %v7858_v7 = vpack.c.bf16 %v2833_v63, %v2829_v60  ;;  %v7860_v8 = vpack.c.bf16 %v2835_v0, %v2831_v61  ;;  %v2473_v31 = vpop.f32.mrb[40].mxu0  ;;  %v2596_v32 = vpop.f32.mrb[48].mxu1 }
 0x2fe   : > { %v2764_v41 = vadd.f32 %v7622_v20, %v2473_v31  ;;  %v2766_v29 = vadd.f32 %v7624_v21, %v2596_v32  ;;  %v2475_v30 = vpop.f32.mrb[41].mxu0  ;;  %v2598_v42 = vpop.f32.mrb[49].mxu1 }
 0x2ff   : > { %v2765_v34 = vadd.f32 %v7626_v22, %v2475_v30  ;;  %v2767_v36 = vadd.f32 %v7628_v23, %v2598_v42  ;;  %v2477_v44 = vpop.f32.mrb[42].mxu0  ;;  %v2600_v45 = vpop.f32.mrb[50].mxu1  ;;  %3407 = vmatprep.mubr.bf16.mxu0 %v7858_v7  ;;  %3512 = vmatprep.mubr.bf16.mxu1 %v7860_v8 }
 0x300   : > { %v2768_v46 = vadd.f32 %v7622_v20, %v2477_v44  ;;  %v2770_v47 = vadd.f32 %v7624_v21, %v2600_v45  ;;  %v2479_v48 = vpop.f32.mrb[43].mxu0  ;;  %v2602_v49 = vpop.f32.mrb[51].mxu1  ;;  %3408 = vmatmul.mubr.bf16.gmra.mrb[72].mxu0 %v7854_v1  ;;  %3513 = vmatmul.mubr.bf16.gmra.mrb[80].mxu1 %v7856_v3  ;;  %v2836_v58 = vmax.f32 %v2764_v41, 0.0  ;;  %v2838_v59 = vmax.f32 %v2766_v29, 0.0 }
 0x301   : > { %v2769_v51 = vadd.f32 %v7626_v22, %v2479_v48  ;;  %v2771_v52 = vadd.f32 %v7628_v23, %v2602_v49  ;;  %v2837_v63 = vmax.f32 %v2765_v34, 0.0  ;;  %v2839_v0 = vmax.f32 %v2767_v36, 0.0 }
 0x302   : > { %v2840_v60 = vmax.f32 %v2768_v46, 0.0  ;;  %v2842_v61 = vmax.f32 %v2770_v47, 0.0 }
 0x303   : > { %v2841_v31 = vmax.f32 %v2769_v51, 0.0  ;;  %v2843_v32 = vmax.f32 %v2771_v52, 0.0 }
 0x304   : > { %v7874_v30 = vpack.c.bf16 %v2840_v60, %v2836_v58  ;;  %v7876_v42 = vpack.c.bf16 %v2842_v61, %v2838_v59 }
 0x305   : > { %v7878_v44 = vpack.c.bf16 %v2841_v31, %v2837_v63  ;;  %v7880_v45 = vpack.c.bf16 %v2843_v32, %v2839_v0  ;;  %v2483_v19 = vpop.f32.mrb[44].mxu0  ;;  %v2606_v48 = vpop.f32.mrb[52].mxu1 }
 0x306   : > { %v2772_v49 = vadd.f32 %v7622_v20, %v2483_v19  ;;  %v2774_v41 = vadd.f32 %v7624_v21, %v2606_v48  ;;  %v2485_v29 = vpop.f32.mrb[45].mxu0  ;;  %v2608_v46 = vpop.f32.mrb[53].mxu1 }
 0x307   : > { %v2773_v34 = vadd.f32 %v7626_v22, %v2485_v29  ;;  %v2775_v36 = vadd.f32 %v7628_v23, %v2608_v46  ;;  %v2487_v47 = vpop.f32.mrb[46].mxu0  ;;  %v2610_v51 = vpop.f32.mrb[54].mxu1  ;;  %3415 = vmatprep.mubr.bf16.mxu0 %v7878_v44  ;;  %3520 = vmatprep.mubr.bf16.mxu1 %v7880_v45 }
 0x308   : > { %v2776_v52 = vadd.f32 %v7622_v20, %v2487_v47  ;;  %v2778_v58 = vadd.f32 %v7624_v21, %v2610_v51  ;;  %v2489_v59 = vpop.f32.mrb[47].mxu0  ;;  %v2612_v19 = vpop.f32.mrb[55].mxu1  ;;  %3416 = vmatmul.mubr.bf16.gmra.mrb[76].mxu0 %v7874_v30  ;;  %3521 = vmatmul.mubr.bf16.gmra.mrb[84].mxu1 %v7876_v42  ;;  %v2844_v63 = vmax.f32 %v2772_v49, 0.0  ;;  %v2846_v0 = vmax.f32 %v2774_v41, 0.0  ;;  %v6632_v49 = vld [vmem:[%s8415_s3 + $0x248] sm:$0xff]   ;;  %v6641_v41 = vld [vmem:[%s8415_s3 + $0x280] sm:$0xff]  }
 0x309   : > { %v2777_v60 = vadd.f32 %v7626_v22, %v2489_v59  ;;  %v2779_v61 = vadd.f32 %v7628_v23, %v2612_v19  ;;  %v2845_v48 = vmax.f32 %v2773_v34, 0.0  ;;  %v2847_v29 = vmax.f32 %v2775_v36, 0.0  ;;  %v6631_v23 = vld [vmem:[%s8415_s3 + $0x200] sm:$0xff]   ;;  %v6643_v34 = vld [vmem:[%s8415_s3 + $0x2c8] sm:$0xff]   ;;  %v6636_v59 = vld [vmem:[%s8415_s3 + $0x258] sm:$0xff]  }
 0x30a   : > { %v2848_v31 = vmax.f32 %v2776_v52, 0.0  ;;  %v2850_v32 = vmax.f32 %v2778_v58, 0.0  ;;  %v8424_v22 = vmov 0   ;;  %v6633_v36 = vld [vmem:[%s8415_s3 + $0x208] sm:$0xff]   ;;  %v6634_v52 = vld [vmem:[%s8415_s3 + $0x250] sm:$0xff]  }
 0x30b   : > { %v2849_v46 = vmax.f32 %v2777_v60, 0.0  ;;  %v2851_v20 = vmax.f32 %v2779_v61, 0.0  ;;  %v6645_v58 = vld [vmem:[%s8415_s3 + $0x288] sm:$0xff]   ;;  %v6647_v19 = vld [vmem:[%s8415_s3 + $0x290] sm:$0xff]   ;;  %v6648_v60 = vld [vmem:[%s8415_s3 + $0x2d8] sm:$0xff]  }
 0x30c   : > { %v7894_v47 = vpack.c.bf16 %v2848_v31, %v2844_v63  ;;  %v7896_v21 = vpack.c.bf16 %v2850_v32, %v2846_v0  ;;  %v6637_v61 = vld [vmem:[%s8415_s3 + $0x218] sm:$0xff]   ;;  %v6639_v63 = vld [vmem:[%s8415_s3 + $0x220] sm:$0xff]   ;;  %v6642_v31 = vld [vmem:[%s8415_s3 + $0x268] sm:$0xff]  }
 0x30d   : > { %v7898_v51 = vpack.c.bf16 %v2849_v46, %v2845_v48  ;;  %v7900_v17 = vpack.c.bf16 %v2851_v20, %v2847_v29  ;;  %v6652_v0 = vld [vmem:[%s8415_s3 + $0x2e0] sm:$0xff]   ;;  %v6654_v48 = vld [vmem:[%s8415_s3 + $0x2e8] sm:$0xff]   ;;  %v6649_v46 = vld [vmem:[%s8415_s3 + $0x270] sm:$0xff]  }
 0x30e   : > { %v6653_v32 = vld [vmem:[%s8415_s3 + $0x2a0] sm:$0xff]   ;;  %v6644_v29 = vld [vmem:[%s8415_s3 + $0x228] sm:$0xff]  }
 0x30f   : > { %3423 = vmatprep.mubr.bf16.mxu0 %v7898_v51  ;;  %3528 = vmatprep.mubr.bf16.mxu1 %v7900_v17  ;;  %v6655_v20 = vld [vmem:[%s8415_s3 + $0x2a8] sm:$0xff]  }
 0x310   : > { %3424 = vmatmul.mubr.bf16.gmra.mrb[80].mxu0 %v7894_v47  ;;  %3529 = vmatmul.mubr.bf16.gmra.mrb[88].mxu1 %v7896_v21 }
 0x311   : > { %3761 = vmatprep.mubr.bf16.mxu0 %v8424_v22  ;;  %3866 = vmatprep.mubr.bf16.mxu1 %v8424_v22 }
 0x318   : > { %3762 = vmatmul.mubr.bf16.vlgmr.msra.gmra.mrb[84].mxu0 %v8424_v22  ;;  %3867 = vmatmul.mubr.bf16.vlgmr.msra.gmra.mrb[92].mxu1 %v8424_v22 }
 0x319   : > { %5817 = vmatpush3.bf16.msra.mxu0 %v6631_v23  ;;  %3769 = vmatprep.mubr.bf16.mxu0 %v7642_v55  ;;  %v6635_v55 = vld [vmem:[%s8415_s3 + $0x210] sm:$0xff]  }
 0x31a   : > { %3874 = vmatprep.mubr.bf16.mxu1 %v7644_v56  ;;  %5818 = vmatprep.subr.bf16.mxu0 %v6632_v49  ;;  %v6646_v56 = vld [vmem:[%s8415_s3 + $0x2d0] sm:$0xff]  }
 0x31b   : > { %5887 = vmatpush3.bf16.msra.mxu1 %v6641_v41  ;;  %v6651_v23 = vld [vmem:[%s8415_s3 + $0x230] sm:$0xff]   ;;  %v6656_v41 = vld [vmem:[%s8415_s3 + $0x278] sm:$0xff]  }
 0x31c   : > { %5888 = vmatprep.subr.bf16.mxu1 %v6643_v34  ;;  %v6658_v49 = vld [vmem:[%s8415_s3 + $0x2f0] sm:$0xff]  }
 0x31d   : > { %5819 = vmatpush3.bf16.msra.mxu0 %v6633_v36  ;;  %v6659_v34 = vld [vmem:[%s8415_s3 + $0x2b0] sm:$0xff]   ;;  %v6660_v36 = vld [vmem:[%s8415_s3 + $0x2f8] sm:$0xff]  }
 0x31e   : > { %5820 = vmatprep.subr.bf16.mxu0 %v6634_v52  ;;  %v6657_v52 = vld [vmem:[%s8415_s3 + $0x238] sm:$0xff]  }
 0x31f   : > { %5889 = vmatpush3.bf16.msra.mxu1 %v6645_v58  ;;  %v6661_v58 = vld [vmem:[%s8415_s3 + $0x2b8] sm:$0xff]  }
 0x320   : > { %3770 = vmatmul.mubr.bf16.gmra.mrb[88].mxu0 %v7638_v53  ;;  %3875 = vmatmul.mubr.bf16.gmra.mrb[96].mxu1 %v7640_v54  ;;  %v6638_v53 = vld [vmem:[%s8415_s3 + $0x260] sm:$0xff]   ;;  %v6650_v54 = vld [vmem:[%s8415_s3 + $0x298] sm:$0xff]  }
 0x321   : > { %3777 = vmatprep.mubr.bf16.mxu0 %v7686_v39  ;;  %3882 = vmatprep.mubr.bf16.mxu1 %v7688_v40 }
 0x322   : > { %5821 = vmatpush3.bf16.msra.mxu0 %v6635_v55  ;;  %5890 = vmatprep.subr.bf16.mxu1 %v6646_v56  ;;  %v8425_v55 = vmov 0.0   ;;  %v6662_v56 = vld [vmem:[%s8416_s4] sm:$0xff]  }
 0x323   : > { %5822 = vmatprep.subr.bf16.mxu0 %v6636_v59  ;;  %5891 = vmatpush3.bf16.msra.mxu1 %v6647_v19  ;;  %v6663_v59 = vld [vmem:[%s8416_s4 + $0x8] sm:$0xff]  }
 0x324   : > { %5892 = vmatprep.subr.bf16.mxu1 %v6648_v60 }
 0x326   : > { %5823 = vmatpush3.bf16.msra.mxu0 %v6637_v61 }
 0x327   : > { %5824 = vmatprep.subr.bf16.mxu0 %v6638_v53  ;;  %5893 = vmatpush3.bf16.msra.mxu1 %v6650_v54 }
 0x328   : > { %3778 = vmatmul.mubr.bf16.gmra.mrb[92].mxu0 %v7682_v37  ;;  %3883 = vmatmul.mubr.bf16.gmra.mrb[100].mxu1 %v7684_v38 }
 0x329   : > { %3785 = vmatprep.mubr.bf16.mxu0 %v7730_v27  ;;  %3890 = vmatprep.mubr.bf16.mxu1 %v7732_v28 }
 0x32a   : > { %5825 = vmatpush3.bf16.msra.mxu0 %v6639_v63  ;;  %5894 = vmatprep.subr.bf16.mxu1 %v6652_v0 }
 0x32b   : > { %5826 = vmatprep.subr.bf16.mxu0 %v6642_v31  ;;  %5895 = vmatpush3.bf16.msra.mxu1 %v6653_v32 }
 0x32c   : > { %5896 = vmatprep.subr.bf16.mxu1 %v6654_v48 }
 0x32e   : > { %5827 = vmatpush3.bf16.msra.mxu0 %v6644_v29 }
 0x32f   : > { %5828 = vmatprep.subr.bf16.mxu0 %v6649_v46  ;;  %5897 = vmatpush3.bf16.msra.mxu1 %v6655_v20 }
 0x330   : > { %3786 = vmatmul.mubr.bf16.gmra.mrb[96].mxu0 %v7726_v25  ;;  %3891 = vmatmul.mubr.bf16.gmra.mrb[104].mxu1 %v7728_v26 }
 0x331   : > { %3793 = vmatprep.mubr.bf16.mxu0 %v7774_v13  ;;  %3898 = vmatprep.mubr.bf16.mxu1 %v7776_v14 }
 0x332   : > { %5829 = vmatpush3.bf16.msra.mxu0 %v6651_v23  ;;  %5898 = vmatprep.subr.bf16.mxu1 %v6658_v49 }
 0x333   : > { %5830 = vmatprep.subr.bf16.mxu0 %v6656_v41  ;;  %5899 = vmatpush3.bf16.msra.mxu1 %v6659_v34 }
 0x334   : > { %5900 = vmatprep.subr.bf16.mxu1 %v6660_v36 }
 0x336   : > { %5831 = vmatpush3.bf16.msra.mxu0 %v6657_v52 }
 0x337   : > { %5901 = vmatpush3.bf16.msra.mxu1 %v6661_v58  ;;  %6133 = vmatprep.subr.bf16.mxu0 %v8425_v55 }
 0x338   : > { %3794 = vmatmul.mubr.bf16.gmra.mrb[100].mxu0 %v7770_v11  ;;  %3899 = vmatmul.mubr.bf16.gmra.mrb[108].mxu1 %v7772_v12 }
 0x339   : > { %3801 = vmatprep.mubr.bf16.mxu0 %v7818_v15  ;;  %3906 = vmatprep.mubr.bf16.mxu1 %v7820_v18 }
 0x340   : > { %3802 = vmatmul.mubr.bf16.gmra.mrb[104].mxu0 %v7814_v9  ;;  %3907 = vmatmul.mubr.bf16.gmra.mrb[112].mxu1 %v7816_v10 }
 0x341   : > { %3809 = vmatprep.mubr.bf16.mxu0 %v7838_v5  ;;  %3914 = vmatprep.mubr.bf16.mxu1 %v7840_v6 }
 0x348   : > { %3810 = vmatmul.mubr.bf16.gmra.mrb[108].mxu0 %v7834_v62  ;;  %3915 = vmatmul.mubr.bf16.gmra.mrb[116].mxu1 %v7836_v4 }
 0x349   : > { %3817 = vmatprep.mubr.bf16.mxu0 %v7858_v7  ;;  %3922 = vmatprep.mubr.bf16.mxu1 %v7860_v8 }
 0x350   : > { %3818 = vmatmul.mubr.bf16.gmra.mrb[112].mxu0 %v7854_v1  ;;  %3923 = vmatmul.mubr.bf16.gmra.mrb[120].mxu1 %v7856_v3 }
 0x351   : > { %3825 = vmatprep.mubr.bf16.mxu0 %v7878_v44  ;;  %3930 = vmatprep.mubr.bf16.mxu1 %v7880_v45 }
 0x358   : > { %3826 = vmatmul.mubr.bf16.gmra.mrb[116].mxu0 %v7874_v30  ;;  %3931 = vmatmul.mubr.bf16.gmra.mrb[124].mxu1 %v7876_v42 }
 0x359   : > { %4265 = vmatprep.mubr.bf16.mxu0 %v7686_v39  ;;  %4370 = vmatprep.mubr.bf16.mxu1 %v7688_v40  ;;  %v6666_v39 = vld [vmem:[%s8416_s4 + $0x20] sm:$0xff]   ;;  %v6667_v40 = vld [vmem:[%s8416_s4 + $0x28] sm:$0xff]  }
 0x360   : > { %4266 = vmatmul.mubr.bf16.vlgmr.msra.gmra.mrb[120].mxu0 %v7682_v37  ;;  %4371 = vmatmul.mubr.bf16.vlgmr.msra.gmra.mrb[128].mxu1 %v7684_v38  ;;  %v6664_v37 = vld [vmem:[%s8416_s4 + $0x10] sm:$0xff]   ;;  %v6665_v38 = vld [vmem:[%s8416_s4 + $0x18] sm:$0xff]  }
 0x361   : > { %6134 = vmatpush3.bf16.msra.mxu0 %v6662_v56  ;;  %4273 = vmatprep.mubr.bf16.mxu0 %v7730_v27 }
 0x362   : > { %4378 = vmatprep.mubr.bf16.mxu1 %v7732_v28  ;;  %6135 = vmatprep.subr.bf16.mxu0 %v8425_v55 }
 0x365   : > { %6136 = vmatpush3.bf16.msra.mxu0 %v6663_v59 }
 0x366   : > { %6137 = vmatprep.subr.bf16.mxu0 %v8425_v55 }
 0x368   : > { %4274 = vmatmul.mubr.bf16.gmra.mrb[124].mxu0 %v7726_v25  ;;  %4379 = vmatmul.mubr.bf16.gmra.mrb[132].mxu1 %v7728_v26  ;;  %v6668_v25 = vld [vmem:[%s8416_s4 + $0x30] sm:$0xff]   ;;  %v6669_v26 = vld [vmem:[%s8416_s4 + $0x38] sm:$0xff]  }
 0x369   : > { %4281 = vmatprep.mubr.bf16.mxu0 %v7774_v13  ;;  %4386 = vmatprep.mubr.bf16.mxu1 %v7776_v14 }
 0x36a   : > { %6138 = vmatpush3.bf16.msra.mxu0 %v6664_v37 }
 0x36b   : > { %6139 = vmatprep.subr.bf16.mxu0 %v8425_v55 }
 0x36e   : > { %6140 = vmatpush3.bf16.msra.mxu0 %v6665_v38 }
 0x36f   : > { %6141 = vmatprep.subr.bf16.mxu0 %v8425_v55 }
 0x370   : > { %4282 = vmatmul.mubr.bf16.gmra.mrb[128].mxu0 %v7770_v11  ;;  %4387 = vmatmul.mubr.bf16.gmra.mrb[136].mxu1 %v7772_v12 }
 0x371   : > { %4289 = vmatprep.mubr.bf16.mxu0 %v7818_v15  ;;  %4394 = vmatprep.mubr.bf16.mxu1 %v7820_v18 }
 0x372   : > { %6142 = vmatpush3.bf16.msra.mxu0 %v6666_v39 }
 0x373   : > { %6143 = vmatprep.subr.bf16.mxu0 %v8425_v55 }
 0x376   : > { %6144 = vmatpush3.bf16.msra.mxu0 %v6667_v40 }
 0x377   : > { %6145 = vmatprep.subr.bf16.mxu0 %v8425_v55 }
 0x378   : > { %4290 = vmatmul.mubr.bf16.gmra.mrb[132].mxu0 %v7814_v9  ;;  %4395 = vmatmul.mubr.bf16.gmra.mrb[140].mxu1 %v7816_v10 }
 0x379   : > { %4297 = vmatprep.mubr.bf16.mxu0 %v7838_v5  ;;  %4402 = vmatprep.mubr.bf16.mxu1 %v7840_v6 }
 0x37a   : > { %6146 = vmatpush3.bf16.msra.mxu0 %v6668_v25 }
 0x37b   : > { %6147 = vmatprep.subr.bf16.mxu0 %v8425_v55 }
 0x37e   : > { %6148 = vmatpush3.bf16.msra.mxu0 %v6669_v26 }
 0x380   : > { %4298 = vmatmul.mubr.bf16.gmra.mrb[136].mxu0 %v7834_v62  ;;  %4403 = vmatmul.mubr.bf16.gmra.mrb[144].mxu1 %v7836_v4 }
 0x381   : > { %4305 = vmatprep.mubr.bf16.mxu0 %v7858_v7  ;;  %4410 = vmatprep.mubr.bf16.mxu1 %v7860_v8 }
 0x388   : > { %4306 = vmatmul.mubr.bf16.gmra.mrb[140].mxu0 %v7854_v1  ;;  %4411 = vmatmul.mubr.bf16.gmra.mrb[148].mxu1 %v7856_v3 }
 0x389   : > { %4313 = vmatprep.mubr.bf16.mxu0 %v7878_v44  ;;  %4418 = vmatprep.mubr.bf16.mxu1 %v7880_v45 }
 0x390   : > { %4314 = vmatmul.mubr.bf16.gmra.mrb[144].mxu0 %v7874_v30  ;;  %4419 = vmatmul.mubr.bf16.gmra.mrb[152].mxu1 %v7876_v42 }
 0x391   : > { %4321 = vmatprep.mubr.bf16.mxu0 %v7898_v51  ;;  %4426 = vmatprep.mubr.bf16.mxu1 %v7900_v17 }
 0x398   : > { %4322 = vmatmul.mubr.bf16.gmra.mrb[148].mxu0 %v7894_v47  ;;  %4427 = vmatmul.mubr.bf16.gmra.mrb[156].mxu1 %v7896_v21 }
 0x399   : > { %4329 = vmatprep.mubr.bf16.mxu0 %v8424_v22  ;;  %4434 = vmatprep.mubr.bf16.mxu1 %v8424_v22 }
 0x3a0   : > { %4330 = vmatmul.mubr.bf16.gmra.mrb[152].mxu0 %v8424_v22  ;;  %4435 = vmatmul.mubr.bf16.gmra.mrb[160].mxu1 %v8424_v22 }
 0x3a1   : > { %6149 = vmatprep.mubr.msk.bf16.mxu0 %vm6697_vm0, %v8425_v55 }
 0x3a3   : > { %v5552_v27 = vpop.f32.mrb[48].mxu0  ;;  %v5622_v28 = vpop.f32.mrb[56].mxu1 }
 0x3a4   : > { %v5553_v11 = vpop.f32.mrb[49].mxu0  ;;  %v5623_v12 = vpop.f32.mrb[57].mxu1 }
 0x3a5   : > { %v5554_v17 = vadd.f32 %v5553_v11, %v5552_v27  ;;  %v5624_v13 = vadd.f32 %v5623_v12, %v5622_v28  ;;  %v5555_v14 = vpop.f32.mrb[50].mxu0  ;;  %v5625_v9 = vpop.f32.mrb[58].mxu1 }
 0x3a6   : > { %v5556_v10 = vpop.f32.mrb[51].mxu0  ;;  %v5626_v15 = vpop.f32.mrb[59].mxu1 }
 0x3a7   : > { %v8102_v18 = vadd.f32 %v5624_v13, %v5554_v17  ;;  %v5557_v62 = vadd.f32 %v5556_v10, %v5555_v14  ;;  %v5627_v4 = vadd.f32 %v5626_v15, %v5625_v9 }
 0x3a8   : > { %6150 = vmatmul.mubr.bf16.vlgmr.msra.gmra.mrb[156].mxu0 %v6941_v57 }
 0x3a9   : > { %v8105_v5 = vadd.f32 %v5627_v4, %v5557_v62  ;;  %6153 = vmatprep.mubr.msk.bf16.mxu0 %vm6697_vm0, %v8425_v55 }
 0x3ab   : > { %v5558_v6 = vpop.f32.mrb[52].mxu0  ;;  %v5628_v1 = vpop.f32.mrb[60].mxu1 }
 0x3ac   : > { %v5559_v3 = vpop.f32.mrb[53].mxu0  ;;  %v5629_v7 = vpop.f32.mrb[61].mxu1 }
 0x3ad   : > { %v5560_v8 = vadd.f32 %v5559_v3, %v5558_v6  ;;  %v5630_v30 = vadd.f32 %v5629_v7, %v5628_v1  ;;  %v5561_v42 = vpop.f32.mrb[54].mxu0  ;;  %v5631_v44 = vpop.f32.mrb[62].mxu1 }
 0x3ae   : > { %v5562_v45 = vpop.f32.mrb[55].mxu0  ;;  %v5632_v47 = vpop.f32.mrb[63].mxu1 }
 0x3af   : > { %v8109_v21 = vadd.f32 %v5630_v30, %v5560_v8  ;;  %v5563_v51 = vadd.f32 %v5562_v45, %v5561_v42  ;;  %v5633_v22 = vadd.f32 %v5632_v47, %v5631_v44 }
 0x3b0   : > { %6154 = vmatmul.mubr.bf16.gmra.mrb[160].mxu0 %v6863_v35 }
 0x3b1   : > { %v8112_v57 = vadd.f32 %v5633_v22, %v5563_v51  ;;  %6157 = vmatprep.mubr.msk.bf16.mxu0 %vm6697_vm0, %v8425_v55 }
 0x3b3   : > { %v5564_v19 = vpop.f32.mrb[56].mxu0  ;;  %v5634_v60 = vpop.f32.mrb[64].mxu1 }
 0x3b4   : > { %v5565_v61 = vpop.f32.mrb[57].mxu0  ;;  %v5635_v53 = vpop.f32.mrb[65].mxu1 }
 0x3b5   : > { %v5566_v54 = vadd.f32 %v5565_v61, %v5564_v19  ;;  %v5636_v63 = vadd.f32 %v5635_v53, %v5634_v60  ;;  %v5567_v0 = vpop.f32.mrb[58].mxu0  ;;  %v5637_v31 = vpop.f32.mrb[66].mxu1 }
 0x3b6   : > { %v5568_v32 = vpop.f32.mrb[59].mxu0  ;;  %v5638_v48 = vpop.f32.mrb[67].mxu1 }
 0x3b7   : > { %v8116_v29 = vadd.f32 %v5636_v63, %v5566_v54  ;;  %v5569_v46 = vadd.f32 %v5568_v32, %v5567_v0  ;;  %v5639_v20 = vadd.f32 %v5638_v48, %v5637_v31 }
 0x3b8   : > { %6158 = vmatmul.mubr.bf16.gmra.mrb[164].mxu0 %v6891_v43 }
 0x3b9   : > { %v8119_v35 = vadd.f32 %v5639_v20, %v5569_v46  ;;  %6161 = vmatprep.mubr.msk.bf16.mxu0 %vm6697_vm0, %v8425_v55 }
 0x3bb   : > { %v5570_v23 = vpop.f32.mrb[60].mxu0  ;;  %v5640_v49 = vpop.f32.mrb[68].mxu1 }
 0x3bc   : > { %v5571_v41 = vpop.f32.mrb[61].mxu0  ;;  %v5641_v34 = vpop.f32.mrb[69].mxu1 }
 0x3bd   : > { %v5572_v36 = vadd.f32 %v5571_v41, %v5570_v23  ;;  %v5642_v52 = vadd.f32 %v5641_v34, %v5640_v49  ;;  %v5573_v58 = vpop.f32.mrb[62].mxu0  ;;  %v5643_v56 = vpop.f32.mrb[70].mxu1 }
 0x3be   : > { %v5574_v59 = vpop.f32.mrb[63].mxu0  ;;  %v5644_v37 = vpop.f32.mrb[71].mxu1 }
 0x3bf   : > { %v8123_v38 = vadd.f32 %v5642_v52, %v5572_v36  ;;  %v5575_v39 = vadd.f32 %v5574_v59, %v5573_v58  ;;  %v5645_v40 = vadd.f32 %v5644_v37, %v5643_v56 }
 0x3c0   : > { %6162 = vmatmul.mubr.bf16.gmra.mrb[168].mxu0 %v7022_v16 }
 0x3c1   : > { %v8126_v43 = vadd.f32 %v5645_v40, %v5575_v39  ;;  %6165 = vmatprep.mubr.msk.bf16.mxu0 %vm6697_vm0, %v8425_v55 }
 0x3c3   : > { %v5576_v25 = vpop.f32.mrb[64].mxu0  ;;  %v5646_v26 = vpop.f32.mrb[72].mxu1 }
 0x3c4   : > { %v5577_v27 = vpop.f32.mrb[65].mxu0  ;;  %v5647_v28 = vpop.f32.mrb[73].mxu1 }
 0x3c5   : > { %v5578_v11 = vadd.f32 %v5577_v27, %v5576_v25  ;;  %v5648_v12 = vadd.f32 %v5647_v28, %v5646_v26  ;;  %v5579_v17 = vpop.f32.mrb[66].mxu0  ;;  %v5649_v13 = vpop.f32.mrb[74].mxu1 }
 0x3c6   : > { %v5580_v14 = vpop.f32.mrb[67].mxu0  ;;  %v5650_v9 = vpop.f32.mrb[75].mxu1 }
 0x3c7   : > { %v8130_v10 = vadd.f32 %v5648_v12, %v5578_v11  ;;  %v5581_v15 = vadd.f32 %v5580_v14, %v5579_v17  ;;  %v5651_v62 = vadd.f32 %v5650_v9, %v5649_v13  ;;  %v6670_v17 = vld [vmem:[%s6855_s30 + $0x80] sm:$0xff]  ;;  %v6671_v13 = vld [vmem:[%s6855_s30 + $0x88] sm:$0xff] }
 0x3c8   : > { %6166 = vmatmul.mubr.bf16.gmra.mrb[172].mxu0 %v6972_v2  ;;  %v382_v14 = vpack.c.bf16 %v6671_v13, %v6670_v17 }
 0x3c9   : > { %v8133_v16 = vadd.f32 %v5651_v62, %v5581_v15  ;;  %6169 = vmatprep.mubr.msk.bf16.mxu0 %vm6697_vm0, %v8425_v55 }
 0x3cb   : > { %v5582_v4 = vpop.f32.mrb[68].mxu0  ;;  %v5652_v6 = vpop.f32.mrb[76].mxu1 }
 0x3cc   : > { %v5583_v1 = vpop.f32.mrb[69].mxu0  ;;  %v5653_v3 = vpop.f32.mrb[77].mxu1 }
 0x3cd   : > { %v5584_v7 = vadd.f32 %v5583_v1, %v5582_v4  ;;  %v5654_v8 = vadd.f32 %v5653_v3, %v5652_v6  ;;  %v5585_v30 = vpop.f32.mrb[70].mxu0  ;;  %v5655_v42 = vpop.f32.mrb[78].mxu1 }
 0x3ce   : > { %v5586_v44 = vpop.f32.mrb[71].mxu0  ;;  %v5656_v45 = vpop.f32.mrb[79].mxu1 }
 0x3cf   : > { %v8137_v47 = vadd.f32 %v5654_v8, %v5584_v7  ;;  %v5587_v51 = vadd.f32 %v5586_v44, %v5585_v30  ;;  %v5657_v22 = vadd.f32 %v5656_v45, %v5655_v42 }
 0x3d0   : > { %6170 = vmatmul.mubr.bf16.gmra.mrb[176].mxu0 %v7075_v33 }
 0x3d1   : > { %v8140_v2 = vadd.f32 %v5657_v22, %v5587_v51  ;;  %6173 = vmatprep.mubr.msk.bf16.mxu0 %vm6697_vm0, %v8425_v55 }
 0x3d3   : > { %v5588_v19 = vpop.f32.mrb[72].mxu0  ;;  %v5658_v60 = vpop.f32.mrb[80].mxu1 }
 0x3d4   : > { %v5589_v61 = vpop.f32.mrb[73].mxu0  ;;  %v5659_v53 = vpop.f32.mrb[81].mxu1 }
 0x3d5   : > { %v5590_v54 = vadd.f32 %v5589_v61, %v5588_v19  ;;  %v5660_v63 = vadd.f32 %v5659_v53, %v5658_v60  ;;  %v5591_v0 = vpop.f32.mrb[74].mxu0  ;;  %v5661_v31 = vpop.f32.mrb[82].mxu1 }
 0x3d6   : > { %v5592_v32 = vpop.f32.mrb[75].mxu0  ;;  %v5662_v48 = vpop.f32.mrb[83].mxu1 }
 0x3d7   : > { %v8144_v46 = vadd.f32 %v5660_v63, %v5590_v54  ;;  %v5593_v20 = vadd.f32 %v5592_v32, %v5591_v0  ;;  %v5663_v23 = vadd.f32 %v5662_v48, %v5661_v31 }
 0x3d8   : > { %6174 = vmatmul.mubr.bf16.gmra.mrb[180].mxu0 %v7047_v24 }
 0x3d9   : > { %v8147_v33 = vadd.f32 %v5663_v23, %v5593_v20  ;;  %6177 = vmatprep.mubr.msk.bf16.mxu0 %vm6697_vm0, %v8425_v55 }
 0x3db   : > { %v5594_v49 = vpop.f32.mrb[76].mxu0  ;;  %v5664_v41 = vpop.f32.mrb[84].mxu1 }
 0x3dc   : > { %v5595_v34 = vpop.f32.mrb[77].mxu0  ;;  %v5665_v36 = vpop.f32.mrb[85].mxu1 }
 0x3dd   : > { %v5596_v52 = vadd.f32 %v5595_v34, %v5594_v49  ;;  %v5666_v58 = vadd.f32 %v5665_v36, %v5664_v41  ;;  %v5597_v56 = vpop.f32.mrb[78].mxu0  ;;  %v5667_v59 = vpop.f32.mrb[86].mxu1 }
 0x3de   : > { %v5598_v37 = vpop.f32.mrb[79].mxu0  ;;  %v5668_v39 = vpop.f32.mrb[87].mxu1 }
 0x3df   : > { %v8151_v40 = vadd.f32 %v5666_v58, %v5596_v52  ;;  %v5599_v24 = vadd.f32 %v5598_v37, %v5597_v56  ;;  %v5669_v25 = vadd.f32 %v5668_v39, %v5667_v59 }
 0x3e0   : > { %6178 = vmatmul.mubr.bf16.gmra.mrb[184].mxu0 %v7126_v50 }
 0x3e1   : > { %v8154_v26 = vadd.f32 %v5669_v25, %v5599_v24  ;;  %6181 = vmatprep.mubr.msk.bf16.mxu0 %vm6697_vm0, %v8425_v55 }
 0x3e3   : > { %v5600_v27 = vpop.f32.mrb[80].mxu0  ;;  %v5670_v28 = vpop.f32.mrb[88].mxu1 }
 0x3e4   : > { %v5601_v11 = vpop.f32.mrb[81].mxu0  ;;  %v5671_v12 = vpop.f32.mrb[89].mxu1 }
 0x3e5   : > { %v5602_v9 = vadd.f32 %v5601_v11, %v5600_v27  ;;  %v5672_v15 = vadd.f32 %v5671_v12, %v5670_v28  ;;  %v5603_v62 = vpop.f32.mrb[82].mxu0  ;;  %v5673_v4 = vpop.f32.mrb[90].mxu1 }
 0x3e6   : > { %v5604_v6 = vpop.f32.mrb[83].mxu0  ;;  %v5674_v1 = vpop.f32.mrb[91].mxu1 }
 0x3e7   : > { %v8160_v3 = vadd.f32 %v5672_v15, %v5602_v9  ;;  %v5605_v50 = vadd.f32 %v5604_v6, %v5603_v62  ;;  %v5675_v7 = vadd.f32 %v5674_v1, %v5673_v4 }
 0x3e8   : > { %6182 = vmatmul.mubr.bf16.gmra.mrb[188].mxu0 %v382_v14 }
 0x3e9   : > { %v8162_v8 = vadd.f32 %v5675_v7, %v5605_v50 }
 0x3eb   : > { %v5692_v55 = vpop.f32.mrb[84].mxu0  ;;  %v5762_v30 = vpop.f32.mrb[92].mxu1 }
 0x3ec   : > { %v5693_v42 = vpop.f32.mrb[85].mxu0  ;;  %v5763_v44 = vpop.f32.mrb[93].mxu1 }
 0x3ed   : > { %v5694_v45 = vadd.f32 %v5693_v42, %v5692_v55  ;;  %v5695_v51 = vpop.f32.mrb[86].mxu0  ;;  %v5764_v22 = vadd.f32 %v5763_v44, %v5762_v30  ;;  %v5765_v19 = vpop.f32.mrb[94].mxu1 }
 0x3ee   : > { %v5696_v60 = vpop.f32.mrb[87].mxu0  ;;  %v5766_v61 = vpop.f32.mrb[95].mxu1 }
 0x3ef   : > { %v3764_v53 = vadd.f32 %v5694_v45, %v8102_v18  ;;  %v5697_v54 = vadd.f32 %v5696_v60, %v5695_v51  ;;  %v5767_v63 = vadd.f32 %v5766_v61, %v5765_v19 }
 0x3f1   : > { %v3767_v0 = vadd.f32 %v5697_v54, %v8105_v5  ;;  %v8166_v31 = vadd.f32 %v5764_v22, %v3764_v53 }
 0x3f3   : > { %v8168_v32 = vadd.f32 %v5767_v63, %v3767_v0  ;;  %v5698_v48 = vpop.f32.mrb[88].mxu0  ;;  %v5768_v20 = vpop.f32.mrb[96].mxu1 }
 0x3f4   : > { %v5699_v23 = vpop.f32.mrb[89].mxu0  ;;  %v5769_v49 = vpop.f32.mrb[97].mxu1 }
 0x3f5   : > { %v5700_v41 = vadd.f32 %v5699_v23, %v5698_v48  ;;  %v5770_v34 = vadd.f32 %v5769_v49, %v5768_v20  ;;  %v5701_v36 = vpop.f32.mrb[90].mxu0  ;;  %v5771_v52 = vpop.f32.mrb[98].mxu1 }
 0x3f6   : > { %v5702_v58 = vpop.f32.mrb[91].mxu0  ;;  %v5772_v56 = vpop.f32.mrb[99].mxu1 }
 0x3f7   : > { %v3772_v18 = vadd.f32 %v5700_v41, %v8109_v21  ;;  %v5703_v59 = vadd.f32 %v5702_v58, %v5701_v36  ;;  %v5773_v37 = vadd.f32 %v5772_v56, %v5771_v52 }
 0x3f9   : > { %v8171_v39 = vadd.f32 %v5770_v34, %v3772_v18  ;;  %v3775_v5 = vadd.f32 %v5703_v59, %v8112_v57 }
 0x3fb   : > { %v8174_v24 = vadd.f32 %v5773_v37, %v3775_v5  ;;  %v5704_v25 = vpop.f32.mrb[92].mxu0  ;;  %v5774_v27 = vpop.f32.mrb[100].mxu1 }
 0x3fc   : > { %v5705_v28 = vpop.f32.mrb[93].mxu0  ;;  %v5775_v11 = vpop.f32.mrb[101].mxu1 }
 0x3fd   : > { %v5706_v12 = vadd.f32 %v5705_v28, %v5704_v25  ;;  %v5776_v17 = vadd.f32 %v5775_v11, %v5774_v27  ;;  %v5707_v13 = vpop.f32.mrb[94].mxu0  ;;  %v5777_v14 = vpop.f32.mrb[102].mxu1 }
 0x3fe   : > { %v5708_v9 = vpop.f32.mrb[95].mxu0  ;;  %v5778_v15 = vpop.f32.mrb[103].mxu1 }
 0x3ff   : > { %v3780_v21 = vadd.f32 %v5706_v12, %v8116_v29  ;;  %v5709_v62 = vadd.f32 %v5708_v9, %v5707_v13  ;;  %v5779_v4 = vadd.f32 %v5778_v15, %v5777_v14 }
 0x401   : > { %v8177_v6 = vadd.f32 %v5776_v17, %v3780_v21  ;;  %v3783_v57 = vadd.f32 %v5709_v62, %v8119_v35 }
 0x403   : > { %v8180_v1 = vadd.f32 %v5779_v4, %v3783_v57  ;;  %v5710_v50 = vpop.f32.mrb[96].mxu0  ;;  %v5780_v7 = vpop.f32.mrb[104].mxu1 }
 0x404   : > { %v5711_v55 = vpop.f32.mrb[97].mxu0  ;;  %v5781_v30 = vpop.f32.mrb[105].mxu1 }
 0x405   : > { %v5712_v42 = vadd.f32 %v5711_v55, %v5710_v50  ;;  %v5782_v44 = vadd.f32 %v5781_v30, %v5780_v7  ;;  %v5713_v45 = vpop.f32.mrb[98].mxu0  ;;  %v5783_v51 = vpop.f32.mrb[106].mxu1 }
 0x406   : > { %v5714_v22 = vpop.f32.mrb[99].mxu0  ;;  %v5784_v19 = vpop.f32.mrb[107].mxu1 }
 0x407   : > { %v3788_v29 = vadd.f32 %v5712_v42, %v8123_v38  ;;  %v5715_v60 = vadd.f32 %v5714_v22, %v5713_v45  ;;  %v5785_v61 = vadd.f32 %v5784_v19, %v5783_v51 }
 0x409   : > { %v8183_v53 = vadd.f32 %v5782_v44, %v3788_v29  ;;  %v3791_v35 = vadd.f32 %v5715_v60, %v8126_v43 }
 0x40b   : > { %v8186_v54 = vadd.f32 %v5785_v61, %v3791_v35  ;;  %v5716_v63 = vpop.f32.mrb[100].mxu0  ;;  %v5786_v0 = vpop.f32.mrb[108].mxu1 }
 0x40c   : > { %v5717_v48 = vpop.f32.mrb[101].mxu0  ;;  %v5787_v20 = vpop.f32.mrb[109].mxu1 }
 0x40d   : > { %v5718_v23 = vadd.f32 %v5717_v48, %v5716_v63  ;;  %v5788_v49 = vadd.f32 %v5787_v20, %v5786_v0  ;;  %v5719_v41 = vpop.f32.mrb[102].mxu0  ;;  %v5789_v34 = vpop.f32.mrb[110].mxu1 }
 0x40e   : > { %v5720_v36 = vpop.f32.mrb[103].mxu0  ;;  %v5790_v52 = vpop.f32.mrb[111].mxu1 }
 0x40f   : > { %v3796_v38 = vadd.f32 %v5718_v23, %v8130_v10  ;;  %v5721_v58 = vadd.f32 %v5720_v36, %v5719_v41  ;;  %v5791_v56 = vadd.f32 %v5790_v52, %v5789_v34 }
 0x411   : > { %v8189_v18 = vadd.f32 %v5788_v49, %v3796_v38  ;;  %v3799_v43 = vadd.f32 %v5721_v58, %v8133_v16 }
 0x413   : > { %v8192_v59 = vadd.f32 %v5791_v56, %v3799_v43  ;;  %v5722_v37 = vpop.f32.mrb[104].mxu0  ;;  %v5792_v5 = vpop.f32.mrb[112].mxu1 }
 0x414   : > { %v5723_v25 = vpop.f32.mrb[105].mxu0  ;;  %v5793_v27 = vpop.f32.mrb[113].mxu1 }
 0x415   : > { %v5724_v28 = vadd.f32 %v5723_v25, %v5722_v37  ;;  %v5794_v11 = vadd.f32 %v5793_v27, %v5792_v5  ;;  %v5725_v12 = vpop.f32.mrb[106].mxu0  ;;  %v5795_v17 = vpop.f32.mrb[114].mxu1 }
 0x416   : > { %v5726_v13 = vpop.f32.mrb[107].mxu0  ;;  %v5796_v14 = vpop.f32.mrb[115].mxu1 }
 0x417   : > { %v3804_v10 = vadd.f32 %v5724_v28, %v8137_v47  ;;  %v5727_v9 = vadd.f32 %v5726_v13, %v5725_v12  ;;  %v5797_v15 = vadd.f32 %v5796_v14, %v5795_v17 }
 0x419   : > { %v8195_v21 = vadd.f32 %v5794_v11, %v3804_v10  ;;  %v3807_v16 = vadd.f32 %v5727_v9, %v8140_v2 }
 0x41b   : > { %v8198_v62 = vadd.f32 %v5797_v15, %v3807_v16  ;;  %v5728_v4 = vpop.f32.mrb[108].mxu0  ;;  %v5798_v57 = vpop.f32.mrb[116].mxu1 }
 0x41c   : > { %v5729_v50 = vpop.f32.mrb[109].mxu0  ;;  %v5799_v7 = vpop.f32.mrb[117].mxu1 }
 0x41d   : > { %v5730_v55 = vadd.f32 %v5729_v50, %v5728_v4  ;;  %v5800_v30 = vadd.f32 %v5799_v7, %v5798_v57  ;;  %v5731_v42 = vpop.f32.mrb[110].mxu0  ;;  %v5801_v44 = vpop.f32.mrb[118].mxu1 }
 0x41e   : > { %v5732_v45 = vpop.f32.mrb[111].mxu0  ;;  %v5802_v51 = vpop.f32.mrb[119].mxu1 }
 0x41f   : > { %v3812_v47 = vadd.f32 %v5730_v55, %v8144_v46  ;;  %v5733_v22 = vadd.f32 %v5732_v45, %v5731_v42  ;;  %v5803_v19 = vadd.f32 %v5802_v51, %v5801_v44 }
 0x421   : > { %v8201_v29 = vadd.f32 %v5800_v30, %v3812_v47  ;;  %v3815_v2 = vadd.f32 %v5733_v22, %v8147_v33 }
 0x423   : > { %v8204_v60 = vadd.f32 %v5803_v19, %v3815_v2  ;;  %v5734_v61 = vpop.f32.mrb[112].mxu0  ;;  %v5804_v35 = vpop.f32.mrb[120].mxu1 }
 0x424   : > { %v5735_v63 = vpop.f32.mrb[113].mxu0  ;;  %v5805_v0 = vpop.f32.mrb[121].mxu1 }
 0x425   : > { %v5736_v48 = vadd.f32 %v5735_v63, %v5734_v61  ;;  %v5806_v20 = vadd.f32 %v5805_v0, %v5804_v35  ;;  %v5737_v23 = vpop.f32.mrb[114].mxu0  ;;  %v5807_v49 = vpop.f32.mrb[122].mxu1 }
 0x426   : > { %v5738_v41 = vpop.f32.mrb[115].mxu0  ;;  %v5808_v34 = vpop.f32.mrb[123].mxu1 }
 0x427   : > { %v3820_v46 = vadd.f32 %v5736_v48, %v8151_v40  ;;  %v5739_v36 = vadd.f32 %v5738_v41, %v5737_v23  ;;  %v5809_v52 = vadd.f32 %v5808_v34, %v5807_v49 }
 0x429   : > { %v8207_v38 = vadd.f32 %v5806_v20, %v3820_v46  ;;  %v3823_v33 = vadd.f32 %v5739_v36, %v8154_v26 }
 0x42b   : > { %v8210_v58 = vadd.f32 %v5809_v52, %v3823_v33  ;;  %v5740_v56 = vpop.f32.mrb[116].mxu0  ;;  %v5810_v43 = vpop.f32.mrb[124].mxu1 }
 0x42c   : > { %v5741_v37 = vpop.f32.mrb[117].mxu0  ;;  %v5811_v5 = vpop.f32.mrb[125].mxu1 }
 0x42d   : > { %v5742_v25 = vadd.f32 %v5741_v37, %v5740_v56  ;;  %v5812_v27 = vadd.f32 %v5811_v5, %v5810_v43  ;;  %v5743_v28 = vpop.f32.mrb[118].mxu0  ;;  %v5813_v11 = vpop.f32.mrb[126].mxu1 }
 0x42e   : > { %v5744_v12 = vpop.f32.mrb[119].mxu0  ;;  %v5814_v17 = vpop.f32.mrb[127].mxu1 }
 0x42f   : > { %v3828_v40 = vadd.f32 %v5742_v25, %v8160_v3  ;;  %v5745_v13 = vadd.f32 %v5744_v12, %v5743_v28  ;;  %v5815_v14 = vadd.f32 %v5814_v17, %v5813_v11 }
 0x431   : > { %v8213_v10 = vadd.f32 %v5812_v27, %v3828_v40  ;;  %v3831_v26 = vadd.f32 %v5745_v13, %v8162_v8 }
 0x433   : > { %v8216_v9 = vadd.f32 %v5815_v14, %v3831_v26  ;;  %v5832_v15 = vpop.f32.mrb[120].mxu0  ;;  %v5902_v16 = vpop.f32.mrb[128].mxu1 }
 0x434   : > { %v5833_v4 = vpop.f32.mrb[121].mxu0  ;;  %v5903_v57 = vpop.f32.mrb[129].mxu1 }
 0x435   : > { %v5834_v50 = vadd.f32 %v5833_v4, %v5832_v15  ;;  %v5904_v7 = vadd.f32 %v5903_v57, %v5902_v16  ;;  %v5835_v55 = vpop.f32.mrb[122].mxu0  ;;  %v5905_v30 = vpop.f32.mrb[130].mxu1 }
 0x436   : > { %v5836_v42 = vpop.f32.mrb[123].mxu0  ;;  %v5906_v44 = vpop.f32.mrb[131].mxu1 }
 0x437   : > { %v4373_v45 = vadd.f32 %v5904_v7, %v5834_v50  ;;  %v5837_v3 = vadd.f32 %v5836_v42, %v5835_v55  ;;  %v5907_v51 = vadd.f32 %v5906_v44, %v5905_v30 }
 0x439   : > { %v8219_v47 = vadd.f32 %v4373_v45, %v8166_v31  ;;  %v4376_v22 = vadd.f32 %v5907_v51, %v5837_v3 }
 0x43b   : > { %v8222_v8 = vadd.f32 %v4376_v22, %v8168_v32  ;;  %v5838_v19 = vpop.f32.mrb[124].mxu0  ;;  %v5908_v2 = vpop.f32.mrb[132].mxu1 }
 0x43c   : > { %v5839_v61 = vpop.f32.mrb[125].mxu0  ;;  %v5909_v35 = vpop.f32.mrb[133].mxu1 }
 0x43d   : > { %v5840_v63 = vadd.f32 %v5839_v61, %v5838_v19  ;;  %v5910_v0 = vadd.f32 %v5909_v35, %v5908_v2  ;;  %v5841_v48 = vpop.f32.mrb[126].mxu0  ;;  %v5911_v20 = vpop.f32.mrb[134].mxu1 }
 0x43e   : > { %v5842_v23 = vpop.f32.mrb[127].mxu0  ;;  %v5912_v49 = vpop.f32.mrb[135].mxu1 }
 0x43f   : > { %v4381_v41 = vadd.f32 %v5910_v0, %v5840_v63  ;;  %v5843_v34 = vadd.f32 %v5842_v23, %v5841_v48  ;;  %v5913_v46 = vadd.f32 %v5912_v49, %v5911_v20 }
 0x441   : > { %v8225_v31 = vadd.f32 %v4381_v41, %v8171_v39  ;;  %v4384_v36 = vadd.f32 %v5913_v46, %v5843_v34 }
 0x443   : > { %v8228_v32 = vadd.f32 %v4384_v36, %v8174_v24  ;;  %v5844_v52 = vpop.f32.mrb[128].mxu0  ;;  %v5914_v33 = vpop.f32.mrb[136].mxu1 }
 0x444   : > { %v5845_v56 = vpop.f32.mrb[129].mxu0  ;;  %v5915_v43 = vpop.f32.mrb[137].mxu1 }
 0x445   : > { %v5846_v37 = vadd.f32 %v5845_v56, %v5844_v52  ;;  %v5916_v5 = vadd.f32 %v5915_v43, %v5914_v33  ;;  %v5847_v25 = vpop.f32.mrb[130].mxu0  ;;  %v5917_v27 = vpop.f32.mrb[138].mxu1 }
 0x446   : > { %v5848_v28 = vpop.f32.mrb[131].mxu0  ;;  %v5918_v11 = vpop.f32.mrb[139].mxu1 }
 0x447   : > { %v4389_v12 = vadd.f32 %v5916_v5, %v5846_v37  ;;  %v5849_v17 = vadd.f32 %v5848_v28, %v5847_v25  ;;  %v5919_v40 = vadd.f32 %v5918_v11, %v5917_v27 }
 0x449   : > { %v8231_v39 = vadd.f32 %v4389_v12, %v8177_v6  ;;  %v4392_v13 = vadd.f32 %v5919_v40, %v5849_v17 }
 0x44b   : > { %v8234_v24 = vadd.f32 %v4392_v13, %v8180_v1  ;;  %v5850_v14 = vpop.f32.mrb[132].mxu0  ;;  %v5920_v26 = vpop.f32.mrb[140].mxu1 }
 0x44c   : > { %v5851_v15 = vpop.f32.mrb[133].mxu0  ;;  %v5921_v16 = vpop.f32.mrb[141].mxu1 }
 0x44d   : > { %v5852_v4 = vadd.f32 %v5851_v15, %v5850_v14  ;;  %v5922_v57 = vadd.f32 %v5921_v16, %v5920_v26  ;;  %v5853_v50 = vpop.f32.mrb[134].mxu0  ;;  %v5923_v7 = vpop.f32.mrb[142].mxu1 }
 0x44e   : > { %v5854_v55 = vpop.f32.mrb[135].mxu0  ;;  %v5924_v30 = vpop.f32.mrb[143].mxu1 }
 0x44f   : > { %v4397_v42 = vadd.f32 %v5922_v57, %v5852_v4  ;;  %v5855_v44 = vadd.f32 %v5854_v55, %v5853_v50  ;;  %v5925_v45 = vadd.f32 %v5924_v30, %v5923_v7 }
 0x451   : > { %v8237_v6 = vadd.f32 %v4397_v42, %v8183_v53  ;;  %v4400_v3 = vadd.f32 %v5925_v45, %v5855_v44 }
 0x453   : > { %v8240_v1 = vadd.f32 %v4400_v3, %v8186_v54  ;;  %v5856_v51 = vpop.f32.mrb[136].mxu0  ;;  %v5926_v22 = vpop.f32.mrb[144].mxu1 }
 0x454   : > { %v5857_v19 = vpop.f32.mrb[137].mxu0  ;;  %v5927_v2 = vpop.f32.mrb[145].mxu1 }
 0x455   : > { %v5858_v61 = vadd.f32 %v5857_v19, %v5856_v51  ;;  %v5928_v35 = vadd.f32 %v5927_v2, %v5926_v22  ;;  %v5859_v63 = vpop.f32.mrb[138].mxu0  ;;  %v5929_v0 = vpop.f32.mrb[146].mxu1 }
 0x456   : > { %v5860_v48 = vpop.f32.mrb[139].mxu0  ;;  %v5930_v20 = vpop.f32.mrb[147].mxu1 }
 0x457   : > { %v4405_v23 = vadd.f32 %v5928_v35, %v5858_v61  ;;  %v5861_v49 = vadd.f32 %v5860_v48, %v5859_v63  ;;  %v5931_v41 = vadd.f32 %v5930_v20, %v5929_v0 }
 0x459   : > { %v8243_v53 = vadd.f32 %v4405_v23, %v8189_v18  ;;  %v4408_v34 = vadd.f32 %v5931_v41, %v5861_v49 }
 0x45b   : > { %v8246_v54 = vadd.f32 %v4408_v34, %v8192_v59  ;;  %v5862_v46 = vpop.f32.mrb[140].mxu0  ;;  %v5932_v36 = vpop.f32.mrb[148].mxu1 }
 0x45c   : > { %v5863_v52 = vpop.f32.mrb[141].mxu0  ;;  %v5933_v33 = vpop.f32.mrb[149].mxu1 }
 0x45d   : > { %v5864_v56 = vadd.f32 %v5863_v52, %v5862_v46  ;;  %v5934_v43 = vadd.f32 %v5933_v33, %v5932_v36  ;;  %v5865_v37 = vpop.f32.mrb[142].mxu0  ;;  %v5935_v5 = vpop.f32.mrb[150].mxu1 }
 0x45e   : > { %v5866_v25 = vpop.f32.mrb[143].mxu0  ;;  %v5936_v27 = vpop.f32.mrb[151].mxu1 }
 0x45f   : > { %v4413_v28 = vadd.f32 %v5934_v43, %v5864_v56  ;;  %v5867_v11 = vadd.f32 %v5866_v25, %v5865_v37  ;;  %v5937_v12 = vadd.f32 %v5936_v27, %v5935_v5  ;;  %v8269_v37 = vld [vmem:[%s8417_s5 + $0x5] ss:$0 sm:$0xff] }
 0x461   : > { %v8249_v18 = vadd.f32 %v4413_v28, %v8195_v21  ;;  %v4416_v17 = vadd.f32 %v5937_v12, %v5867_v11 }
 0x463   : > { %v8252_v59 = vadd.f32 %v4416_v17, %v8198_v62  ;;  %v5868_v40 = vpop.f32.mrb[144].mxu0  ;;  %v5938_v13 = vpop.f32.mrb[152].mxu1  ;;  %v8279_v17 = vld [vmem:[%s8417_s5 + $0x6] ss:$0 sm:$0xff] }
 0x464   : > { %v5869_v14 = vpop.f32.mrb[145].mxu0  ;;  %v5939_v26 = vpop.f32.mrb[153].mxu1 }
 0x465   : > { %v5870_v15 = vadd.f32 %v5869_v14, %v5868_v40  ;;  %v5940_v16 = vadd.f32 %v5939_v26, %v5938_v13  ;;  %v5871_v4 = vpop.f32.mrb[146].mxu0  ;;  %v5941_v57 = vpop.f32.mrb[154].mxu1  ;;  %v4468_v40 = vadd.f32 %v8269_v37, %v8222_v8 }
 0x466   : > { %v5872_v50 = vpop.f32.mrb[147].mxu0  ;;  %v5942_v7 = vpop.f32.mrb[155].mxu1 }
 0x467   : > { %v4421_v55 = vadd.f32 %v5940_v16, %v5870_v15  ;;  %v5873_v30 = vadd.f32 %v5872_v50, %v5871_v4  ;;  %v5943_v42 = vadd.f32 %v5942_v7, %v5941_v57  ;;  %v4486_v4 = vmax.f32 %v4468_v40, 0.0 }
 0x468   : > { %v4470_v7 = vadd.f32 %v8269_v37, %v8228_v32  ;;  %v4472_v32 = vadd.f32 %v8269_v37, %v8234_v24  ;;  %v4474_v24 = vadd.f32 %v8269_v37, %v8240_v1  ;;  %v4476_v1 = vadd.f32 %v8269_v37, %v8246_v54 }
 0x469   : > { %v8255_v21 = vadd.f32 %v4421_v55, %v8201_v29  ;;  %v4424_v44 = vadd.f32 %v5943_v42, %v5873_v30  ;;  %v4478_v54 = vadd.f32 %v8269_v37, %v8252_v59 }
 0x46b   : > { %v8258_v62 = vadd.f32 %v4424_v44, %v8204_v60  ;;  %v5874_v45 = vpop.f32.mrb[148].mxu0  ;;  %v5944_v3 = vpop.f32.mrb[156].mxu1 }
 0x46c   : > { %v5875_v51 = vpop.f32.mrb[149].mxu0  ;;  %v5945_v22 = vpop.f32.mrb[157].mxu1 }
 0x46d   : > { %v5876_v19 = vadd.f32 %v5875_v51, %v5874_v45  ;;  %v5946_v2 = vadd.f32 %v5945_v22, %v5944_v3  ;;  %v5877_v61 = vpop.f32.mrb[150].mxu0  ;;  %v5947_v35 = vpop.f32.mrb[158].mxu1  ;;  %v4488_v51 = vmax.f32 %v4470_v7, 0.0  ;;  %v4480_v59 = vadd.f32 %v8269_v37, %v8258_v62 }
 0x46e   : > { %v5878_v63 = vpop.f32.mrb[151].mxu0  ;;  %v5948_v0 = vpop.f32.mrb[159].mxu1 }
 0x46f   : > { %v4429_v48 = vadd.f32 %v5946_v2, %v5876_v19  ;;  %v5879_v20 = vadd.f32 %v5878_v63, %v5877_v61  ;;  %v5949_v23 = vadd.f32 %v5948_v0, %v5947_v35 }
 0x471   : > { %v8261_v29 = vadd.f32 %v4429_v48, %v8207_v38  ;;  %v4432_v49 = vadd.f32 %v5949_v23, %v5879_v20  ;;  %v4490_v23 = vmax.f32 %v4472_v32, 0.0 }
 0x473   : > { %v8264_v60 = vadd.f32 %v4432_v49, %v8210_v58  ;;  %v5880_v41 = vpop.f32.mrb[152].mxu0  ;;  %v5950_v34 = vpop.f32.mrb[160].mxu1  ;;  %v4467_v58 = vadd.f32 %v8269_v37, %v8219_v47 }
 0x474   : > { %v5881_v46 = vpop.f32.mrb[153].mxu0  ;;  %v5951_v36 = vpop.f32.mrb[161].mxu1 }
 0x475   : > { %v5882_v52 = vadd.f32 %v5881_v46, %v5880_v41  ;;  %v5952_v33 = vadd.f32 %v5951_v36, %v5950_v34  ;;  %v5883_v56 = vpop.f32.mrb[154].mxu0  ;;  %v5953_v43 = vpop.f32.mrb[162].mxu1  ;;  %v4485_v26 = vmax.f32 %v4467_v58, 0.0  ;;  %v4482_v62 = vadd.f32 %v8269_v37, %v8264_v60 }
 0x476   : > { %v5884_v5 = vpop.f32.mrb[155].mxu0  ;;  %v5954_v38 = vpop.f32.mrb[163].mxu1 }
 0x477   : > { %v4437_v25 = vadd.f32 %v5952_v33, %v5882_v52  ;;  %v5885_v27 = vadd.f32 %v5884_v5, %v5883_v56  ;;  %v5955_v28 = vadd.f32 %v5954_v38, %v5953_v43  ;;  %v4492_v5 = vmax.f32 %v4474_v24, 0.0 }
 0x479   : > { %v8274_v11 = vadd.f32 %v4437_v25, %v8213_v10  ;;  %v4440_v12 = vadd.f32 %v5955_v28, %v5885_v27 }
 0x47b   : > { %v8284_v13 = vadd.f32 %v4440_v12, %v8216_v9  ;;  %v4607_v14 = vpop.f32.mrb[156].mxu0  ;;  %v4469_v9 = vadd.f32 %v8269_v37, %v8225_v31  ;;  %v4471_v31 = vadd.f32 %v8269_v37, %v8231_v39  ;;  %v4473_v39 = vadd.f32 %v8269_v37, %v8237_v6 }
 0x47c   : > { %v4608_v15 = vadd.f32 %v8279_v17, %v4607_v14  ;;  %v6151_v47 = vpop.f32.mrb[157].mxu0  ;;  %v4475_v6 = vadd.f32 %v8269_v37, %v8243_v53  ;;  %v4477_v53 = vadd.f32 %v8269_v37, %v8249_v18  ;;  %v4479_v18 = vadd.f32 %v8269_v37, %v8255_v21 }
 0x47d   : > { %v4610_v16 = vpop.f32.mrb[158].mxu0  ;;  %v4487_v30 = vmax.f32 %v4469_v9, 0.0  ;;  %v4489_v35 = vmax.f32 %v4471_v31, 0.0  ;;  %v4491_v36 = vmax.f32 %v4473_v39, 0.0  ;;  %v4498_v31 = vmax.f32 %v4480_v59, 0.0 }
 0x47e   : > { %v4678_v10 = vadd.f32 %v4608_v15, %v4485_v26  ;;  %v4611_v57 = vadd.f32 %v8279_v17, %v4610_v16  ;;  %v6152_v50 = vpop.f32.mrb[159].mxu0  ;;  %v4493_v58 = vmax.f32 %v4475_v6, 0.0  ;;  %v4494_v15 = vmax.f32 %v4476_v1, 0.0 }
 0x47f   : > { %v4481_v21 = vadd.f32 %v8269_v37, %v8261_v29  ;;  %v4483_v29 = vadd.f32 %v8269_v37, %v8274_v11  ;;  %v4484_v60 = vadd.f32 %v8269_v37, %v8284_v13 }
 0x480   : > { %4696 = vst [vmem:[%s8289_s20] sm:$0xff] %v4678_v10  ;;  %v4679_v8 = vadd.f32 %v4611_v57, %v4486_v4  ;;  %v4495_v57 = vmax.f32 %v4477_v53, 0.0 }
 0x482   : > { %4697 = vst [vmem:[%s8289_s20 + $0x8] sm:$0xff] %v4679_v8 }
 0x483   : > { %v4615_v55 = vpop.f32.mrb[160].mxu0 }
 0x484   : > { %v4616_v42 = vadd.f32 %v8279_v17, %v4615_v55  ;;  %v6155_v44 = vpop.f32.mrb[161].mxu0  ;;  %v4496_v55 = vmax.f32 %v4478_v54, 0.0 }
 0x485   : > { %v4618_v45 = vpop.f32.mrb[162].mxu0 }
 0x486   : > { %v4680_v3 = vadd.f32 %v4616_v42, %v4487_v30  ;;  %v4619_v22 = vadd.f32 %v8279_v17, %v4618_v45  ;;  %v6156_v19 = vpop.f32.mrb[163].mxu0 }
 0x487   : > { %v4785_v37 = vld [vmem:[%s8289_s20] sm:$0xff] (%p6764_p5) }
 0x488   : > { %4698 = vst [vmem:[%s8289_s20 + $0x10] sm:$0xff] %v4680_v3  ;;  %v4681_v2 = vadd.f32 %v4619_v22, %v4488_v51  ;;  %v4497_v3 = vmax.f32 %v4479_v18, 0.0  ;;  %4786 = vst [vmem:[%s8367_s29] sm:$0xff] (%p6764_p5), %v4785_v37 }
 0x489   : > { %v4787_v11 = vld [vmem:[%s8289_s20 + $0x8] sm:$0xff] (%p6764_p5) }
 0x48a   : > { %4699 = vst [vmem:[%s8289_s20 + $0x18] sm:$0xff] %v4681_v2  ;;  %4788 = vst [vmem:[%s8367_s29 + $0x8] sm:$0xff] (%p6764_p5), %v4787_v11 }
 0x48b   : > { %v4623_v61 = vpop.f32.mrb[164].mxu0 }
 0x48c   : > { %v4624_v63 = vadd.f32 %v8279_v17, %v4623_v61  ;;  %v6159_v0 = vpop.f32.mrb[165].mxu0 }
 0x48d   : > { %v4626_v48 = vpop.f32.mrb[166].mxu0  ;;  %v4499_v0 = vmax.f32 %v4481_v21, 0.0 }
 0x48e   : > { %v4682_v20 = vadd.f32 %v4624_v63, %v4489_v35  ;;  %v4627_v49 = vadd.f32 %v8279_v17, %v4626_v48  ;;  %v6160_v41 = vpop.f32.mrb[167].mxu0 }
 0x48f   : > { %v4500_v41 = vmax.f32 %v4482_v62, 0.0 }
 0x490   : > { %4700 = vst [vmem:[%s8289_s20 + $0x20] sm:$0xff] %v4682_v20  ;;  %v4683_v34 = vadd.f32 %v4627_v49, %v4490_v23 }
 0x491   : > { %v4791_v13 = vld [vmem:[%s8289_s20 + $0x18] sm:$0xff] (%p6764_p5) }
 0x492   : > { %4701 = vst [vmem:[%s8289_s20 + $0x28] sm:$0xff] %v4683_v34  ;;  %4792 = vst [vmem:[%s8367_s29 + $0x48] sm:$0xff] (%p6764_p5), %v4791_v13 }
 0x493   : > { %v4631_v46 = vpop.f32.mrb[168].mxu0 }
 0x494   : > { %v4632_v52 = vadd.f32 %v8279_v17, %v4631_v46  ;;  %v6163_v33 = vpop.f32.mrb[169].mxu0 }
 0x495   : > { %v4634_v56 = vpop.f32.mrb[170].mxu0 }
 0x496   : > { %v4684_v43 = vadd.f32 %v4632_v52, %v4491_v36  ;;  %v4635_v38 = vadd.f32 %v8279_v17, %v4634_v56  ;;  %v6164_v25 = vpop.f32.mrb[171].mxu0  ;;  %v4501_v36 = vmax.f32 %v4483_v29, 0.0 }
 0x497   : > { %v4793_v6 = vld [vmem:[%s8289_s20 + $0x20] sm:$0xff] (%p6764_p5) }
 0x498   : > { %4702 = vst [vmem:[%s8289_s20 + $0x30] sm:$0xff] %v4684_v43  ;;  %v4685_v27 = vadd.f32 %v4635_v38, %v4492_v5  ;;  %v4502_v5 = vmax.f32 %v4484_v60, 0.0  ;;  %4794 = vst [vmem:[%s8367_s29 + $0x80] sm:$0xff] (%p6764_p5), %v4793_v6 }
 0x499   : > { %v4795_v1 = vld [vmem:[%s8289_s20 + $0x28] sm:$0xff] (%p6764_p5) }
 0x49a   : > { %4703 = vst [vmem:[%s8289_s20 + $0x38] sm:$0xff] %v4685_v27  ;;  %4796 = vst [vmem:[%s8367_s29 + $0x88] sm:$0xff] (%p6764_p5), %v4795_v1 }
 0x49b   : > { %v4639_v28 = vpop.f32.mrb[172].mxu0 }
 0x49c   : > { %v4640_v12 = vadd.f32 %v8279_v17, %v4639_v28  ;;  %v6167_v40 = vpop.f32.mrb[173].mxu0 }
 0x49d   : > { %v4642_v14 = vpop.f32.mrb[174].mxu0 }
 0x49e   : > { %v4686_v26 = vadd.f32 %v4640_v12, %v4493_v58  ;;  %v4643_v47 = vadd.f32 %v8279_v17, %v4642_v14  ;;  %v6168_v16 = vpop.f32.mrb[175].mxu0 }
 0x49f   : > { %v4797_v28 = vld [vmem:[%s8289_s20 + $0x30] sm:$0xff] (%p6764_p5) }
 0x4a0   : > { %4704 = vst [vmem:[%s8289_s20 + $0x40] sm:$0xff] %v4686_v26  ;;  %v4687_v10 = vadd.f32 %v4643_v47, %v4494_v15  ;;  %4798 = vst [vmem:[%s8367_s29 + $0xc0] sm:$0xff] (%p6764_p5), %v4797_v28 }
 0x4a1   : > { %v4799_v58 = vld [vmem:[%s8289_s20 + $0x38] sm:$0xff] (%p6764_p5) }
 0x4a2   : > { %4705 = vst [vmem:[%s8289_s20 + $0x48] sm:$0xff] %v4687_v10  ;;  %4800 = vst [vmem:[%s8367_s29 + $0xc8] sm:$0xff] (%p6764_p5), %v4799_v58 }
 0x4a3   : > { %v4647_v4 = vpop.f32.mrb[176].mxu0 }
 0x4a4   : > { %v4648_v50 = vadd.f32 %v8279_v17, %v4647_v4  ;;  %v6171_v8 = vpop.f32.mrb[177].mxu0 }
 0x4a5   : > { %v4650_v9 = vpop.f32.mrb[178].mxu0 }
 0x4a6   : > { %v4688_v7 = vadd.f32 %v4648_v50, %v4495_v57  ;;  %v4651_v30 = vadd.f32 %v8279_v17, %v4650_v9  ;;  %v6172_v42 = vpop.f32.mrb[179].mxu0 }
 0x4a7   : > { %v4801_v12 = vld [vmem:[%s8289_s20 + $0x40] sm:$0xff] (%p6764_p5) }
 0x4a8   : > { %4706 = vst [vmem:[%s8289_s20 + $0x50] sm:$0xff] %v4688_v7  ;;  %v4689_v44 = vadd.f32 %v4651_v30, %v4496_v55  ;;  %4802 = vst [vmem:[%s8367_s29 + $0x100] sm:$0xff] (%p6764_p5), %v4801_v12 }
 0x4a9   : > { %v4803_v40 = vld [vmem:[%s8289_s20 + $0x48] sm:$0xff] (%p6764_p5) }
 0x4aa   : > { %4707 = vst [vmem:[%s8289_s20 + $0x58] sm:$0xff] %v4689_v44  ;;  %4804 = vst [vmem:[%s8367_s29 + $0x108] sm:$0xff] (%p6764_p5), %v4803_v40 }
 0x4ab   : > { %v4655_v45 = vpop.f32.mrb[180].mxu0 }
 0x4ac   : > { %v4656_v51 = vadd.f32 %v8279_v17, %v4655_v45  ;;  %v6175_v22 = vpop.f32.mrb[181].mxu0 }
 0x4ad   : > { %v4658_v19 = vpop.f32.mrb[182].mxu0 }
 0x4ae   : > { %v4690_v2 = vadd.f32 %v4656_v51, %v4497_v3  ;;  %v4659_v32 = vadd.f32 %v8279_v17, %v4658_v19  ;;  %v6176_v61 = vpop.f32.mrb[183].mxu0 }
 0x4af   : > { %v4805_v14 = vld [vmem:[%s8289_s20 + $0x50] sm:$0xff] (%p6764_p5) }
 0x4b0   : > { %4708 = vst [vmem:[%s8289_s20 + $0x60] sm:$0xff] %v4690_v2  ;;  %v4691_v35 = vadd.f32 %v4659_v32, %v4498_v31  ;;  %4806 = vst [vmem:[%s8367_s29 + $0x140] sm:$0xff] (%p6764_p5), %v4805_v14 }
 0x4b1   : > { %v4807_v26 = vld [vmem:[%s8289_s20 + $0x58] sm:$0xff] (%p6764_p5) }
 0x4b2   : > { %4709 = vst [vmem:[%s8289_s20 + $0x68] sm:$0xff] %v4691_v35  ;;  %4808 = vst [vmem:[%s8367_s29 + $0x148] sm:$0xff] (%p6764_p5), %v4807_v26 }
 0x4b3   : > { %v4663_v63 = vpop.f32.mrb[184].mxu0 }
 0x4b4   : > { %v4664_v48 = vadd.f32 %v8279_v17, %v4663_v63  ;;  %v6179_v20 = vpop.f32.mrb[185].mxu0 }
 0x4b5   : > { %v4666_v23 = vpop.f32.mrb[186].mxu0 }
 0x4b6   : > { %v4692_v49 = vadd.f32 %v4664_v48, %v4499_v0  ;;  %v4667_v34 = vadd.f32 %v8279_v17, %v4666_v23  ;;  %v6180_v39 = vpop.f32.mrb[187].mxu0 }
 0x4b7   : > { %v4809_v15 = vld [vmem:[%s8289_s20 + $0x60] sm:$0xff] (%p6764_p5) }
 0x4b8   : > { %4710 = vst [vmem:[%s8289_s20 + $0x70] sm:$0xff] %v4692_v49  ;;  %v4693_v24 = vadd.f32 %v4667_v34, %v4500_v41  ;;  %4810 = vst [vmem:[%s8367_s29 + $0x180] sm:$0xff] (%p6764_p5), %v4809_v15 }
 0x4b9   : > { %v4811_v47 = vld [vmem:[%s8289_s20 + $0x68] sm:$0xff] (%p6764_p5) }
 0x4ba   : > { %4711 = vst [vmem:[%s8289_s20 + $0x78] sm:$0xff] %v4693_v24  ;;  %4812 = vst [vmem:[%s8367_s29 + $0x188] sm:$0xff] (%p6764_p5), %v4811_v47 }
 0x4bb   : > { %v4671_v46 = vpop.f32.mrb[188].mxu0 }
 0x4bc   : > { %v4672_v52 = vadd.f32 %v8279_v17, %v4671_v46  ;;  %v6183_v33 = vpop.f32.mrb[189].mxu0  ;;  %4720 = sbr.rel (!%p6764_p5) target bundleno = 1227 (0x4cb), region = 86 }
 0x4bd   : > { %v4674_v56 = vpop.f32.mrb[190].mxu0 }
 0x4be   : > { %v4694_v43 = vadd.f32 %v4672_v52, %v4501_v36  ;;  %v4675_v38 = vadd.f32 %v8279_v17, %v4674_v56  ;;  %v6184_v25 = vpop.f32.mrb[191].mxu0  ;;  %v4789_v17 = vld [vmem:[%s8289_s20 + $0x10] sm:$0xff] (%p6764_p5) }
 0x4bf   : > { %4790 = vst [vmem:[%s8367_s29 + $0x40] sm:$0xff] (%p6764_p5), %v4789_v17  ;;  %v4813_v16 = vld [vmem:[%s8289_s20 + $0x70] sm:$0xff] (%p6764_p5) }
 0x4c0   : > { %4712 = vst [vmem:[%s8289_s20 + $0x80] sm:$0xff] %v4694_v43  ;;  %v4695_v27 = vadd.f32 %v4675_v38, %v4502_v5  ;;  %4814 = vst [vmem:[%s8367_s29 + $0x1c0] sm:$0xff] (%p6764_p5), %v4813_v16 }
 0x4c1   : > { %v4815_v10 = vld [vmem:[%s8289_s20 + $0x78] sm:$0xff] (%p6764_p5) }
 0x4c2   : > { %4713 = vst [vmem:[%s8289_s20 + $0x88] sm:$0xff] %v4695_v27  ;;  %4816 = vst [vmem:[%s8367_s29 + $0x1c8] sm:$0xff] (%p6764_p5), %v4815_v10 }
 0x4c7   : > { %v4817_v53 = vld [vmem:[%s8289_s20 + $0x80] sm:$0xff] }
 0x4c8   : > { %4818 = vst [vmem:[%s8367_s29 + $0x200] sm:$0xff] %v4817_v53 }
 0x4c9   : > { %v4819_v54 = vld [vmem:[%s8289_s20 + $0x88] sm:$0xff] }
 0x4ca   : > { %4820 = vst [vmem:[%s8367_s29 + $0x208] sm:$0xff] %v4819_v54 }
 0x4cb PF: > { %p13_p10 = scmp.ge.s32.totalorder %s6751_s25, 6   ;;  %s8426_s21 = smov %s6690_s22 }
 0x4cc   : > { %s8427_s22 = smov %s6762_s28  ;;  %s8428_s23 = smov %s6751_s25 }
 0x4cd   :  { %15 = sbr.rel (!%p13_p10) target bundleno = 2 (0x2), region = 173 }

</bundles_post_ra>
